<compile_context>
chip_gen: v5e
topology: v5e:2x2
jax: 0.10.0
libtpu: 0.0.40
codegen_flags: <defaults>
</compile_context>

<pallas_src>
import functools

import numpy as np
import jax
import jax.numpy as jnp
from jax import lax
from jax.experimental import pallas as pl
from jax.experimental.pallas import tpu as pltpu


# Tap order is (dy, dx) with k = dy*3 + dx, matching the weight fold below.
_TAPS = tuple((dy, dx) for dy in range(3) for dx in range(3))
_CENTER = 4  # (dy, dx) == (1, 1)


def _fe2_branch_kernel(col_ref, w1_ref, s1_ref, b1_ref, w2_ref, s2_ref, b2_ref,
                       out_ref, acc_pad, *, n, h, w):
    """One (branch, MID-chunk) grid step of FeatureExtractor2.

    col_ref : (1, M, 9*Cin)      bf16  im2col'd conv1 input (M = N*H*W)
    w1_ref  : (1, 9*Cin, CT)     bf16  conv1 weight chunk (taps folded into K)
    s1/b1   : (1, 1, CT)         f32   folded BN1 scale / bias chunk
    w2_ref  : (1, 9, CT, OUT)    bf16  conv2 weight chunk, per tap
    s2/b2   : (1, 1, OUT)        f32   folded BN2 scale / bias
    out_ref : (N, H, W, OUT)           channel block b of the concat output
    acc_pad : VMEM (N, H+2, W+2, OUT) f32  halo-padded conv2 accumulator
    """
    t = pl.program_id(1)                    # MID-chunk index (innermost axis)
    last = pl.num_programs(1) - 1
    N, H, W = n, h, w
    OUT = out_ref.shape[-1]

    # ---- conv1 (this CT-wide channel chunk) + BN1 + ReLU, kept in regs ------
    y1 = jnp.dot(col_ref[0], w1_ref[0], preferred_element_type=jnp.float32)
    y1 = jnp.maximum(y1 * s1_ref[0] + b1_ref[0], 0.0)
    h1 = y1.astype(w2_ref.dtype)            # (M, CT) bf16, never touches HBM

    # ---- conv2 partial contraction over this chunk ---------------------------
    # Nine tap matmuls on the aligned (M, CT) block; the (M, OUT) f32 results
    # are shift-accumulated into the halo-padded accumulator.  Destination
    # window for tap (dy, dx) is acc_pad[:, 2-dy : 2-dy+H, 2-dx : 2-dx+W, :];
    # the 1-wide halo catches contributions that fall outside the output.
    def tap(k):
        y = jnp.dot(h1, w2_ref[0, k], preferred_element_type=jnp.float32)
        return y.reshape(N, H, W, OUT)

    # Centre tap writes exactly the interior: use it to initialise the
    # accumulator on the first chunk (no zero-fill of the scratch, ever).
    yc = tap(_CENTER)

    @pl.when(t == 0)
    def _():
        acc_pad[:, 1:1 + H, 1:1 + W, :] = yc

    @pl.when(t != 0)
    def _():
        acc_pad[:, 1:1 + H, 1:1 + W, :] += yc

    for k, (dy, dx) in enumerate(_TAPS):
        if k == _CENTER:
            continue
        oy, ox = 2 - dy, 2 - dx
        acc_pad[:, oy:oy + H, ox:ox + W, :] += tap(k)

    # ---- BN2 + ReLU epilogue, lane-dense 128-channel output store -----------
    @pl.when(t == last)
    def _():
        res = acc_pad[:, 1:1 + H, 1:1 + W, :]
        res = jnp.maximum(res * s2_ref[0] + b2_ref[0], 0.0)
        out_ref[...] = res.astype(out_ref.dtype)


def _fold_branch(p, eps, compute_dtype):
    """Fold BN (inference) into scale/bias and reshape weights for the kernel."""
    MID, Cin = p["w1"].shape[0], p["w1"].shape[1]
    OUT = p["w2"].shape[0]
    s1 = p["bn1_gamma"] / jnp.sqrt(p["bn1_var"] + eps)
    b1 = p["bn1_beta"] - p["bn1_mean"] * s1
    s2 = p["bn2_gamma"] / jnp.sqrt(p["bn2_var"] + eps)
    b2 = p["bn2_beta"] - p["bn2_mean"] * s2
    # (Cout, Cin, 3, 3) -> (ky, kx, Cin, Cout); K index = (ky*3 + kx)*Cin + c.
    w1 = jnp.transpose(p["w1"], (2, 3, 1, 0)).reshape(9 * Cin, MID)
    w2 = jnp.transpose(p["w2"], (2, 3, 1, 0)).reshape(9, MID, OUT)
    return (w1.astype(compute_dtype),
            s1.reshape(1, MID).astype(jnp.float32),
            b1.reshape(1, MID).astype(jnp.float32),
            w2.astype(compute_dtype),
            s2.reshape(1, OUT).astype(jnp.float32),
            b2.reshape(1, OUT).astype(jnp.float32))


def _im2col(x_nchw, compute_dtype):
    """NCHW -> (N*H*W, 9*Cin) im2col in compute_dtype (tap order dy*3+dx)."""
    N, Cin, H, W = x_nchw.shape
    x = jnp.transpose(x_nchw, (0, 2, 3, 1)).astype(compute_dtype)
    xp = jnp.pad(x, ((0, 0), (1, 1), (1, 1), (0, 0)))
    cols = [xp[:, dy:dy + H, dx:dx + W, :] for dy, dx in _TAPS]
    return jnp.concatenate(cols, axis=-1).reshape(N * H * W, 9 * Cin)


def _vmem_limit_bytes(N, H, W, Cin, MID, OUT, ct, compute_dtype, out_dtype):
    """Explicit VMEM budget: double-buffered blocks + scratch, with margin."""
    M = N * H * W
    cb = np.dtype(compute_dtype).itemsize
    ob = np.dtype(out_dtype).itemsize
    f32 = 4
    rnd8 = lambda v: (v + 7) // 8 * 8
    db = 2  # BlockSpec double-buffering
    est = (db * M * 9 * Cin * cb            # col block
           + db * 9 * Cin * ct * cb         # w1 chunk
           + db * 2 * ct * f32              # s1, b1 chunks
           + db * 9 * ct * OUT * cb         # w2 chunk
           + db * 2 * OUT * f32             # s2, b2
           + db * M * OUT * ob              # output block
           + N * (H + 2) * rnd8(W + 2) * OUT * f32)   # acc_pad scratch
    # At least the usual 32 MiB scoped default, at most v7x's 64 MiB physical.
    return int(min(max(2 * est + (2 << 20), 32 << 20), 64 << 20))


def feature_extractor2(gx_nchw, lx_nchw, params_g, params_l, *,
                       compute_dtype=jnp.bfloat16, out_dtype=jnp.float32,
                       ct=256, eps=1e-5):
    """Forward pass of FeatureExtractor2. Inputs/outputs are NCHW like PyTorch."""
    N, Cin, H, W = gx_nchw.shape
    MID = params_g["w1"].shape[0]
    OUT = params_g["w2"].shape[0]
    ct = min(ct, MID)
    assert OUT % 128 == 0 and ct % 128 == 0 and MID % ct == 0
    M = N * H * W

    # im2col + bf16 cast once in the wrapper (the raw input is tiny; this is
    # free layout plumbing) so the kernel never touches Cin-wide slices.
    col = jnp.stack([_im2col(gx_nchw, compute_dtype),
                     _im2col(lx_nchw, compute_dtype)], axis=0)

    fg = _fold_branch(params_g, eps, compute_dtype)
    fl = _fold_branch(params_l, eps, compute_dtype)
    w1, s1, b1, w2, s2, b2 = [jnp.stack([a, b]) for a, b in zip(fg, fl)]

    kernel = functools.partial(_fe2_branch_kernel, n=N, h=H, w=W)
    n_chunks = MID // ct

    out_nhwc = pl.pallas_call(
        kernel,
        out_shape=jax.ShapeDtypeStruct((N, H, W, 2 * OUT), out_dtype),
        grid_spec=pltpu.PrefetchScalarGridSpec(
            num_scalar_prefetch=0,
            grid=(2, n_chunks),   # (branch, MID chunk); chunk axis innermost
            in_specs=[
                pl.BlockSpec((1, M, 9 * Cin), lambda b, t: (b, 0, 0)),
                pl.BlockSpec((1, 9 * Cin, ct), lambda b, t: (b, 0, t)),
                pl.BlockSpec((1, 1, ct), lambda b, t: (b, 0, t)),
                pl.BlockSpec((1, 1, ct), lambda b, t: (b, 0, t)),
                pl.BlockSpec((1, 9, ct, OUT), lambda b, t: (b, 0, t, 0)),
                pl.BlockSpec((1, 1, OUT), lambda b, t: (b, 0, 0)),
                pl.BlockSpec((1, 1, OUT), lambda b, t: (b, 0, 0)),
            ],
            # Channel concat realised here: branch b writes channel block b.
            out_specs=pl.BlockSpec((N, H, W, OUT), lambda b, t: (0, 0, 0, b)),
            scratch_shapes=[
                pltpu.VMEM((N, H + 2, W + 2, OUT), jnp.float32),
            ],
        ),
        compiler_params=pltpu.CompilerParams(
            dimension_semantics=("parallel", "arbitrary"),
            vmem_limit_bytes=_vmem_limit_bytes(
                N, H, W, Cin, MID, OUT, ct, compute_dtype, out_dtype)),
    )(col, w1, s1, b1, w2, s2, b2)

    # Single NHWC -> NCHW transpose on the fused, already-concatenated result.
    return jnp.transpose(out_nhwc, (0, 3, 1, 2))


def init_double_conv_params(key, in_ch, out_ch, mid_ch):
    """Deterministic param init matching DoubleConv's shapes."""
    k1, k2, k3, k4, k5, k6, k7, k8 = jax.random.split(key, 8)
    return {
        "w1": jax.random.normal(k1, (mid_ch, in_ch, 3, 3), jnp.float32) * 0.05,
        "bn1_gamma": 1.0 + 0.1 * jax.random.normal(k2, (mid_ch,), jnp.float32),
        "bn1_beta": 0.1 * jax.random.normal(k3, (mid_ch,), jnp.float32),
        "bn1_mean": 0.01 * jax.random.normal(k4, (mid_ch,), jnp.float32),
        "bn1_var": jnp.abs(1.0 + 0.1 * jax.random.normal(k5, (mid_ch,), jnp.float32)),
        "w2": jax.random.normal(k6, (out_ch, mid_ch, 3, 3), jnp.float32) * 0.05,
        "bn2_gamma": 1.0 + 0.1 * jax.random.normal(k7, (out_ch,), jnp.float32),
        "bn2_beta": 0.1 * jax.random.normal(k8, (out_ch,), jnp.float32),
        "bn2_mean": jnp.zeros((out_ch,), jnp.float32),
        "bn2_var": jnp.ones((out_ch,), jnp.float32),
    }


# ---------------- pure-JAX references (for correctness checks) ----------------
def _ref_conv_bn_relu(x_nhwc, w_oihw, gamma, beta, mean, var, eps=1e-5,
                      matmul_dtype=jnp.float32):
    w_hwio = jnp.transpose(w_oihw, (2, 3, 1, 0))
    y = lax.conv_general_dilated(
        x_nhwc.astype(matmul_dtype), w_hwio.astype(matmul_dtype),
        window_strides=(1, 1), padding=((1, 1), (1, 1)),
        dimension_numbers=("NHWC", "HWIO", "NHWC"),
        preferred_element_type=jnp.float32)
    y = (y - mean) / jnp.sqrt(var + eps) * gamma + beta
    return jnp.maximum(y, 0.0)


def _ref_double_conv(x_nhwc, p, matmul_dtype):
    h = _ref_conv_bn_relu(x_nhwc, p["w1"], p["bn1_gamma"], p["bn1_beta"],
                          p["bn1_mean"], p["bn1_var"], matmul_dtype=matmul_dtype)
    return _ref_conv_bn_relu(h, p["w2"], p["bn2_gamma"], p["bn2_beta"],
                             p["bn2_mean"], p["bn2_var"], matmul_dtype=matmul_dtype)


def _ref_feature_extractor2(gx_nchw, lx_nchw, pg, plp, matmul_dtype=jnp.float32):
    gx = jnp.transpose(gx_nchw, (0, 2, 3, 1))
    lx = jnp.transpose(lx_nchw, (0, 2, 3, 1))
    g = jnp.transpose(_ref_double_conv(gx, pg, matmul_dtype), (0, 3, 1, 2))
    l = jnp.transpose(_ref_double_conv(lx, plp, matmul_dtype), (0, 3, 1, 2))
    return jnp.concatenate([g, l], axis=1)


if __name__ == "__main__":
    # Small shapes consistent with the module: n_channels is configurable,
    # mid=512 / out=128 are hard-coded by FeatureExtractor2.
    N, C_IN, H, W = 2, 16, 8, 8
    MID, OUT = 512, 128

    key = jax.random.PRNGKey(0)
    k_g, k_l, k_gx, k_lx = jax.random.split(key, 4)

    params_g = init_double_conv_params(k_g, C_IN, OUT, MID)
    params_l = init_double_conv_params(k_l, C_IN, OUT, MID)

    gx = jax.random.normal(k_gx, (N, C_IN, H, W), jnp.float32)
    lx = jax.random.normal(k_lx, (N, C_IN, H, W), jnp.float32)

    fe2 = jax.jit(feature_extractor2)
    out = jax.block_until_ready(fe2(gx, lx, params_g, params_l))
    assert out.shape == (N, 2 * OUT, H, W), out.shape

    # Tight check vs a reference that also uses bf16 matmul inputs / f32 accum
    # (isolates kernel logic from the deliberate bf16-MXU precision choice).
    ref_bf16 = jax.block_until_ready(
        _ref_feature_extractor2(gx, lx, params_g, params_l,
                                matmul_dtype=jnp.bfloat16))
    err_b = float(jnp.max(jnp.abs(out - ref_bf16)))
    assert jnp.allclose(out, ref_bf16, atol=2e-3, rtol=2e-3), err_b

    # Loose sanity check vs the full-f32 reference (difference is only the
    # bf16 rounding of the MXU inputs).
    ref_f32 = jax.block_until_ready(
        _ref_feature_extractor2(gx, lx, params_g, params_l))
    err_f = float(jnp.max(jnp.abs(out - ref_f32)))
    assert jnp.allclose(out, ref_f32, atol=1e-1, rtol=5e-2), err_f

    print("KERNEL_OK")
</pallas_src>

<mosaic_0001>
module attributes {stable_mosaic.version = 11 : i64} {
  func.func @_fe2_branch_kernel(%arg0: i32, %arg1: i32, %arg2: memref<1x128x144xbf16, #tpu.memory_space<vmem>>, %arg3: memref<1x144x256xbf16, #tpu.memory_space<vmem>>, %arg4: memref<1x1x256xf32, #tpu.memory_space<vmem>>, %arg5: memref<1x1x256xf32, #tpu.memory_space<vmem>>, %arg6: memref<1x9x256x128xbf16, #tpu.memory_space<vmem>>, %arg7: memref<1x1x128xf32, #tpu.memory_space<vmem>>, %arg8: memref<1x1x128xf32, #tpu.memory_space<vmem>>, %arg9: memref<2x8x8x128xf32, #tpu.memory_space<vmem>>, %arg10: memref<2x10x10x128xf32, #tpu.memory_space<vmem>>) attributes {dimension_semantics = [#tpu.dimension_semantics<parallel>, #tpu.dimension_semantics<arbitrary>], iteration_bounds = array<i64: 2, 2>, scalar_prefetch = 0 : i64, scratch_operands = 1 : i64, tpu.core_type = #tpu.core_type<tc>, window_params = [{transform_indices = @transform_0, window_bounds = array<i64: 1, 128, 144>}, {transform_indices = @transform_1, window_bounds = array<i64: 1, 144, 256>}, {transform_indices = @transform_2, window_bounds = array<i64: 1, 1, 256>}, {transform_indices = @transform_3, window_bounds = array<i64: 1, 1, 256>}, {transform_indices = @transform_4, window_bounds = array<i64: 1, 9, 256, 128>}, {transform_indices = @transform_5, window_bounds = array<i64: 1, 1, 128>}, {transform_indices = @transform_6, window_bounds = array<i64: 1, 1, 128>}, {transform_indices = @transform_7, window_bounds = array<i64: 2, 8, 8, 128>}]} {
    %c0 = arith.constant 0 : index
    %c0_0 = arith.constant 0 : index
    %c0_1 = arith.constant 0 : index
    %0 = vector.load %arg2[%c0, %c0_0, %c0_1] : memref<1x128x144xbf16, #tpu.memory_space<vmem>>, vector<1x128x144xbf16>
    %1 = vector.shape_cast %0 : vector<1x128x144xbf16> to vector<128x144xbf16>
    %c0_2 = arith.constant 0 : index
    %c0_3 = arith.constant 0 : index
    %c0_4 = arith.constant 0 : index
    %2 = vector.load %arg3[%c0_2, %c0_3, %c0_4] : memref<1x144x256xbf16, #tpu.memory_space<vmem>>, vector<1x144x256xbf16>
    %3 = vector.shape_cast %2 : vector<1x144x256xbf16> to vector<144x256xbf16>
    %cst = arith.constant dense<0.000000e+00> : vector<128x256xf32>
    %4 = tpu.matmul %1, %3, %cst {dimension_numbers = #tpu.dot_dimension_numbers<[1], [0], [0], [1], [0, 0, 1, 1], [], []>} : vector<128x144xbf16>, vector<144x256xbf16>, vector<128x256xf32> -> vector<128x256xf32>
    %c0_5 = arith.constant 0 : index
    %c0_6 = arith.constant 0 : index
    %c0_7 = arith.constant 0 : index
    %5 = vector.load %arg4[%c0_5, %c0_6, %c0_7] : memref<1x1x256xf32, #tpu.memory_space<vmem>>, vector<1x1x256xf32>
    %6 = vector.shape_cast %5 : vector<1x1x256xf32> to vector<1x256xf32>
    %7 = vector.broadcast %6 : vector<1x256xf32> to vector<128x256xf32>
    %8 = arith.mulf %4, %7 : vector<128x256xf32>
    %c0_8 = arith.constant 0 : index
    %c0_9 = arith.constant 0 : index
    %c0_10 = arith.constant 0 : index
    %9 = vector.load %arg5[%c0_8, %c0_9, %c0_10] : memref<1x1x256xf32, #tpu.memory_space<vmem>>, vector<1x1x256xf32>
    %10 = vector.shape_cast %9 : vector<1x1x256xf32> to vector<1x256xf32>
    %11 = vector.broadcast %10 : vector<1x256xf32> to vector<128x256xf32>
    %12 = arith.addf %8, %11 : vector<128x256xf32>
    %cst_11 = arith.constant 0.000000e+00 : f32
    %13 = vector.broadcast %cst_11 : f32 to vector<128x256xf32>
    %14 = arith.maximumf %12, %13 : vector<128x256xf32>
    %15 = arith.truncf %14 : vector<128x256xf32> to vector<128x256xbf16>
    %c0_12 = arith.constant 0 : index
    %c4 = arith.constant 4 : index
    %c0_13 = arith.constant 0 : index
    %c0_14 = arith.constant 0 : index
    %16 = vector.load %arg6[%c0_12, %c4, %c0_13, %c0_14] : memref<1x9x256x128xbf16, #tpu.memory_space<vmem>>, vector<1x1x256x128xbf16>
    %17 = vector.shape_cast %16 : vector<1x1x256x128xbf16> to vector<256x128xbf16>
    %cst_15 = arith.constant dense<0.000000e+00> : vector<128x128xf32>
    %18 = tpu.matmul %15, %17, %cst_15 {dimension_numbers = #tpu.dot_dimension_numbers<[1], [0], [0], [1], [0, 0, 1, 1], [], []>} : vector<128x256xbf16>, vector<256x128xbf16>, vector<128x128xf32> -> vector<128x128xf32>
    %19 = vector.shape_cast %18 : vector<128x128xf32> to vector<2x8x8x128xf32>
    %c0_i32 = arith.constant 0 : i32
    %20 = arith.cmpi eq, %arg1, %c0_i32 : i32
    %21 = arith.extui %20 : i1 to i32
    %c0_i32_16 = arith.constant 0 : i32
    %22 = arith.cmpi ne, %21, %c0_i32_16 : i32
    scf.if %22 {
      %c0_117 = arith.constant 0 : index
      %c1_118 = arith.constant 1 : index
      %c1_119 = arith.constant 1 : index
      %c0_120 = arith.constant 0 : index
      %85 = vector.load %arg10[%c0_117, %c1_118, %c1_119, %c0_120] : memref<2x10x10x128xf32, #tpu.memory_space<vmem>>, vector<2x8x8x128xf32>
      tpu.vector_store %arg10[%c0_117, %c1_118, %c1_119, %c0_120], %19 {strides = array<i32>} : memref<2x10x10x128xf32, #tpu.memory_space<vmem>>, vector<2x8x8x128xf32>,
    } else {
    }
    %c0_i32_17 = arith.constant 0 : i32
    %23 = arith.cmpi ne, %arg1, %c0_i32_17 : i32
    %24 = arith.extui %23 : i1 to i32
    %c0_i32_18 = arith.constant 0 : i32
    %25 = arith.cmpi ne, %24, %c0_i32_18 : i32
    scf.if %25 {
      %c0_117 = arith.constant 0 : index
      %c1_118 = arith.constant 1 : index
      %c1_119 = arith.constant 1 : index
      %c0_120 = arith.constant 0 : index
      %85 = vector.load %arg10[%c0_117, %c1_118, %c1_119, %c0_120] : memref<2x10x10x128xf32, #tpu.memory_space<vmem>>, vector<2x8x8x128xf32>
      %86 = arith.addf %85, %19 : vector<2x8x8x128xf32>
      %c0_121 = arith.constant 0 : index
      %c1_122 = arith.constant 1 : index
      %c1_123 = arith.constant 1 : index
      %c0_124 = arith.constant 0 : index
      %87 = vector.load %arg10[%c0_121, %c1_122, %c1_123, %c0_124] : memref<2x10x10x128xf32, #tpu.memory_space<vmem>>, vector<2x8x8x128xf32>
      tpu.vector_store %arg10[%c0_121, %c1_122, %c1_123, %c0_124], %86 {strides = array<i32>} : memref<2x10x10x128xf32, #tpu.memory_space<vmem>>, vector<2x8x8x128xf32>,
    } else {
    }
    %c0_19 = arith.constant 0 : index
    %c2 = arith.constant 2 : index
    %c2_20 = arith.constant 2 : index
    %c0_21 = arith.constant 0 : index
    %26 = vector.load %arg10[%c0_19, %c2, %c2_20, %c0_21] : memref<2x10x10x128xf32, #tpu.memory_space<vmem>>, vector<2x8x8x128xf32>
    %c0_22 = arith.constant 0 : index
    %c0_23 = arith.constant 0 : index
    %c0_24 = arith.constant 0 : index
    %c0_25 = arith.constant 0 : index
    %27 = vector.load %arg6[%c0_22, %c0_23, %c0_24, %c0_25] : memref<1x9x256x128xbf16, #tpu.memory_space<vmem>>, vector<1x1x256x128xbf16>
    %28 = vector.shape_cast %27 : vector<1x1x256x128xbf16> to vector<256x128xbf16>
    %cst_26 = arith.constant dense<0.000000e+00> : vector<128x128xf32>
    %29 = tpu.matmul %15, %28, %cst_26 {dimension_numbers = #tpu.dot_dimension_numbers<[1], [0], [0], [1], [0, 0, 1, 1], [], []>} : vector<128x256xbf16>, vector<256x128xbf16>, vector<128x128xf32> -> vector<128x128xf32>
    %30 = vector.shape_cast %29 : vector<128x128xf32> to vector<2x8x8x128xf32>
    %31 = arith.addf %26, %30 : vector<2x8x8x128xf32>
    %c0_27 = arith.constant 0 : index
    %c2_28 = arith.constant 2 : index
    %c2_29 = arith.constant 2 : index
    %c0_30 = arith.constant 0 : index
    %32 = vector.load %arg10[%c0_27, %c2_28, %c2_29, %c0_30] : memref<2x10x10x128xf32, #tpu.memory_space<vmem>>, vector<2x8x8x128xf32>
    tpu.vector_store %arg10[%c0_27, %c2_28, %c2_29, %c0_30], %31 {strides = array<i32>} : memref<2x10x10x128xf32, #tpu.memory_space<vmem>>, vector<2x8x8x128xf32>,
    %c0_31 = arith.constant 0 : index
    %c2_32 = arith.constant 2 : index
    %c1 = arith.constant 1 : index
    %c0_33 = arith.constant 0 : index
    %33 = vector.load %arg10[%c0_31, %c2_32, %c1, %c0_33] : memref<2x10x10x128xf32, #tpu.memory_space<vmem>>, vector<2x8x8x128xf32>
    %c0_34 = arith.constant 0 : index
    %c1_35 = arith.constant 1 : index
    %c0_36 = arith.constant 0 : index
    %c0_37 = arith.constant 0 : index
    %34 = vector.load %arg6[%c0_34, %c1_35, %c0_36, %c0_37] : memref<1x9x256x128xbf16, #tpu.memory_space<vmem>>, vector<1x1x256x128xbf16>
    %35 = vector.shape_cast %34 : vector<1x1x256x128xbf16> to vector<256x128xbf16>
    %cst_38 = arith.constant dense<0.000000e+00> : vector<128x128xf32>
    %36 = tpu.matmul %15, %35, %cst_38 {dimension_numbers = #tpu.dot_dimension_numbers<[1], [0], [0], [1], [0, 0, 1, 1], [], []>} : vector<128x256xbf16>, vector<256x128xbf16>, vector<128x128xf32> -> vector<128x128xf32>
    %37 = vector.shape_cast %36 : vector<128x128xf32> to vector<2x8x8x128xf32>
    %38 = arith.addf %33, %37 : vector<2x8x8x128xf32>
    %c0_39 = arith.constant 0 : index
    %c2_40 = arith.constant 2 : index
    %c1_41 = arith.constant 1 : index
    %c0_42 = arith.constant 0 : index
    %39 = vector.load %arg10[%c0_39, %c2_40, %c1_41, %c0_42] : memref<2x10x10x128xf32, #tpu.memory_space<vmem>>, vector<2x8x8x128xf32>
    tpu.vector_store %arg10[%c0_39, %c2_40, %c1_41, %c0_42], %38 {strides = array<i32>} : memref<2x10x10x128xf32, #tpu.memory_space<vmem>>, vector<2x8x8x128xf32>,
    %c0_43 = arith.constant 0 : index
    %c2_44 = arith.constant 2 : index
    %c0_45 = arith.constant 0 : index
    %c0_46 = arith.constant 0 : index
    %40 = vector.load %arg10[%c0_43, %c2_44, %c0_45, %c0_46] : memref<2x10x10x128xf32, #tpu.memory_space<vmem>>, vector<2x8x8x128xf32>
    %c0_47 = arith.constant 0 : index
    %c2_48 = arith.constant 2 : index
    %c0_49 = arith.constant 0 : index
    %c0_50 = arith.constant 0 : index
    %41 = vector.load %arg6[%c0_47, %c2_48, %c0_49, %c0_50] : memref<1x9x256x128xbf16, #tpu.memory_space<vmem>>, vector<1x1x256x128xbf16>
    %42 = vector.shape_cast %41 : vector<1x1x256x128xbf16> to vector<256x128xbf16>
    %cst_51 = arith.constant dense<0.000000e+00> : vector<128x128xf32>
    %43 = tpu.matmul %15, %42, %cst_51 {dimension_numbers = #tpu.dot_dimension_numbers<[1], [0], [0], [1], [0, 0, 1, 1], [], []>} : vector<128x256xbf16>, vector<256x128xbf16>, vector<128x128xf32> -> vector<128x128xf32>
    %44 = vector.shape_cast %43 : vector<128x128xf32> to vector<2x8x8x128xf32>
    %45 = arith.addf %40, %44 : vector<2x8x8x128xf32>
    %c0_52 = arith.constant 0 : index
    %c2_53 = arith.constant 2 : index
    %c0_54 = arith.constant 0 : index
    %c0_55 = arith.constant 0 : index
    %46 = vector.load %arg10[%c0_52, %c2_53, %c0_54, %c0_55] : memref<2x10x10x128xf32, #tpu.memory_space<vmem>>, vector<2x8x8x128xf32>
    tpu.vector_store %arg10[%c0_52, %c2_53, %c0_54, %c0_55], %45 {strides = array<i32>} : memref<2x10x10x128xf32, #tpu.memory_space<vmem>>, vector<2x8x8x128xf32>,
    %c0_56 = arith.constant 0 : index
    %c1_57 = arith.constant 1 : index
    %c2_58 = arith.constant 2 : index
    %c0_59 = arith.constant 0 : index
    %47 = vector.load %arg10[%c0_56, %c1_57, %c2_58, %c0_59] : memref<2x10x10x128xf32, #tpu.memory_space<vmem>>, vector<2x8x8x128xf32>
    %c0_60 = arith.constant 0 : index
    %c3 = arith.constant 3 : index
    %c0_61 = arith.constant 0 : index
    %c0_62 = arith.constant 0 : index
    %48 = vector.load %arg6[%c0_60, %c3, %c0_61, %c0_62] : memref<1x9x256x128xbf16, #tpu.memory_space<vmem>>, vector<1x1x256x128xbf16>
    %49 = vector.shape_cast %48 : vector<1x1x256x128xbf16> to vector<256x128xbf16>
    %cst_63 = arith.constant dense<0.000000e+00> : vector<128x128xf32>
    %50 = tpu.matmul %15, %49, %cst_63 {dimension_numbers = #tpu.dot_dimension_numbers<[1], [0], [0], [1], [0, 0, 1, 1], [], []>} : vector<128x256xbf16>, vector<256x128xbf16>, vector<128x128xf32> -> vector<128x128xf32>
    %51 = vector.shape_cast %50 : vector<128x128xf32> to vector<2x8x8x128xf32>
    %52 = arith.addf %47, %51 : vector<2x8x8x128xf32>
    %c0_64 = arith.constant 0 : index
    %c1_65 = arith.constant 1 : index
    %c2_66 = arith.constant 2 : index
    %c0_67 = arith.constant 0 : index
    %53 = vector.load %arg10[%c0_64, %c1_65, %c2_66, %c0_67] : memref<2x10x10x128xf32, #tpu.memory_space<vmem>>, vector<2x8x8x128xf32>
    tpu.vector_store %arg10[%c0_64, %c1_65, %c2_66, %c0_67], %52 {strides = array<i32>} : memref<2x10x10x128xf32, #tpu.memory_space<vmem>>, vector<2x8x8x128xf32>,
    %c0_68 = arith.constant 0 : index
    %c1_69 = arith.constant 1 : index
    %c0_70 = arith.constant 0 : index
    %c0_71 = arith.constant 0 : index
    %54 = vector.load %arg10[%c0_68, %c1_69, %c0_70, %c0_71] : memref<2x10x10x128xf32, #tpu.memory_space<vmem>>, vector<2x8x8x128xf32>
    %c0_72 = arith.constant 0 : index
    %c5 = arith.constant 5 : index
    %c0_73 = arith.constant 0 : index
    %c0_74 = arith.constant 0 : index
    %55 = vector.load %arg6[%c0_72, %c5, %c0_73, %c0_74] : memref<1x9x256x128xbf16, #tpu.memory_space<vmem>>, vector<1x1x256x128xbf16>
    %56 = vector.shape_cast %55 : vector<1x1x256x128xbf16> to vector<256x128xbf16>
    %cst_75 = arith.constant dense<0.000000e+00> : vector<128x128xf32>
    %57 = tpu.matmul %15, %56, %cst_75 {dimension_numbers = #tpu.dot_dimension_numbers<[1], [0], [0], [1], [0, 0, 1, 1], [], []>} : vector<128x256xbf16>, vector<256x128xbf16>, vector<128x128xf32> -> vector<128x128xf32>
    %58 = vector.shape_cast %57 : vector<128x128xf32> to vector<2x8x8x128xf32>
    %59 = arith.addf %54, %58 : vector<2x8x8x128xf32>
    %c0_76 = arith.constant 0 : index
    %c1_77 = arith.constant 1 : index
    %c0_78 = arith.constant 0 : index
    %c0_79 = arith.constant 0 : index
    %60 = vector.load %arg10[%c0_76, %c1_77, %c0_78, %c0_79] : memref<2x10x10x128xf32, #tpu.memory_space<vmem>>, vector<2x8x8x128xf32>
    tpu.vector_store %arg10[%c0_76, %c1_77, %c0_78, %c0_79], %59 {strides = array<i32>} : memref<2x10x10x128xf32, #tpu.memory_space<vmem>>, vector<2x8x8x128xf32>,
    %c0_80 = arith.constant 0 : index
    %c0_81 = arith.constant 0 : index
    %c2_82 = arith.constant 2 : index
    %c0_83 = arith.constant 0 : index
    %61 = vector.load %arg10[%c0_80, %c0_81, %c2_82, %c0_83] : memref<2x10x10x128xf32, #tpu.memory_space<vmem>>, vector<2x8x8x128xf32>
    %c0_84 = arith.constant 0 : index
    %c6 = arith.constant 6 : index
    %c0_85 = arith.constant 0 : index
    %c0_86 = arith.constant 0 : index
    %62 = vector.load %arg6[%c0_84, %c6, %c0_85, %c0_86] : memref<1x9x256x128xbf16, #tpu.memory_space<vmem>>, vector<1x1x256x128xbf16>
    %63 = vector.shape_cast %62 : vector<1x1x256x128xbf16> to vector<256x128xbf16>
    %cst_87 = arith.constant dense<0.000000e+00> : vector<128x128xf32>
    %64 = tpu.matmul %15, %63, %cst_87 {dimension_numbers = #tpu.dot_dimension_numbers<[1], [0], [0], [1], [0, 0, 1, 1], [], []>} : vector<128x256xbf16>, vector<256x128xbf16>, vector<128x128xf32> -> vector<128x128xf32>
    %65 = vector.shape_cast %64 : vector<128x128xf32> to vector<2x8x8x128xf32>
    %66 = arith.addf %61, %65 : vector<2x8x8x128xf32>
    %c0_88 = arith.constant 0 : index
    %c0_89 = arith.constant 0 : index
    %c2_90 = arith.constant 2 : index
    %c0_91 = arith.constant 0 : index
    %67 = vector.load %arg10[%c0_88, %c0_89, %c2_90, %c0_91] : memref<2x10x10x128xf32, #tpu.memory_space<vmem>>, vector<2x8x8x128xf32>
    tpu.vector_store %arg10[%c0_88, %c0_89, %c2_90, %c0_91], %66 {strides = array<i32>} : memref<2x10x10x128xf32, #tpu.memory_space<vmem>>, vector<2x8x8x128xf32>,
    %c0_92 = arith.constant 0 : index
    %c0_93 = arith.constant 0 : index
    %c1_94 = arith.constant 1 : index
    %c0_95 = arith.constant 0 : index
    %68 = vector.load %arg10[%c0_92, %c0_93, %c1_94, %c0_95] : memref<2x10x10x128xf32, #tpu.memory_space<vmem>>, vector<2x8x8x128xf32>
    %c0_96 = arith.constant 0 : index
    %c7 = arith.constant 7 : index
    %c0_97 = arith.constant 0 : index
    %c0_98 = arith.constant 0 : index
    %69 = vector.load %arg6[%c0_96, %c7, %c0_97, %c0_98] : memref<1x9x256x128xbf16, #tpu.memory_space<vmem>>, vector<1x1x256x128xbf16>
    %70 = vector.shape_cast %69 : vector<1x1x256x128xbf16> to vector<256x128xbf16>
    %cst_99 = arith.constant dense<0.000000e+00> : vector<128x128xf32>
    %71 = tpu.matmul %15, %70, %cst_99 {dimension_numbers = #tpu.dot_dimension_numbers<[1], [0], [0], [1], [0, 0, 1, 1], [], []>} : vector<128x256xbf16>, vector<256x128xbf16>, vector<128x128xf32> -> vector<128x128xf32>
    %72 = vector.shape_cast %71 : vector<128x128xf32> to vector<2x8x8x128xf32>
    %73 = arith.addf %68, %72 : vector<2x8x8x128xf32>
    %c0_100 = arith.constant 0 : index
    %c0_101 = arith.constant 0 : index
    %c1_102 = arith.constant 1 : index
    %c0_103 = arith.constant 0 : index
    %74 = vector.load %arg10[%c0_100, %c0_101, %c1_102, %c0_103] : memref<2x10x10x128xf32, #tpu.memory_space<vmem>>, vector<2x8x8x128xf32>
    tpu.vector_store %arg10[%c0_100, %c0_101, %c1_102, %c0_103], %73 {strides = array<i32>} : memref<2x10x10x128xf32, #tpu.memory_space<vmem>>, vector<2x8x8x128xf32>,
    %c0_104 = arith.constant 0 : index
    %c0_105 = arith.constant 0 : index
    %c0_106 = arith.constant 0 : index
    %c0_107 = arith.constant 0 : index
    %75 = vector.load %arg10[%c0_104, %c0_105, %c0_106, %c0_107] : memref<2x10x10x128xf32, #tpu.memory_space<vmem>>, vector<2x8x8x128xf32>
    %c0_108 = arith.constant 0 : index
    %c8 = arith.constant 8 : index
    %c0_109 = arith.constant 0 : index
    %c0_110 = arith.constant 0 : index
    %76 = vector.load %arg6[%c0_108, %c8, %c0_109, %c0_110] : memref<1x9x256x128xbf16, #tpu.memory_space<vmem>>, vector<1x1x256x128xbf16>
    %77 = vector.shape_cast %76 : vector<1x1x256x128xbf16> to vector<256x128xbf16>
    %cst_111 = arith.constant dense<0.000000e+00> : vector<128x128xf32>
    %78 = tpu.matmul %15, %77, %cst_111 {dimension_numbers = #tpu.dot_dimension_numbers<[1], [0], [0], [1], [0, 0, 1, 1], [], []>} : vector<128x256xbf16>, vector<256x128xbf16>, vector<128x128xf32> -> vector<128x128xf32>
    %79 = vector.shape_cast %78 : vector<128x128xf32> to vector<2x8x8x128xf32>
    %80 = arith.addf %75, %79 : vector<2x8x8x128xf32>
    %c0_112 = arith.constant 0 : index
    %c0_113 = arith.constant 0 : index
    %c0_114 = arith.constant 0 : index
    %c0_115 = arith.constant 0 : index
    %81 = vector.load %arg10[%c0_112, %c0_113, %c0_114, %c0_115] : memref<2x10x10x128xf32, #tpu.memory_space<vmem>>, vector<2x8x8x128xf32>
    tpu.vector_store %arg10[%c0_112, %c0_113, %c0_114, %c0_115], %80 {strides = array<i32>} : memref<2x10x10x128xf32, #tpu.memory_space<vmem>>, vector<2x8x8x128xf32>,
    %c1_i32 = arith.constant 1 : i32
    %82 = arith.cmpi eq, %arg1, %c1_i32 : i32
    %83 = arith.extui %82 : i1 to i32
    %c0_i32_116 = arith.constant 0 : i32
    %84 = arith.cmpi ne, %83, %c0_i32_116 : i32
    scf.if %84 {
      %c0_117 = arith.constant 0 : index
      %c1_118 = arith.constant 1 : index
      %c1_119 = arith.constant 1 : index
      %c0_120 = arith.constant 0 : index
      %85 = vector.load %arg10[%c0_117, %c1_118, %c1_119, %c0_120] : memref<2x10x10x128xf32, #tpu.memory_space<vmem>>, vector<2x8x8x128xf32>
      %c0_121 = arith.constant 0 : index
      %c0_122 = arith.constant 0 : index
      %c0_123 = arith.constant 0 : index
      %86 = vector.load %arg7[%c0_121, %c0_122, %c0_123] : memref<1x1x128xf32, #tpu.memory_space<vmem>>, vector<1x1x128xf32>
      %87 = vector.shape_cast %86 : vector<1x1x128xf32> to vector<1x128xf32>
      %88 = vector.shape_cast %87 : vector<1x128xf32> to vector<1x1x1x128xf32>
      %89 = vector.broadcast %88 : vector<1x1x1x128xf32> to vector<2x8x8x128xf32>
      %90 = arith.mulf %85, %89 : vector<2x8x8x128xf32>
      %c0_124 = arith.constant 0 : index
      %c0_125 = arith.constant 0 : index
      %c0_126 = arith.constant 0 : index
      %91 = vector.load %arg8[%c0_124, %c0_125, %c0_126] : memref<1x1x128xf32, #tpu.memory_space<vmem>>, vector<1x1x128xf32>
      %92 = vector.shape_cast %91 : vector<1x1x128xf32> to vector<1x128xf32>
      %93 = vector.shape_cast %92 : vector<1x128xf32> to vector<1x1x1x128xf32>
      %94 = vector.broadcast %93 : vector<1x1x1x128xf32> to vector<2x8x8x128xf32>
      %95 = arith.addf %90, %94 : vector<2x8x8x128xf32>
      %cst_127 = arith.constant 0.000000e+00 : f32
      %96 = vector.broadcast %cst_127 : f32 to vector<2x8x8x128xf32>
      %97 = arith.maximumf %95, %96 : vector<2x8x8x128xf32>
      %c0_128 = arith.constant 0 : index
      %c0_129 = arith.constant 0 : index
      %c0_130 = arith.constant 0 : index
      %c0_131 = arith.constant 0 : index
      %98 = vector.load %arg9[%c0_128, %c0_129, %c0_130, %c0_131] : memref<2x8x8x128xf32, #tpu.memory_space<vmem>>, vector<2x8x8x128xf32>
      tpu.vector_store %arg9[%c0_128, %c0_129, %c0_130, %c0_131], %97 {strides = array<i32>} : memref<2x8x8x128xf32, #tpu.memory_space<vmem>>, vector<2x8x8x128xf32>,
    } else {
    }
    return
  }
  func.func @transform_0(%arg0: i32, %arg1: i32) -> (i32, i32, i32) {
    %c0_i32 = arith.constant 0 : i32
    %c0_i32_0 = arith.constant 0 : i32
    %c0_i32_1 = arith.constant 0 : i32
    return %arg0, %c0_i32, %c0_i32_0 : i32, i32, i32
  }
  func.func @transform_1(%arg0: i32, %arg1: i32) -> (i32, i32, i32) {
    %c0_i32 = arith.constant 0 : i32
    %c0_i32_0 = arith.constant 0 : i32
    return %arg0, %c0_i32, %arg1 : i32, i32, i32
  }
  func.func @transform_2(%arg0: i32, %arg1: i32) -> (i32, i32, i32) {
    %c0_i32 = arith.constant 0 : i32
    %c0_i32_0 = arith.constant 0 : i32
    return %arg0, %c0_i32, %arg1 : i32, i32, i32
  }
  func.func @transform_3(%arg0: i32, %arg1: i32) -> (i32, i32, i32) {
    %c0_i32 = arith.constant 0 : i32
    %c0_i32_0 = arith.constant 0 : i32
    return %arg0, %c0_i32, %arg1 : i32, i32, i32
  }
  func.func @transform_4(%arg0: i32, %arg1: i32) -> (i32, i32, i32, i32) {
    %c0_i32 = arith.constant 0 : i32
    %c0_i32_0 = arith.constant 0 : i32
    %c0_i32_1 = arith.constant 0 : i32
    return %arg0, %c0_i32, %arg1, %c0_i32_0 : i32, i32, i32, i32
  }
  func.func @transform_5(%arg0: i32, %arg1: i32) -> (i32, i32, i32) {
    %c0_i32 = arith.constant 0 : i32
    %c0_i32_0 = arith.constant 0 : i32
    %c0_i32_1 = arith.constant 0 : i32
    return %arg0, %c0_i32, %c0_i32_0 : i32, i32, i32
  }
  func.func @transform_6(%arg0: i32, %arg1: i32) -> (i32, i32, i32) {
    %c0_i32 = arith.constant 0 : i32
    %c0_i32_0 = arith.constant 0 : i32
    %c0_i32_1 = arith.constant 0 : i32
    return %arg0, %c0_i32, %c0_i32_0 : i32, i32, i32
  }
  func.func @transform_7(%arg0: i32, %arg1: i32) -> (i32, i32, i32, i32) {
    %c0_i32 = arith.constant 0 : i32
    %c0_i32_0 = arith.constant 0 : i32
    %c0_i32_1 = arith.constant 0 : i32
    %c0_i32_2 = arith.constant 0 : i32
    return %c0_i32, %c0_i32_0, %c0_i32_1, %arg0 : i32, i32, i32, i32
  }
}

</mosaic_0001>

<bundles_post_ra>
// kernel: feature_extractor2.1
= control target key start
LH: loop header
LB: loop body
LE: loop exit
PB: predicated region body
PF: predicated region fallthrough
CT: control target
= control target key end

     0   :  { %s8828_s0 = inlined_call_operand.vmem [shape: bf16[2,128,144], index: 0, kind: input, shape index: {}]   ;;  %s8829_s1 = inlined_call_operand.vmem [shape: bf16[2,144,512], index: 1, kind: input, shape index: {}]   ;;  %s8830_s2 = inlined_call_operand.vmem [shape: f32[2,1,512], index: 2, kind: input, shape index: {}]   ;;  %s8831_s3 = inlined_call_operand.vmem [shape: f32[2,1,512], index: 3, kind: input, shape index: {}]   ;;  %s8832_s4 = inlined_call_operand.vmem [shape: bf16[2,9,512,128], index: 4, kind: input, shape index: {}]   ;;  %s8833_s5 = inlined_call_operand.vmem [shape: f32[2,1,128], index: 5, kind: input, shape index: {}]   ;;  %s8834_s6 = inlined_call_operand.vmem [shape: f32[2,1,128], index: 6, kind: input, shape index: {}]   ;;  %s8835_s7 = inlined_call_operand.hbm [shape: f32[2,8,8,256], index: 7, kind: output, shape index: {}]  }
   0x1   :  { %8840 = sst [smem:[#allocation11_spill]] %s8828_s0 }
   0x2   :  { %8841 = sst [smem:[#allocation12_spill]] %s8829_s1 }
   0x3   :  { %12 = vsyncpa [#allocation6], 0 }
   0x4   :  { %14 = vsyncpa [#allocation6 + $0x1], 0  ;;  %s7670_s24 = smov 0   ;;  %s7672_s25 = smov 0  }
   0x5   :  { %s7674_s26 = smov 0   ;;  %s7676_s27 = smov 0  }
   0x6   :  { %s7678_s28 = smov 0   ;;  %s7680_s29 = smov 0  }
   0x7   :  { %s7682_s30 = smov 0   ;;  %s7684_s8 = smov 0  }
   0x8   :  { %s7686_s9 = smov 0   ;;  %s7688_s10 = smov 0  }
   0x9 LB: > { %s6229_s11 = sadd.s32 4294967295, %s7625_s10   ;;  %s6230_s12 = sadd.s32 4294967294, %s7625_s10   ;;  %s7625_s10 = sphi %s7688_s10, %s20_s10   ;;  %s7621_s9 = sphi %s7686_s9, %s8863_s9   ;;  %s7617_s8 = sphi %s7684_s8, %s8862_s8   ;;  %s7613_s30 = sphi %s7682_s30, %s8861_s30   ;;  %s7609_s29 = sphi %s7680_s29, %s8860_s29   ;;  %s7605_s28 = sphi %s7678_s28, %s8859_s28   ;;  %s7601_s27 = sphi %s7676_s27, %s8858_s27   ;;  %s7597_s26 = sphi %s7674_s26, %s8857_s26   ;;  %s7593_s25 = sphi %s7672_s25, %s8856_s25   ;;  %s7589_s24 = sphi %s7670_s24, %s8855_s24  }
   0xa   : > { %s29_s13 = sadd.s32 1, %s7617_s8  ;;  %s32_s14 = sadd.s32 1, %s7621_s9 }
   0xb   : > { %p30_p0 = scmp.ge.s32.totalorder %s29_s13, 2  ;;  %s67_s15 = sadd.s32 1, %s7605_s28 }
   0xc   : > { %p74_p1 = scmp.ne.s32.totalorder %s7605_s28, %s7601_s27  ;;  %p75_p2 = scmp.eq.s32.totalorder %s7625_s10, 0 }
   0xd   : > { %s8865_s13 = smov (%p30_p0, %s29_s13), 0  ;;  %s8867_s14 = smov (!%p30_p0, %s32_s14), %s7621_s9 }
   0xe   : > { %8842 = sst [smem:[#allocation8_spill]] %s8865_s13  ;;  %s63_s16 = ssub.s32 %s7617_s8, %s8865_s13 }
   0xf   : > { %p7733_p3 = por %p75_p2, %p74_p1  ;;  %p34_p4 = scmp.ge.s32.totalorder %s8867_s14, 2 }
  0x10   : > { %s229_s18 = sadd.s32 1, %s7597_s26  ;;  %p239_p5 = scmp.ne.s32.totalorder %s7597_s26, %s7593_s25 }
  0x11   : > { %p240_p6 = scmp.eq.s32.totalorder %s6229_s11, 3  ;;  %s8869_s14 = smov (%p34_p4, %s8867_s14), 0 }
  0x12   : > { %8844 = sst [smem:[#allocation9_spill]] %s8869_s14  ;;  %p245_p8 = scmp.ne.s32.totalorder %s7593_s25, %s7589_s24 }
  0x13   : > { %p7742_p7 = por %p240_p6, %p239_p5  ;;  %s62_s20 = ssub.s32 %s7621_s9, %s8869_s14 }
  0x14   : > { %p246_p9 = scmp.eq.s32.totalorder %s6230_s12, 3  ;;  %s64_s21 = sor.u32 %s63_s16, %s62_s20 }
  0x15   : > { %p227_p10 = scmp.eq.s32.totalorder %s62_s20, 0  ;;  %p65_p11 = scmp.eq.s32.totalorder %s64_s21, 0 }
  0x16   : > { %p7750_p12 = por %p246_p9, %p245_p8  ;;  %p6232_p13 = scmp.ge.s32.totalorder %s7625_s10, 4 }
  0x17   : > { %s7755_s23 = scalar_select %p227_p10, %s7597_s26, %s229_s18  }
  0x18   : > { %s8846_s22 = scalar_select %p7750_p12, 1, 0 }
  0x19   : > { %s7758_s11 = scalar_select %p65_p11, %s7605_s28, %s67_s15  }
  0x1a   : > { %8847 = sst [smem:[#allocation10_spill]] %s8846_s22  ;;  %262 = sbr.rel (%p6232_p13) target bundleno = 211 (0xd3), region = 16 }
  0x1f   : > { %273 = sbr.rel (!%p7733_p3) target bundleno = 59 (0x3b), region = 24  ;;  %s275_s12 = sand.u32 (%p7733_p3), 1, %s7605_s28  }
  0x20   : > { %s7417_s16 = smul.u32 (%p7733_p3), 144, %s275_s12  ;;  %s6233_s20 = sshll.u32 (%p7733_p3), %s7617_s8, 1 }
  0x21   : > { %s7418_s21 = smul.u32 (%p7733_p3), 72, %s7621_s9  ;;  %s8848_s1 = sld [smem:[#allocation12_spill]] (%p7733_p3) }
  0x22   : > { %s7774_s12 = scalar_lea.vmem (%p7733_p3), [#allocation3], %s7417_s16 }
  0x23   : > { %s280_s14 = sadd.s32 (%p7733_p3), %s7418_s21, %s6233_s20 }
  0x24   : > { %s6234_s13 = sshll.u32 %s280_s14, 2 }
  0x27   : > { %s7769_s15 = scalar_lea.vmem %s8848_s1, %s6234_s13 }
  0x28   : > { %v345_v0 = vld [vmem:[%s7769_s15] sm:$0xff]  ;;  %v347_v1 = vld [vmem:[%s7769_s15 + $0x10] sm:$0xff] }
  0x29   : > { %v349_v2 = vld [vmem:[%s7769_s15 + $0x20] sm:$0xff]  ;;  %346 = vst [vmem:[%s7774_s12] sm:$0xff] %v345_v0  ;;  %v351_v3 = vld [vmem:[%s7769_s15 + $0x30] sm:$0xff] }
  0x2a   : > { %348 = vst [vmem:[%s7774_s12 + $0x8] sm:$0xff] %v347_v1  ;;  %v353_v4 = vld [vmem:[%s7769_s15 + $0x40] sm:$0xff]  ;;  %v355_v5 = vld [vmem:[%s7769_s15 + $0x50] sm:$0xff] }
  0x2b   : > { %350 = vst [vmem:[%s7774_s12 + $0x10] sm:$0xff] %v349_v2  ;;  %v357_v6 = vld [vmem:[%s7769_s15 + $0x60] sm:$0xff]  ;;  %v359_v7 = vld [vmem:[%s7769_s15 + $0x70] sm:$0xff] }
  0x2c   : > { %352 = vst [vmem:[%s7774_s12 + $0x18] sm:$0xff] %v351_v3  ;;  %v361_v8 = vld [vmem:[%s7769_s15 + $0x80] sm:$0xff]  ;;  %v363_v9 = vld [vmem:[%s7769_s15 + $0x90] sm:$0xff] }
  0x2d   : > { %354 = vst [vmem:[%s7774_s12 + $0x20] sm:$0xff] %v353_v4  ;;  %v365_v10 = vld [vmem:[%s7769_s15 + $0xa0] sm:$0xff]  ;;  %v367_v11 = vld [vmem:[%s7769_s15 + $0xb0] sm:$0xff] }
  0x2e   : > { %356 = vst [vmem:[%s7774_s12 + $0x28] sm:$0xff] %v355_v5  ;;  %v369_v12 = vld [vmem:[%s7769_s15 + $0xc0] sm:$0xff]  ;;  %v371_v13 = vld [vmem:[%s7769_s15 + $0xd0] sm:$0xff] }
  0x2f   : > { %358 = vst [vmem:[%s7774_s12 + $0x30] sm:$0xff] %v357_v6  ;;  %v373_v14 = vld [vmem:[%s7769_s15 + $0xe0] sm:$0xff]  ;;  %v375_v15 = vld [vmem:[%s7769_s15 + $0xf0] sm:$0xff] }
  0x30   : > { %360 = vst [vmem:[%s7774_s12 + $0x38] sm:$0xff] %v359_v7  ;;  %v377_v16 = vld [vmem:[%s7769_s15 + $0x100] sm:$0xff]  ;;  %v379_v17 = vld [vmem:[%s7769_s15 + $0x110] sm:$0xff] }
  0x31   : > { %362 = vst [vmem:[%s7774_s12 + $0x40] sm:$0xff] %v361_v8 }
  0x32   : > { %364 = vst [vmem:[%s7774_s12 + $0x48] sm:$0xff] %v363_v9 }
  0x33   : > { %366 = vst [vmem:[%s7774_s12 + $0x50] sm:$0xff] %v365_v10 }
  0x34   : > { %368 = vst [vmem:[%s7774_s12 + $0x58] sm:$0xff] %v367_v11 }
  0x35   : > { %370 = vst [vmem:[%s7774_s12 + $0x60] sm:$0xff] %v369_v12 }
  0x36   : > { %372 = vst [vmem:[%s7774_s12 + $0x68] sm:$0xff] %v371_v13 }
  0x37   : > { %374 = vst [vmem:[%s7774_s12 + $0x70] sm:$0xff] %v373_v14 }
  0x38   : > { %376 = vst [vmem:[%s7774_s12 + $0x78] sm:$0xff] %v375_v15 }
  0x39   : > { %378 = vst [vmem:[%s7774_s12 + $0x80] sm:$0xff] %v377_v16 }
  0x3a   : > { %380 = vst [vmem:[%s7774_s12 + $0x88] sm:$0xff] %v379_v17 }
  0x3b PF: > { %410 = sbr.rel (!%p7733_p3) target bundleno = 211 (0xd3), region = 70  ;;  %s412_s13 = sand.u32 (%p7733_p3), 1, %s7605_s28  }
  0x3c   : > { %s7419_s14 = smul.u32 (%p7733_p3), 1152, %s412_s13  ;;  %s6235_s22 = sshll.u32 (%p7733_p3), %s7617_s8, 5 }
  0x3d   : > { %s7420_s16 = smul.u32 (%p7733_p3), 576, %s7621_s9 }
  0x3e   : > { %s7822_s17 = scalar_lea.vmem (%p7733_p3), [#allocation4], %s7419_s14 }
  0x3f   : > { %s417_s20 = sadd.s32 (%p7733_p3), %s7420_s16, %s6235_s22 }
  0x40   : > { %s6236_s21 = sshll.u32 %s417_s20, 2 }
  0x41   : > { %s7817_s15 = scalar_lea.vmem %s8832_s4, %s6236_s21 }
  0x42   : > { %v436_v18 = vld [vmem:[%s7817_s15] sm:$0xff]   ;;  %v440_v19 = vld [vmem:[%s7817_s15 + $0x8] sm:$0xff]   ;;  %v444_v20 = vld [vmem:[%s7817_s15 + $0x10] sm:$0xff]  }
  0x43   : > { %437 = vst [vmem:[%s7822_s17] sm:$0xff] %v436_v18   ;;  %v448_v21 = vld [vmem:[%s7817_s15 + $0x18] sm:$0xff]   ;;  %v452_v22 = vld [vmem:[%s7817_s15 + $0x20] sm:$0xff]   ;;  %v456_v23 = vld [vmem:[%s7817_s15 + $0x28] sm:$0xff]  }
  0x44   : > { %441 = vst [vmem:[%s7822_s17 + $0x8] sm:$0xff] %v440_v19   ;;  %v460_v24 = vld [vmem:[%s7817_s15 + $0x30] sm:$0xff]   ;;  %v464_v25 = vld [vmem:[%s7817_s15 + $0x38] sm:$0xff]   ;;  %v468_v26 = vld [vmem:[%s7817_s15 + $0x40] sm:$0xff]  }
  0x45   : > { %445 = vst [vmem:[%s7822_s17 + $0x10] sm:$0xff] %v444_v20   ;;  %v472_v27 = vld [vmem:[%s7817_s15 + $0x48] sm:$0xff]   ;;  %v476_v28 = vld [vmem:[%s7817_s15 + $0x50] sm:$0xff]   ;;  %v480_v29 = vld [vmem:[%s7817_s15 + $0x58] sm:$0xff]  }
  0x46   : > { %449 = vst [vmem:[%s7822_s17 + $0x18] sm:$0xff] %v448_v21   ;;  %v484_v30 = vld [vmem:[%s7817_s15 + $0x60] sm:$0xff]   ;;  %v488_v31 = vld [vmem:[%s7817_s15 + $0x68] sm:$0xff]   ;;  %v492_v32 = vld [vmem:[%s7817_s15 + $0x70] sm:$0xff]  }
  0x47   : > { %453 = vst [vmem:[%s7822_s17 + $0x20] sm:$0xff] %v452_v22   ;;  %v496_v33 = vld [vmem:[%s7817_s15 + $0x78] sm:$0xff]   ;;  %v500_v34 = vld [vmem:[%s7817_s15 + $0x100] sm:$0xff]   ;;  %v504_v35 = vld [vmem:[%s7817_s15 + $0x108] sm:$0xff]  }
  0x48   : > { %457 = vst [vmem:[%s7822_s17 + $0x28] sm:$0xff] %v456_v23   ;;  %v508_v36 = vld [vmem:[%s7817_s15 + $0x110] sm:$0xff]   ;;  %v512_v37 = vld [vmem:[%s7817_s15 + $0x118] sm:$0xff]   ;;  %v516_v38 = vld [vmem:[%s7817_s15 + $0x120] sm:$0xff]  }
  0x49   : > { %461 = vst [vmem:[%s7822_s17 + $0x30] sm:$0xff] %v460_v24   ;;  %v520_v39 = vld [vmem:[%s7817_s15 + $0x128] sm:$0xff]   ;;  %v524_v40 = vld [vmem:[%s7817_s15 + $0x130] sm:$0xff]   ;;  %v528_v41 = vld [vmem:[%s7817_s15 + $0x138] sm:$0xff]  }
  0x4a   : > { %465 = vst [vmem:[%s7822_s17 + $0x38] sm:$0xff] %v464_v25   ;;  %v532_v42 = vld [vmem:[%s7817_s15 + $0x140] sm:$0xff]   ;;  %v536_v43 = vld [vmem:[%s7817_s15 + $0x148] sm:$0xff]   ;;  %v540_v44 = vld [vmem:[%s7817_s15 + $0x150] sm:$0xff]  }
  0x4b   : > { %469 = vst [vmem:[%s7822_s17 + $0x40] sm:$0xff] %v468_v26   ;;  %v544_v45 = vld [vmem:[%s7817_s15 + $0x158] sm:$0xff]   ;;  %v548_v46 = vld [vmem:[%s7817_s15 + $0x160] sm:$0xff]   ;;  %v552_v47 = vld [vmem:[%s7817_s15 + $0x168] sm:$0xff]  }
  0x4c   : > { %473 = vst [vmem:[%s7822_s17 + $0x48] sm:$0xff] %v472_v27   ;;  %v556_v48 = vld [vmem:[%s7817_s15 + $0x170] sm:$0xff]   ;;  %v560_v49 = vld [vmem:[%s7817_s15 + $0x178] sm:$0xff]   ;;  %v564_v50 = vld [vmem:[%s7817_s15 + $0x200] sm:$0xff]  }
  0x4d   : > { %477 = vst [vmem:[%s7822_s17 + $0x50] sm:$0xff] %v476_v28   ;;  %v568_v51 = vld [vmem:[%s7817_s15 + $0x208] sm:$0xff]   ;;  %v572_v52 = vld [vmem:[%s7817_s15 + $0x210] sm:$0xff]   ;;  %v576_v53 = vld [vmem:[%s7817_s15 + $0x218] sm:$0xff]  }
  0x4e   : > { %481 = vst [vmem:[%s7822_s17 + $0x58] sm:$0xff] %v480_v29   ;;  %v580_v54 = vld [vmem:[%s7817_s15 + $0x220] sm:$0xff]   ;;  %v584_v55 = vld [vmem:[%s7817_s15 + $0x228] sm:$0xff]   ;;  %v588_v56 = vld [vmem:[%s7817_s15 + $0x230] sm:$0xff]  }
  0x4f   : > { %485 = vst [vmem:[%s7822_s17 + $0x60] sm:$0xff] %v484_v30   ;;  %v592_v57 = vld [vmem:[%s7817_s15 + $0x238] sm:$0xff]   ;;  %v596_v58 = vld [vmem:[%s7817_s15 + $0x240] sm:$0xff]   ;;  %v600_v59 = vld [vmem:[%s7817_s15 + $0x248] sm:$0xff]  }
  0x50   : > { %489 = vst [vmem:[%s7822_s17 + $0x68] sm:$0xff] %v488_v31   ;;  %v604_v60 = vld [vmem:[%s7817_s15 + $0x250] sm:$0xff]   ;;  %v608_v61 = vld [vmem:[%s7817_s15 + $0x258] sm:$0xff]   ;;  %v612_v62 = vld [vmem:[%s7817_s15 + $0x260] sm:$0xff]  }
  0x51   : > { %493 = vst [vmem:[%s7822_s17 + $0x70] sm:$0xff] %v492_v32   ;;  %v616_v63 = vld [vmem:[%s7817_s15 + $0x268] sm:$0xff]   ;;  %v620_v0 = vld [vmem:[%s7817_s15 + $0x270] sm:$0xff]   ;;  %v624_v1 = vld [vmem:[%s7817_s15 + $0x278] sm:$0xff]  }
  0x52   : > { %497 = vst [vmem:[%s7822_s17 + $0x78] sm:$0xff] %v496_v33   ;;  %v628_v2 = vld [vmem:[%s7817_s15 + $0x300] sm:$0xff]   ;;  %v632_v3 = vld [vmem:[%s7817_s15 + $0x308] sm:$0xff]   ;;  %v636_v4 = vld [vmem:[%s7817_s15 + $0x310] sm:$0xff]  }
  0x53   : > { %501 = vst [vmem:[%s7822_s17 + $0x80] sm:$0xff] %v500_v34   ;;  %v640_v5 = vld [vmem:[%s7817_s15 + $0x318] sm:$0xff]   ;;  %v644_v6 = vld [vmem:[%s7817_s15 + $0x320] sm:$0xff]   ;;  %v648_v7 = vld [vmem:[%s7817_s15 + $0x328] sm:$0xff]  }
  0x54   : > { %505 = vst [vmem:[%s7822_s17 + $0x88] sm:$0xff] %v504_v35   ;;  %v652_v8 = vld [vmem:[%s7817_s15 + $0x330] sm:$0xff]   ;;  %v656_v9 = vld [vmem:[%s7817_s15 + $0x338] sm:$0xff]   ;;  %v660_v10 = vld [vmem:[%s7817_s15 + $0x340] sm:$0xff]  }
  0x55   : > { %509 = vst [vmem:[%s7822_s17 + $0x90] sm:$0xff] %v508_v36   ;;  %v664_v11 = vld [vmem:[%s7817_s15 + $0x348] sm:$0xff]   ;;  %v668_v12 = vld [vmem:[%s7817_s15 + $0x350] sm:$0xff]   ;;  %v672_v13 = vld [vmem:[%s7817_s15 + $0x358] sm:$0xff]  }
  0x56   : > { %513 = vst [vmem:[%s7822_s17 + $0x98] sm:$0xff] %v512_v37   ;;  %v676_v14 = vld [vmem:[%s7817_s15 + $0x360] sm:$0xff]   ;;  %v680_v15 = vld [vmem:[%s7817_s15 + $0x368] sm:$0xff]   ;;  %v684_v16 = vld [vmem:[%s7817_s15 + $0x370] sm:$0xff]  }
  0x57   : > { %517 = vst [vmem:[%s7822_s17 + $0xa0] sm:$0xff] %v516_v38   ;;  %v688_v17 = vld [vmem:[%s7817_s15 + $0x378] sm:$0xff]   ;;  %v692_v18 = vld [vmem:[%s7817_s15 + $0x400] sm:$0xff]   ;;  %v696_v19 = vld [vmem:[%s7817_s15 + $0x408] sm:$0xff]  }
  0x58   : > { %521 = vst [vmem:[%s7822_s17 + $0xa8] sm:$0xff] %v520_v39   ;;  %v700_v20 = vld [vmem:[%s7817_s15 + $0x410] sm:$0xff]   ;;  %v704_v21 = vld [vmem:[%s7817_s15 + $0x418] sm:$0xff]   ;;  %v708_v22 = vld [vmem:[%s7817_s15 + $0x420] sm:$0xff]  }
  0x59   : > { %525 = vst [vmem:[%s7822_s17 + $0xb0] sm:$0xff] %v524_v40   ;;  %v712_v23 = vld [vmem:[%s7817_s15 + $0x428] sm:$0xff]   ;;  %v716_v24 = vld [vmem:[%s7817_s15 + $0x430] sm:$0xff]   ;;  %v720_v25 = vld [vmem:[%s7817_s15 + $0x438] sm:$0xff]  }
  0x5a   : > { %529 = vst [vmem:[%s7822_s17 + $0xb8] sm:$0xff] %v528_v41   ;;  %v724_v26 = vld [vmem:[%s7817_s15 + $0x440] sm:$0xff]   ;;  %v728_v27 = vld [vmem:[%s7817_s15 + $0x448] sm:$0xff]   ;;  %v732_v28 = vld [vmem:[%s7817_s15 + $0x450] sm:$0xff]  }
  0x5b   : > { %533 = vst [vmem:[%s7822_s17 + $0xc0] sm:$0xff] %v532_v42   ;;  %v736_v29 = vld [vmem:[%s7817_s15 + $0x458] sm:$0xff]   ;;  %v740_v30 = vld [vmem:[%s7817_s15 + $0x460] sm:$0xff]   ;;  %v744_v31 = vld [vmem:[%s7817_s15 + $0x468] sm:$0xff]  }
  0x5c   : > { %537 = vst [vmem:[%s7822_s17 + $0xc8] sm:$0xff] %v536_v43   ;;  %v748_v32 = vld [vmem:[%s7817_s15 + $0x470] sm:$0xff]   ;;  %v752_v33 = vld [vmem:[%s7817_s15 + $0x478] sm:$0xff]   ;;  %v756_v34 = vld [vmem:[%s7817_s15 + $0x500] sm:$0xff]  }
  0x5d   : > { %541 = vst [vmem:[%s7822_s17 + $0xd0] sm:$0xff] %v540_v44   ;;  %v760_v35 = vld [vmem:[%s7817_s15 + $0x508] sm:$0xff]   ;;  %v764_v36 = vld [vmem:[%s7817_s15 + $0x510] sm:$0xff]   ;;  %v768_v37 = vld [vmem:[%s7817_s15 + $0x518] sm:$0xff]  }
  0x5e   : > { %545 = vst [vmem:[%s7822_s17 + $0xd8] sm:$0xff] %v544_v45   ;;  %v772_v38 = vld [vmem:[%s7817_s15 + $0x520] sm:$0xff]   ;;  %v776_v39 = vld [vmem:[%s7817_s15 + $0x528] sm:$0xff]   ;;  %v780_v40 = vld [vmem:[%s7817_s15 + $0x530] sm:$0xff]  }
  0x5f   : > { %549 = vst [vmem:[%s7822_s17 + $0xe0] sm:$0xff] %v548_v46   ;;  %v784_v41 = vld [vmem:[%s7817_s15 + $0x538] sm:$0xff]   ;;  %v788_v42 = vld [vmem:[%s7817_s15 + $0x540] sm:$0xff]   ;;  %v792_v43 = vld [vmem:[%s7817_s15 + $0x548] sm:$0xff]  }
  0x60   : > { %553 = vst [vmem:[%s7822_s17 + $0xe8] sm:$0xff] %v552_v47   ;;  %v796_v44 = vld [vmem:[%s7817_s15 + $0x550] sm:$0xff]   ;;  %v800_v45 = vld [vmem:[%s7817_s15 + $0x558] sm:$0xff]   ;;  %v804_v46 = vld [vmem:[%s7817_s15 + $0x560] sm:$0xff]  }
  0x61   : > { %557 = vst [vmem:[%s7822_s17 + $0xf0] sm:$0xff] %v556_v48   ;;  %v808_v47 = vld [vmem:[%s7817_s15 + $0x568] sm:$0xff]   ;;  %v812_v48 = vld [vmem:[%s7817_s15 + $0x570] sm:$0xff]  }
  0x62   : > { %561 = vst [vmem:[%s7822_s17 + $0xf8] sm:$0xff] %v560_v49   ;;  %v816_v49 = vld [vmem:[%s7817_s15 + $0x578] sm:$0xff]  }
  0x63   : > { %565 = vst [vmem:[%s7822_s17 + $0x100] sm:$0xff] %v564_v50   ;;  %v820_v50 = vld [vmem:[%s7817_s15 + $0x600] sm:$0xff]  }
  0x64   : > { %569 = vst [vmem:[%s7822_s17 + $0x108] sm:$0xff] %v568_v51   ;;  %v824_v51 = vld [vmem:[%s7817_s15 + $0x608] sm:$0xff]  }
  0x65   : > { %573 = vst [vmem:[%s7822_s17 + $0x110] sm:$0xff] %v572_v52   ;;  %v828_v52 = vld [vmem:[%s7817_s15 + $0x610] sm:$0xff]  }
  0x66   : > { %577 = vst [vmem:[%s7822_s17 + $0x118] sm:$0xff] %v576_v53   ;;  %v832_v53 = vld [vmem:[%s7817_s15 + $0x618] sm:$0xff]  }
  0x67   : > { %581 = vst [vmem:[%s7822_s17 + $0x120] sm:$0xff] %v580_v54   ;;  %v836_v54 = vld [vmem:[%s7817_s15 + $0x620] sm:$0xff]  }
  0x68   : > { %585 = vst [vmem:[%s7822_s17 + $0x128] sm:$0xff] %v584_v55   ;;  %v840_v55 = vld [vmem:[%s7817_s15 + $0x628] sm:$0xff]  }
  0x69   : > { %589 = vst [vmem:[%s7822_s17 + $0x130] sm:$0xff] %v588_v56   ;;  %v844_v56 = vld [vmem:[%s7817_s15 + $0x630] sm:$0xff]  }
  0x6a   : > { %593 = vst [vmem:[%s7822_s17 + $0x138] sm:$0xff] %v592_v57   ;;  %v848_v57 = vld [vmem:[%s7817_s15 + $0x638] sm:$0xff]  }
  0x6b   : > { %597 = vst [vmem:[%s7822_s17 + $0x140] sm:$0xff] %v596_v58   ;;  %v852_v58 = vld [vmem:[%s7817_s15 + $0x640] sm:$0xff]  }
  0x6c   : > { %601 = vst [vmem:[%s7822_s17 + $0x148] sm:$0xff] %v600_v59   ;;  %v856_v59 = vld [vmem:[%s7817_s15 + $0x648] sm:$0xff]  }
  0x6d   : > { %605 = vst [vmem:[%s7822_s17 + $0x150] sm:$0xff] %v604_v60   ;;  %v860_v60 = vld [vmem:[%s7817_s15 + $0x650] sm:$0xff]  }
  0x6e   : > { %609 = vst [vmem:[%s7822_s17 + $0x158] sm:$0xff] %v608_v61   ;;  %v864_v61 = vld [vmem:[%s7817_s15 + $0x658] sm:$0xff]  }
  0x6f   : > { %613 = vst [vmem:[%s7822_s17 + $0x160] sm:$0xff] %v612_v62   ;;  %v868_v62 = vld [vmem:[%s7817_s15 + $0x660] sm:$0xff]  }
  0x70   : > { %617 = vst [vmem:[%s7822_s17 + $0x168] sm:$0xff] %v616_v63   ;;  %v872_v63 = vld [vmem:[%s7817_s15 + $0x668] sm:$0xff]  }
  0x71   : > { %621 = vst [vmem:[%s7822_s17 + $0x170] sm:$0xff] %v620_v0   ;;  %v876_v0 = vld [vmem:[%s7817_s15 + $0x670] sm:$0xff]  }
  0x72   : > { %625 = vst [vmem:[%s7822_s17 + $0x178] sm:$0xff] %v624_v1   ;;  %v880_v1 = vld [vmem:[%s7817_s15 + $0x678] sm:$0xff]  }
  0x73   : > { %629 = vst [vmem:[%s7822_s17 + $0x180] sm:$0xff] %v628_v2   ;;  %v884_v2 = vld [vmem:[%s7817_s15 + $0x700] sm:$0xff]  }
  0x74   : > { %633 = vst [vmem:[%s7822_s17 + $0x188] sm:$0xff] %v632_v3   ;;  %v888_v3 = vld [vmem:[%s7817_s15 + $0x708] sm:$0xff]  }
  0x75   : > { %637 = vst [vmem:[%s7822_s17 + $0x190] sm:$0xff] %v636_v4   ;;  %v892_v4 = vld [vmem:[%s7817_s15 + $0x710] sm:$0xff]  }
  0x76   : > { %641 = vst [vmem:[%s7822_s17 + $0x198] sm:$0xff] %v640_v5   ;;  %v896_v5 = vld [vmem:[%s7817_s15 + $0x718] sm:$0xff]  }
  0x77   : > { %645 = vst [vmem:[%s7822_s17 + $0x1a0] sm:$0xff] %v644_v6   ;;  %v900_v6 = vld [vmem:[%s7817_s15 + $0x720] sm:$0xff]  }
  0x78   : > { %649 = vst [vmem:[%s7822_s17 + $0x1a8] sm:$0xff] %v648_v7   ;;  %v904_v7 = vld [vmem:[%s7817_s15 + $0x728] sm:$0xff]  }
  0x79   : > { %653 = vst [vmem:[%s7822_s17 + $0x1b0] sm:$0xff] %v652_v8   ;;  %v908_v8 = vld [vmem:[%s7817_s15 + $0x730] sm:$0xff]  }
  0x7a   : > { %657 = vst [vmem:[%s7822_s17 + $0x1b8] sm:$0xff] %v656_v9   ;;  %v912_v9 = vld [vmem:[%s7817_s15 + $0x738] sm:$0xff]  }
  0x7b   : > { %661 = vst [vmem:[%s7822_s17 + $0x1c0] sm:$0xff] %v660_v10   ;;  %v916_v10 = vld [vmem:[%s7817_s15 + $0x740] sm:$0xff]  }
  0x7c   : > { %665 = vst [vmem:[%s7822_s17 + $0x1c8] sm:$0xff] %v664_v11   ;;  %v920_v11 = vld [vmem:[%s7817_s15 + $0x748] sm:$0xff]  }
  0x7d   : > { %669 = vst [vmem:[%s7822_s17 + $0x1d0] sm:$0xff] %v668_v12   ;;  %v924_v12 = vld [vmem:[%s7817_s15 + $0x750] sm:$0xff]  }
  0x7e   : > { %673 = vst [vmem:[%s7822_s17 + $0x1d8] sm:$0xff] %v672_v13   ;;  %v928_v13 = vld [vmem:[%s7817_s15 + $0x758] sm:$0xff]  }
  0x7f   : > { %677 = vst [vmem:[%s7822_s17 + $0x1e0] sm:$0xff] %v676_v14   ;;  %v932_v14 = vld [vmem:[%s7817_s15 + $0x760] sm:$0xff]  }
  0x80   : > { %681 = vst [vmem:[%s7822_s17 + $0x1e8] sm:$0xff] %v680_v15   ;;  %v936_v15 = vld [vmem:[%s7817_s15 + $0x768] sm:$0xff]  }
  0x81   : > { %685 = vst [vmem:[%s7822_s17 + $0x1f0] sm:$0xff] %v684_v16   ;;  %v940_v16 = vld [vmem:[%s7817_s15 + $0x770] sm:$0xff]  }
  0x82   : > { %689 = vst [vmem:[%s7822_s17 + $0x1f8] sm:$0xff] %v688_v17   ;;  %v944_v17 = vld [vmem:[%s7817_s15 + $0x778] sm:$0xff]  }
  0x83   : > { %693 = vst [vmem:[%s7822_s17 + $0x200] sm:$0xff] %v692_v18   ;;  %v948_v18 = vld [vmem:[%s7817_s15 + $0x800] sm:$0xff]  }
  0x84   : > { %697 = vst [vmem:[%s7822_s17 + $0x208] sm:$0xff] %v696_v19   ;;  %v952_v19 = vld [vmem:[%s7817_s15 + $0x808] sm:$0xff]  }
  0x85   : > { %701 = vst [vmem:[%s7822_s17 + $0x210] sm:$0xff] %v700_v20   ;;  %v956_v20 = vld [vmem:[%s7817_s15 + $0x810] sm:$0xff]  }
  0x86   : > { %705 = vst [vmem:[%s7822_s17 + $0x218] sm:$0xff] %v704_v21   ;;  %v960_v21 = vld [vmem:[%s7817_s15 + $0x818] sm:$0xff]  }
  0x87   : > { %709 = vst [vmem:[%s7822_s17 + $0x220] sm:$0xff] %v708_v22   ;;  %v964_v22 = vld [vmem:[%s7817_s15 + $0x820] sm:$0xff]  }
  0x88   : > { %713 = vst [vmem:[%s7822_s17 + $0x228] sm:$0xff] %v712_v23   ;;  %v968_v23 = vld [vmem:[%s7817_s15 + $0x828] sm:$0xff]  }
  0x89   : > { %717 = vst [vmem:[%s7822_s17 + $0x230] sm:$0xff] %v716_v24   ;;  %v972_v24 = vld [vmem:[%s7817_s15 + $0x830] sm:$0xff]  }
  0x8a   : > { %721 = vst [vmem:[%s7822_s17 + $0x238] sm:$0xff] %v720_v25   ;;  %v976_v25 = vld [vmem:[%s7817_s15 + $0x838] sm:$0xff]  }
  0x8b   : > { %725 = vst [vmem:[%s7822_s17 + $0x240] sm:$0xff] %v724_v26   ;;  %v980_v26 = vld [vmem:[%s7817_s15 + $0x840] sm:$0xff]  }
  0x8c   : > { %729 = vst [vmem:[%s7822_s17 + $0x248] sm:$0xff] %v728_v27   ;;  %v984_v27 = vld [vmem:[%s7817_s15 + $0x848] sm:$0xff]  }
  0x8d   : > { %733 = vst [vmem:[%s7822_s17 + $0x250] sm:$0xff] %v732_v28   ;;  %v988_v28 = vld [vmem:[%s7817_s15 + $0x850] sm:$0xff]  }
  0x8e   : > { %737 = vst [vmem:[%s7822_s17 + $0x258] sm:$0xff] %v736_v29   ;;  %v992_v29 = vld [vmem:[%s7817_s15 + $0x858] sm:$0xff]  }
  0x8f   : > { %741 = vst [vmem:[%s7822_s17 + $0x260] sm:$0xff] %v740_v30   ;;  %v996_v30 = vld [vmem:[%s7817_s15 + $0x860] sm:$0xff]  }
  0x90   : > { %745 = vst [vmem:[%s7822_s17 + $0x268] sm:$0xff] %v744_v31   ;;  %v1000_v31 = vld [vmem:[%s7817_s15 + $0x868] sm:$0xff]  }
  0x91   : > { %749 = vst [vmem:[%s7822_s17 + $0x270] sm:$0xff] %v748_v32   ;;  %v1004_v32 = vld [vmem:[%s7817_s15 + $0x870] sm:$0xff]  }
  0x92   : > { %753 = vst [vmem:[%s7822_s17 + $0x278] sm:$0xff] %v752_v33   ;;  %v1008_v33 = vld [vmem:[%s7817_s15 + $0x878] sm:$0xff]  }
  0x93   : > { %757 = vst [vmem:[%s7822_s17 + $0x280] sm:$0xff] %v756_v34  }
  0x94   : > { %761 = vst [vmem:[%s7822_s17 + $0x288] sm:$0xff] %v760_v35  }
  0x95   : > { %765 = vst [vmem:[%s7822_s17 + $0x290] sm:$0xff] %v764_v36  }
  0x96   : > { %769 = vst [vmem:[%s7822_s17 + $0x298] sm:$0xff] %v768_v37  }
  0x97   : > { %773 = vst [vmem:[%s7822_s17 + $0x2a0] sm:$0xff] %v772_v38  }
  0x98   : > { %777 = vst [vmem:[%s7822_s17 + $0x2a8] sm:$0xff] %v776_v39  }
  0x99   : > { %781 = vst [vmem:[%s7822_s17 + $0x2b0] sm:$0xff] %v780_v40  }
  0x9a   : > { %785 = vst [vmem:[%s7822_s17 + $0x2b8] sm:$0xff] %v784_v41  }
  0x9b   : > { %789 = vst [vmem:[%s7822_s17 + $0x2c0] sm:$0xff] %v788_v42  }
  0x9c   : > { %793 = vst [vmem:[%s7822_s17 + $0x2c8] sm:$0xff] %v792_v43  }
  0x9d   : > { %797 = vst [vmem:[%s7822_s17 + $0x2d0] sm:$0xff] %v796_v44  }
  0x9e   : > { %801 = vst [vmem:[%s7822_s17 + $0x2d8] sm:$0xff] %v800_v45  }
  0x9f   : > { %805 = vst [vmem:[%s7822_s17 + $0x2e0] sm:$0xff] %v804_v46  }
  0xa0   : > { %809 = vst [vmem:[%s7822_s17 + $0x2e8] sm:$0xff] %v808_v47  }
  0xa1   : > { %813 = vst [vmem:[%s7822_s17 + $0x2f0] sm:$0xff] %v812_v48  }
  0xa2   : > { %817 = vst [vmem:[%s7822_s17 + $0x2f8] sm:$0xff] %v816_v49  }
  0xa3   : > { %821 = vst [vmem:[%s7822_s17 + $0x300] sm:$0xff] %v820_v50  }
  0xa4   : > { %825 = vst [vmem:[%s7822_s17 + $0x308] sm:$0xff] %v824_v51  }
  0xa5   : > { %829 = vst [vmem:[%s7822_s17 + $0x310] sm:$0xff] %v828_v52  }
  0xa6   : > { %833 = vst [vmem:[%s7822_s17 + $0x318] sm:$0xff] %v832_v53  }
  0xa7   : > { %837 = vst [vmem:[%s7822_s17 + $0x320] sm:$0xff] %v836_v54  }
  0xa8   : > { %841 = vst [vmem:[%s7822_s17 + $0x328] sm:$0xff] %v840_v55  }
  0xa9   : > { %845 = vst [vmem:[%s7822_s17 + $0x330] sm:$0xff] %v844_v56  }
  0xaa   : > { %849 = vst [vmem:[%s7822_s17 + $0x338] sm:$0xff] %v848_v57  }
  0xab   : > { %853 = vst [vmem:[%s7822_s17 + $0x340] sm:$0xff] %v852_v58  }
  0xac   : > { %857 = vst [vmem:[%s7822_s17 + $0x348] sm:$0xff] %v856_v59  }
  0xad   : > { %861 = vst [vmem:[%s7822_s17 + $0x350] sm:$0xff] %v860_v60  }
  0xae   : > { %865 = vst [vmem:[%s7822_s17 + $0x358] sm:$0xff] %v864_v61  }
  0xaf   : > { %869 = vst [vmem:[%s7822_s17 + $0x360] sm:$0xff] %v868_v62  }
  0xb0   : > { %873 = vst [vmem:[%s7822_s17 + $0x368] sm:$0xff] %v872_v63  }
  0xb1   : > { %877 = vst [vmem:[%s7822_s17 + $0x370] sm:$0xff] %v876_v0  }
  0xb2   : > { %881 = vst [vmem:[%s7822_s17 + $0x378] sm:$0xff] %v880_v1  }
  0xb3   : > { %885 = vst [vmem:[%s7822_s17 + $0x380] sm:$0xff] %v884_v2  }
  0xb4   : > { %889 = vst [vmem:[%s7822_s17 + $0x388] sm:$0xff] %v888_v3  }
  0xb5   : > { %893 = vst [vmem:[%s7822_s17 + $0x390] sm:$0xff] %v892_v4  }
  0xb6   : > { %897 = vst [vmem:[%s7822_s17 + $0x398] sm:$0xff] %v896_v5  }
  0xb7   : > { %901 = vst [vmem:[%s7822_s17 + $0x3a0] sm:$0xff] %v900_v6  }
  0xb8   : > { %905 = vst [vmem:[%s7822_s17 + $0x3a8] sm:$0xff] %v904_v7  }
  0xb9   : > { %909 = vst [vmem:[%s7822_s17 + $0x3b0] sm:$0xff] %v908_v8  }
  0xba   : > { %913 = vst [vmem:[%s7822_s17 + $0x3b8] sm:$0xff] %v912_v9  }
  0xbb   : > { %917 = vst [vmem:[%s7822_s17 + $0x3c0] sm:$0xff] %v916_v10  }
  0xbc   : > { %921 = vst [vmem:[%s7822_s17 + $0x3c8] sm:$0xff] %v920_v11  }
  0xbd   : > { %925 = vst [vmem:[%s7822_s17 + $0x3d0] sm:$0xff] %v924_v12  }
  0xbe   : > { %929 = vst [vmem:[%s7822_s17 + $0x3d8] sm:$0xff] %v928_v13  }
  0xbf   : > { %933 = vst [vmem:[%s7822_s17 + $0x3e0] sm:$0xff] %v932_v14  }
  0xc0   : > { %937 = vst [vmem:[%s7822_s17 + $0x3e8] sm:$0xff] %v936_v15  }
  0xc1   : > { %941 = vst [vmem:[%s7822_s17 + $0x3f0] sm:$0xff] %v940_v16  }
  0xc2   : > { %945 = vst [vmem:[%s7822_s17 + $0x3f8] sm:$0xff] %v944_v17  }
  0xc3   : > { %949 = vst [vmem:[%s7822_s17 + $0x400] sm:$0xff] %v948_v18  }
  0xc4   : > { %953 = vst [vmem:[%s7822_s17 + $0x408] sm:$0xff] %v952_v19  }
  0xc5   : > { %957 = vst [vmem:[%s7822_s17 + $0x410] sm:$0xff] %v956_v20  }
  0xc6   : > { %961 = vst [vmem:[%s7822_s17 + $0x418] sm:$0xff] %v960_v21  }
  0xc7   : > { %965 = vst [vmem:[%s7822_s17 + $0x420] sm:$0xff] %v964_v22  }
  0xc8   : > { %969 = vst [vmem:[%s7822_s17 + $0x428] sm:$0xff] %v968_v23  }
  0xc9   : > { %973 = vst [vmem:[%s7822_s17 + $0x430] sm:$0xff] %v972_v24  }
  0xca   : > { %977 = vst [vmem:[%s7822_s17 + $0x438] sm:$0xff] %v976_v25  }
  0xcb   : > { %981 = vst [vmem:[%s7822_s17 + $0x440] sm:$0xff] %v980_v26  }
  0xcc   : > { %985 = vst [vmem:[%s7822_s17 + $0x448] sm:$0xff] %v984_v27  }
  0xcd   : > { %989 = vst [vmem:[%s7822_s17 + $0x450] sm:$0xff] %v988_v28  }
  0xce   : > { %993 = vst [vmem:[%s7822_s17 + $0x458] sm:$0xff] %v992_v29  }
  0xcf   : > { %997 = vst [vmem:[%s7822_s17 + $0x460] sm:$0xff] %v996_v30  }
  0xd0   : > { %1001 = vst [vmem:[%s7822_s17 + $0x468] sm:$0xff] %v1000_v31  }
  0xd1   : > { %1005 = vst [vmem:[%s7822_s17 + $0x470] sm:$0xff] %v1004_v32  }
  0xd2   : > { %1009 = vst [vmem:[%s7822_s17 + $0x478] sm:$0xff] %v1008_v33  }
  0xd3 PF: > { %p6237_p0 = scmp.ge.s32.totalorder %s7625_s10, 1  ;;  %p2800_p1 = scmp.lt.s32.totalorder %s7625_s10, 5 }
  0xd5   : > { %p2801_p2 = pnand %p6237_p0, %p2800_p1 }
  0xd6   : > { %s2807_s1 = sand.u32 (!%p2801_p2), 1, %s7601_s27   ;;  %s8839_s12 = sand.u32 (!%p2801_p2), 1, %s7593_s25  }
  0xd7   : > { %2804 = sbr.rel (%p2801_p2) target bundleno = 1552 (0x610), region = 130  ;;  %s8117_s14 = sshll.u32 (!%p2801_p2), %s8839_s12, 7 }
  0xd8   : > { %s7421_s13 = smul.u32 (!%p2801_p2), 144, %s2807_s1  ;;  %p2876_p3 = scmp.lt.s32.totalorder (!%p2801_p2), %s7613_s30, 1 }
  0xd9   : > { %s8849_s0 = sld [smem:[#allocation11_spill]] (!%p2801_p2)  ;;  %s8440_s12 = scalar_lea.vmem (!%p2801_p2), [#allocation5], %s8117_s14 }
  0xda   : > { %s8119_s22 = scalar_lea.vmem (!%p2801_p2), [#allocation3], %s7421_s13  ;;  %p6493_p5 = scmp.ne.s32.totalorder (!%p2801_p2), %s7609_s29, 0 }
  0xdc   : > { %v6367_v34 = vld [vmem:[%s8119_s22 + $0x70] sm:$0xf]  ;;  %v7268_v35 = vld [vmem:[%s8119_s22 + $0x74] sm:$0xf0]  ;;  %v7267_v36 = vld [vmem:[%s8119_s22 + $0x74] sm:$0xf] }
  0xdd   : > { %v6368_v37 = vor.u32 %v7268_v35, %v6367_v34  ;;  %v6369_v38 = vld [vmem:[%s8119_s22 + $0x78] sm:$0xf0]  ;;  %v6359_v39 = vld [vmem:[%s8119_s22 + $0x60] sm:$0xf]  ;;  %v7266_v40 = vld [vmem:[%s8119_s22 + $0x64] sm:$0xf0] }
  0xde   : > { %v6372_v41 = vor.u32 %v7267_v36, %v6369_v38  ;;  %v7265_v42 = vld [vmem:[%s8119_s22 + $0x64] sm:$0xf]  ;;  %v6361_v43 = vld [vmem:[%s8119_s22 + $0x68] sm:$0xf0]  ;;  %v6360_v44 = vor.u32 %v7266_v40, %v6359_v39  ;;  %v6351_v46 = vld [vmem:[%s8119_s22 + $0x50] sm:$0xf] }
  0xdf   : > { %3129 = vmatpush.bf16.msra.mxu0 %v6368_v37  ;;  %v6364_v45 = vor.u32 %v7265_v42, %v6361_v43  ;;  %v7264_v47 = vld [vmem:[%s8119_s22 + $0x54] sm:$0xf0]  ;;  %v7263_v48 = vld [vmem:[%s8119_s22 + $0x54] sm:$0xf]  ;;  %v6353_v49 = vld [vmem:[%s8119_s22 + $0x58] sm:$0xf0] }
  0xe0   : > { %3227 = vmatpush.bf16.msra.mxu2 %v6372_v41  ;;  %v6352_v50 = vor.u32 %v7264_v47, %v6351_v46  ;;  %v6356_v51 = vor.u32 %v7263_v48, %v6353_v49  ;;  %v6343_v52 = vld [vmem:[%s8119_s22 + $0x40] sm:$0xf]  ;;  %v7262_v53 = vld [vmem:[%s8119_s22 + $0x44] sm:$0xf0]  ;;  %v7261_v54 = vld [vmem:[%s8119_s22 + $0x44] sm:$0xf] }
  0xe1   : > { %v6345_v55 = vld [vmem:[%s8119_s22 + $0x48] sm:$0xf0]  ;;  %s8139_s16 = scalar_select %p2876_p3, %s7613_s30, 1  ;;  %v6344_v56 = vor.u32 %v7262_v53, %v6343_v52  ;;  %v7269_v57 = vld [vmem:[%s8119_s22 + $0x84] sm:$0xf]  ;;  %vm3104_vm0 = vcmask 130048  }
  0xe2   : > { %v6377_v58 = vld [vmem:[%s8119_s22 + $0x88] sm:$0xf0]  ;;  %v6375_v59 = vld [vmem:[%s8119_s22 + $0x80] sm:$0xf]  ;;  %v6348_v60 = vor.u32 %v7261_v54, %v6345_v55  ;;  %v6335_v61 = vld [vmem:[%s8119_s22 + $0x30] sm:$0xf] }
  0xe3   : > { %3130 = vmatpush.bf16.msra.mxu0 %v6360_v44  ;;  %v7260_v62 = vld [vmem:[%s8119_s22 + $0x34] sm:$0xf0]  ;;  %s2903_s18 = scalar_lea.vmem %s8833_s5, %s8139_s16  ;;  %v6380_v63 = vor.u32 %v7269_v57, %v6377_v58  ;;  %v7270_v0 = vld [vmem:[%s8119_s22 + $0x84] sm:$0xf0]  ;;  %v7259_v1 = vld [vmem:[%s8119_s22 + $0x34] sm:$0xf] }
  0xe4   : > { %3228 = vmatpush.bf16.msra.mxu2 %v6364_v45  ;;  %v6337_v2 = vld [vmem:[%s8119_s22 + $0x38] sm:$0xf0]  ;;  %v6376_v3 = vor.u32 %v7270_v0, %v6375_v59  ;;  %v6336_v4 = vor.u32 %v7260_v62, %v6335_v61  ;;  %v6327_v6 = vld [vmem:[%s8119_s22 + $0x20] sm:$0xf]  ;;  %v7258_v7 = vld [vmem:[%s8119_s22 + $0x24] sm:$0xf0] }
  0xe5   : > { %7416 = vmatpush.bf16.msra.mxu3 %v6380_v63  ;;  %v6340_v5 = vor.u32 %v7259_v1, %v6337_v2  ;;  %v7257_v8 = vld [vmem:[%s8119_s22 + $0x24] sm:$0xf]  ;;  %v6329_v9 = vld [vmem:[%s8119_s22 + $0x28] sm:$0xf0]  ;;  %v6328_v10 = vor.u32 %v7258_v7, %v6327_v6  ;;  %v6319_v12 = vld [vmem:[%s8119_s22 + $0x10] sm:$0xf] }
  0xe6   : > { %7415 = vmatpush.bf16.msra.mxu1 %v6376_v3  ;;  %v6332_v11 = vor.u32 %v7257_v8, %v6329_v9  ;;  %v7256_v13 = vld [vmem:[%s8119_s22 + $0x14] sm:$0xf0]  ;;  %v7255_v14 = vld [vmem:[%s8119_s22 + $0x14] sm:$0xf]  ;;  %v6321_v15 = vld [vmem:[%s8119_s22 + $0x18] sm:$0xf0] }
  0xe7   : > { %3131 = vmatpush.bf16.msra.mxu0 %v6352_v50  ;;  %s7236_s20 = sshll.u32 %s8139_s16, 7  ;;  %v6320_v16 = vor.u32 %v7256_v13, %v6319_v12  ;;  %v6324_v17 = vor.u32 %v7255_v14, %v6321_v15  ;;  %v6311_v18 = vld [vmem:[%s8119_s22] sm:$0xf]  ;;  %v7254_v19 = vld [vmem:[%s8119_s22 + $0x4] sm:$0xf0]  ;;  %s6242_s21 = sshll.u32 %s8139_s16, 2 }
  0xe8   : > { %3229 = vmatpush.bf16.msra.mxu2 %v6356_v51  ;;  %s8171_s17 = scalar_lea.vmem %s8849_s0, %s7236_s20  ;;  %v7253_v20 = vld [vmem:[%s8119_s22 + $0x4] sm:$0xf]  ;;  %v6313_v21 = vld [vmem:[%s8119_s22 + $0x8] sm:$0xf0]  ;;  %v6312_v22 = vor.u32 %v7254_v19, %v6311_v18  ;;  %s6241_s22 = sshll.u32 %s7609_s29, 1 }
  0xe9   : > { %v6247_v23 = vld [vmem:[%s8171_s17] sm:$0xf]  ;;  %v7238_v24 = vld [vmem:[%s8171_s17 + $0x4] sm:$0xf0]  ;;  %v6316_v25 = vor.u32 %v7253_v20, %v6313_v21  ;;  %v6255_v27 = vld [vmem:[%s8171_s17 + $0x10] sm:$0xf] }
  0xea   : > { %v6248_v26 = vor.u32 %v7238_v24, %v6247_v23  ;;  %v7240_v28 = vld [vmem:[%s8171_s17 + $0x14] sm:$0xf0]  ;;  %v7243_v30 = vld [vmem:[%s8171_s17 + $0x34] sm:$0xf]  ;;  %v6273_v31 = vld [vmem:[%s8171_s17 + $0x38] sm:$0xf0] }
  0xeb   : > { %3132 = vmatpush.bf16.msra.mxu0 %v6344_v56  ;;  %v6256_v29 = vor.u32 %v7240_v28, %v6255_v27  ;;  %v6276_v32 = vor.u32 %v7243_v30, %v6273_v31  ;;  %v6263_v33 = vld [vmem:[%s8171_s17 + $0x20] sm:$0xf]  ;;  %v7242_v34 = vld [vmem:[%s8171_s17 + $0x24] sm:$0xf0]  ;;  %v7245_v36 = vld [vmem:[%s8171_s17 + $0x44] sm:$0xf] }
  0xec   : > { %3230 = vmatpush.bf16.msra.mxu2 %v6348_v60  ;;  %v6264_v35 = vor.u32 %v7242_v34, %v6263_v33  ;;  %v6281_v37 = vld [vmem:[%s8171_s17 + $0x48] sm:$0xf0]  ;;  %v6271_v39 = vld [vmem:[%s8171_s17 + $0x30] sm:$0xf]  ;;  %v7244_v40 = vld [vmem:[%s8171_s17 + $0x34] sm:$0xf0] }
  0xed   : > { %6392 = vmatmul.msk.bf16.vlgmr.msra.gmra.mxu3 %vm3104_vm0, %v6276_v32  ;;  %6384 = vmatmul.msk.bf16.vlgmr.msra.gmra.mxu1 %vm3104_vm0, %v6276_v32  ;;  %v6284_v38 = vor.u32 %v7245_v36, %v6281_v37  ;;  %v6272_v41 = vor.u32 %v7244_v40, %v6271_v39  ;;  %v7247_v42 = vld [vmem:[%s8171_s17 + $0x54] sm:$0xf]  ;;  %v6289_v43 = vld [vmem:[%s8171_s17 + $0x58] sm:$0xf0]  ;;  %v6279_v45 = vld [vmem:[%s8171_s17 + $0x40] sm:$0xf] }
  0xee   : > { %v6292_v44 = vor.u32 %v7247_v42, %v6289_v43  ;;  %v7246_v46 = vld [vmem:[%s8171_s17 + $0x44] sm:$0xf0]  ;;  %v7249_v48 = vld [vmem:[%s8171_s17 + $0x64] sm:$0xf]  ;;  %v6297_v49 = vld [vmem:[%s8171_s17 + $0x68] sm:$0xf0] }
  0xef   : > { %3133 = vmatpush.bf16.msra.mxu0 %v6336_v4  ;;  %v6280_v47 = vor.u32 %v7246_v46, %v6279_v45  ;;  %v6300_v50 = vor.u32 %v7249_v48, %v6297_v49  ;;  %v6287_v51 = vld [vmem:[%s8171_s17 + $0x50] sm:$0xf]  ;;  %v7248_v52 = vld [vmem:[%s8171_s17 + $0x54] sm:$0xf0]  ;;  %v7251_v54 = vld [vmem:[%s8171_s17 + $0x74] sm:$0xf] }
  0xf0   : > { %3231 = vmatpush.bf16.msra.mxu2 %v6340_v5  ;;  %v6288_v53 = vor.u32 %v7248_v52, %v6287_v51  ;;  %v6305_v55 = vld [vmem:[%s8171_s17 + $0x78] sm:$0xf0]  ;;  %v6295_v57 = vld [vmem:[%s8171_s17 + $0x60] sm:$0xf]  ;;  %v7250_v58 = vld [vmem:[%s8171_s17 + $0x64] sm:$0xf0] }
  0xf1   : > { %v6308_v56 = vor.u32 %v7251_v54, %v6305_v55  ;;  %v6296_v59 = vor.u32 %v7250_v58, %v6295_v57  ;;  %v6303_v60 = vld [vmem:[%s8171_s17 + $0x70] sm:$0xf]  ;;  %v7252_v61 = vld [vmem:[%s8171_s17 + $0x74] sm:$0xf0]  ;;  %v6249_v0 = vld [vmem:[%s8171_s17 + $0x8] sm:$0xf0] }
  0xf2   : > { %v6304_v62 = vor.u32 %v7252_v61, %v6303_v60  ;;  %v7239_v5 = vld [vmem:[%s8171_s17 + $0x14] sm:$0xf]  ;;  %v6257_v6 = vld [vmem:[%s8171_s17 + $0x18] sm:$0xf0]  ;;  %v7241_v12 = vld [vmem:[%s8171_s17 + $0x24] sm:$0xf] }
  0xf3   : > { %3134 = vmatpush.bf16.msra.mxu0 %v6328_v10  ;;  %v6260_v8 = vor.u32 %v7239_v5, %v6257_v6  ;;  %v6265_v13 = vld [vmem:[%s8171_s17 + $0x28] sm:$0xf0]  ;;  %p2885_p4 = scmp.lt.s32.totalorder %s6241_s22, 3  ;;  %s7422_s20 = smul.u32 1152, %s2807_s1 }
  0xf4   : > { %3232 = vmatpush.bf16.msra.mxu2 %v6332_v11 }
  0xf5   : > { %s8871_s22 = smov (!%p2885_p4, %s6241_s22), 3 }
  0xf6   : > { %s2888_s15 = sadd.s32 %s6242_s21, %s8871_s22 }
  0xf7   : > { %3135 = vmatpush.bf16.msra.mxu0 %v6320_v16  ;;  %v6268_v16 = vor.u32 %v7241_v12, %v6265_v13  ;;  %s2889_s27 = scalar_lea.vmem %s8830_s2, %s2888_s15 }
  0xf8   : > { %3233 = vmatpush.bf16.msra.mxu2 %v6324_v17 }
  0xfb   : > { %3136 = vmatpush.bf16.msra.mxu0 %v6312_v22 }
  0xfc   : > { %3234 = vmatpush.bf16.msra.mxu2 %v6316_v25 }
  0xfd   : > { %6393 = vmatmul.msk.bf16.gmra.mxu3 %vm3104_vm0, %v6284_v38  ;;  %6385 = vmatmul.msk.bf16.gmra.mxu1 %vm3104_vm0, %v6284_v38 }
  0xfe   : > { %3137 = vmatmul.bf16.vlgmr.msra.gmra.mxu0 %v6248_v26 }
  0xff   : > { %3185 = vmatpush.bf16.msrb.mxu0 %v6376_v3  ;;  %3235 = vmatmul.bf16.vlgmr.msra.gmra.mxu2 %v6248_v26  ;;  %v3325_v26 = vld [vmem:[%s2889_s27] sm:$0x3] }
 0x100   : > { %3283 = vmatpush.bf16.msrb.mxu2 %v6380_v63  ;;  %v7237_v63 = vld [vmem:[%s8171_s17 + $0x4] sm:$0xf]  ;;  %s8249_s17 = scalar_lea.vmem [#allocation4], %s7422_s20  ;;  %s2898_s20 = scalar_lea.vmem %s8831_s3, %s2888_s15 }
 0x101   : > { %v6252_v1 = vor.u32 %v7237_v63, %v6249_v0  ;;  %v7286_v22 = vld [vmem:[%s8249_s17 + $0x278] sm:$0xff]  ;;  %v7285_v31 = vld [vmem:[%s8249_s17 + $0x270] sm:$0xff]  ;;  %v3363_v32 = vld [vmem:[%s2898_s20] sm:$0x3] }
 0x102   : > { %3627 = vmatpush.bf16.msrb.mxu3 %v7286_v22  ;;  %v7278_v30 = vld [vmem:[%s8249_s17 + $0x238] sm:$0xff]  ;;  %v8265_v34 = vperm.slane %v3363_v32, 0  ;;  %v7277_v43 = vld [vmem:[%s8249_s17 + $0x230] sm:$0xff]  ;;  %v7284_v45 = vld [vmem:[%s8249_s17 + $0x268] sm:$0xff]  ;;  %v8275_v49 = vperm.slane %v3363_v32, 1 }
 0x103   : > { %3578 = vmatpush.bf16.msrb.mxu1 %v7278_v30  ;;  %v7276_v58 = vld [vmem:[%s8249_s17 + $0x228] sm:$0xff] }
 0x106   : > { %3628 = vmatpush.bf16.msrb.mxu3 %v7285_v31 }
 0x107   : > { %3579 = vmatpush.bf16.msrb.mxu1 %v7277_v43 }
 0x10a   : > { %3629 = vmatpush.bf16.msrb.mxu3 %v7284_v45 }
 0x10b   : > { %3580 = vmatpush.bf16.msrb.mxu1 %v7276_v58  ;;  %v7281_v58 = vld [vmem:[%s8249_s17 + $0x250] sm:$0xff] }
 0x10d   : > { %6394 = vmatmul.msk.bf16.gmra.mxu3 %vm3104_vm0, %v6292_v44  ;;  %6386 = vmatmul.msk.bf16.gmra.mxu1 %vm3104_vm0, %v6292_v44 }
 0x10e   : > { %3142 = vmatmul.bf16.gmra.mxu0 %v6256_v29 }
 0x10f   : > { %3240 = vmatmul.bf16.gmra.mxu2 %v6256_v29  ;;  %v8257_v29 = vperm.slane %v3325_v26, 0 }
 0x11d   : > { %6395 = vmatmul.msk.bf16.gmra.mxu3 %vm3104_vm0, %v6300_v50  ;;  %6387 = vmatmul.msk.bf16.gmra.mxu1 %vm3104_vm0, %v6300_v50 }
 0x11e   : > { %3147 = vmatmul.bf16.gmra.mxu0 %v6264_v35 }
 0x11f   : > { %3245 = vmatmul.bf16.gmra.mxu2 %v6264_v35 }
 0x12d   : > { %6396 = vmatmul.msk.bf16.gmra.mxu3 %vm3104_vm0, %v6308_v56  ;;  %6388 = vmatmul.msk.bf16.gmra.mxu1 %vm3104_vm0, %v6308_v56 }
 0x12e   : > { %3152 = vmatmul.bf16.gmra.mxu0 %v6272_v41 }
 0x12f   : > { %3250 = vmatmul.bf16.gmra.mxu2 %v6272_v41  ;;  %v8268_v41 = vperm.slane %v3325_v26, 1 }
 0x13e   : > { %3157 = vmatmul.bf16.gmra.mxu0 %v6280_v47 }
 0x13f   : > { %3255 = vmatmul.bf16.gmra.mxu2 %v6280_v47 }
 0x14e   : > { %3162 = vmatmul.bf16.gmra.mxu0 %v6288_v53 }
 0x14f   : > { %3260 = vmatmul.bf16.gmra.mxu2 %v6288_v53 }
 0x15e   : > { %3167 = vmatmul.bf16.gmra.mxu0 %v6296_v59 }
 0x15f   : > { %3265 = vmatmul.bf16.gmra.mxu2 %v6296_v59 }
 0x16a   : > { %v3202_v14 = vpop.f32.mrf.mxu1 }
 0x16e   : > { %3172 = vmatmul.bf16.gmra.mxu0 %v6304_v62 }
 0x16f   : > { %3270 = vmatmul.bf16.gmra.mxu2 %v6304_v62 }
 0x170   : > { %v3300_v18 = vpop.f32.mrf.mxu3 }
 0x172   : > { %v3204_v19 = vpop.f32.mrf.mxu1 }
 0x178   : > { %v3302_v23 = vpop.f32.mrf.mxu3 }
 0x17a   : > { %v3207_v27 = vpop.f32.mrf.mxu1 }
 0x17b   : > { %v8213_v2 = vpop.f32.mrf.mxu0 }
 0x17e   : > { %6381 = vmatmul.msk.bf16.vlgmr.msrb.gmra.mxu0 %vm3104_vm0, %v6252_v1 }
 0x17f   : > { %6389 = vmatmul.msk.bf16.vlgmr.msrb.gmra.mxu2 %vm3104_vm0, %v6252_v1 }
 0x180   : > { %v3305_v36 = vpop.f32.mrf.mxu3 }
 0x182   : > { %v8217_v3 = vpop.f32.mrf.mxu2  ;;  %v3209_v42 = vpop.f32.mrf.mxu1 }
 0x183   : > { %v8219_v4 = vpop.f32.mrf.mxu0 }
 0x188   : > { %v3307_v55 = vpop.f32.mrf.mxu3 }
 0x18a   : > { %v8223_v7 = vpop.f32.mrf.mxu2  ;;  %v3212_v60 = vpop.f32.mrf.mxu1 }
 0x18b   : > { %v8225_v9 = vpop.f32.mrf.mxu0 }
 0x18e   : > { %6382 = vmatmul.msk.bf16.gmra.mxu0 %vm3104_vm0, %v6260_v8 }
 0x18f   : > { %6390 = vmatmul.msk.bf16.gmra.mxu2 %vm3104_vm0, %v6260_v8 }
 0x192   : > { %v8229_v10 = vpop.f32.mrf.mxu2  ;;  %v3214_v26 = vpop.f32.mrf.mxu1 }
 0x193   : > { %v8231_v11 = vpop.f32.mrf.mxu0 }
 0x19a   : > { %v8235_v15 = vpop.f32.mrf.mxu2 }
 0x19b   : > { %v8238_v17 = vpop.f32.mrf.mxu0 }
 0x19e   : > { %6383 = vmatmul.msk.bf16.gmra.mxu0 %vm3104_vm0, %v6268_v16 }
 0x19f   : > { %6391 = vmatmul.msk.bf16.gmra.mxu2 %vm3104_vm0, %v6268_v16 }
 0x1a2   : > { %v8244_v20 = vpop.f32.mrf.mxu2 }
 0x1a3   : > { %v8247_v21 = vpop.f32.mrf.mxu0 }
 0x1aa   : > { %v8255_v24 = vpop.f32.mrf.mxu2 }
 0x1ab   : > { %v3153_v25 = vpop.f32.mrf.mxu0 }
 0x1ac   : > { %v3203_v28 = vadd.f32 %v3202_v14, %v3153_v25  ;;  %v7283_v14 = vld [vmem:[%s8249_s17 + $0x260] sm:$0xff] }
 0x1ad   : > { %3630 = vmatpush.bf16.msrb.mxu3 %v7283_v14 }
 0x1ae   : > { %v3343_v33 = vmul.f32 %v8257_v29, %v3203_v28 }
 0x1b0   : > { %v3381_v39 = vadd.f32 %v8265_v34, %v3343_v33 }
 0x1b2   : > { %v3251_v35 = vpop.f32.mrf.mxu2  ;;  %v3413_v47 = vmax.f32 %v3381_v39, 0.0 }
 0x1b3   : > { %v3155_v37 = vpop.f32.mrf.mxu0  ;;  %v3301_v40 = vadd.f32 %v3300_v18, %v3251_v35  ;;  %v3310_v18 = vpop.f32.mrf.mxu3 }
 0x1b4   : > { %v3205_v38 = vadd.f32 %v3204_v19, %v3155_v37  ;;  %v7275_v19 = vld [vmem:[%s8249_s17 + $0x220] sm:$0xff] }
 0x1b5   : > { %v3344_v48 = vmul.f32 %v8268_v41, %v3301_v40  ;;  %3581 = vmatpush.bf16.msrb.mxu1 %v7275_v19 }
 0x1b6   : > { %v3345_v44 = vmul.f32 %v8257_v29, %v3205_v38 }
 0x1b7   : > { %v3382_v59 = vadd.f32 %v8275_v49, %v3344_v48 }
 0x1b8   : > { %v3383_v46 = vadd.f32 %v8265_v34, %v3345_v44 }
 0x1b9   : > { %v3414_v63 = vmax.f32 %v3382_v59, 0.0 }
 0x1ba   : > { %v3253_v50 = vpop.f32.mrf.mxu2  ;;  %v3415_v51 = vmax.f32 %v3383_v46, 0.0  ;;  %v3217_v46 = vpop.f32.mrf.mxu1 }
 0x1bb   : > { %v3303_v52 = vadd.f32 %v3302_v23, %v3253_v50  ;;  %v3158_v53 = vpop.f32.mrf.mxu0  ;;  %v3312_v40 = vpop.f32.mrf.mxu3 }
 0x1bc   : > { %v3208_v54 = vadd.f32 %v3207_v27, %v3158_v53  ;;  %v8277_v56 = vpack.c.bf16 %v3415_v51, %v3413_v47 }
 0x1bd   : > { %v3346_v57 = vmul.f32 %v8268_v41, %v3303_v52 }
 0x1be   : > { %v3347_v62 = vmul.f32 %v8257_v29, %v3208_v54 }
 0x1bf   : > { %v3384_v61 = vadd.f32 %v8275_v49, %v3346_v57  ;;  %v7274_v57 = vld [vmem:[%s8249_s17 + $0x218] sm:$0xff] }
 0x1c0   : > { %v3385_v12 = vadd.f32 %v8265_v34, %v3347_v62  ;;  %3582 = vmatpush.bf16.msrb.mxu1 %v7274_v57 }
 0x1c1   : > { %v3416_v0 = vmax.f32 %v3384_v61, 0.0 }
 0x1c2   : > { %v3256_v1 = vpop.f32.mrf.mxu2  ;;  %v3417_v23 = vmax.f32 %v3385_v12, 0.0 }
 0x1c3   : > { %v3160_v5 = vpop.f32.mrf.mxu0  ;;  %v8284_v6 = vpack.c.bf16 %v3416_v0, %v3414_v63  ;;  %v3306_v13 = vadd.f32 %v3305_v36, %v3256_v1  ;;  %v7282_v36 = vld [vmem:[%s8249_s17 + $0x258] sm:$0xff] }
 0x1c4   : > { %v3210_v8 = vadd.f32 %v3209_v42, %v3160_v5  ;;  %3631 = vmatpush.bf16.msrb.mxu3 %v7282_v36 }
 0x1c5   : > { %v3348_v25 = vmul.f32 %v8268_v41, %v3306_v13 }
 0x1c6   : > { %v3349_v16 = vmul.f32 %v8257_v29, %v3210_v8  ;;  %v3219_v8 = vpop.f32.mrf.mxu1 }
 0x1c7   : > { %v3386_v37 = vadd.f32 %v8275_v49, %v3348_v25 }
 0x1c8   : > { %v3387_v22 = vadd.f32 %v8265_v34, %v3349_v16  ;;  %3632 = vmatpush.bf16.msrb.mxu3 %v7281_v58 }
 0x1c9   : > { %v3418_v42 = vmax.f32 %v3386_v37, 0.0 }
 0x1ca   : > { %v3258_v27 = vpop.f32.mrf.mxu2  ;;  %v3419_v28 = vmax.f32 %v3387_v22, 0.0  ;;  %v7273_v22 = vld [vmem:[%s8249_s17 + $0x210] sm:$0xff] }
 0x1cb   : > { %v3308_v30 = vadd.f32 %v3307_v55, %v3258_v27  ;;  %v3163_v31 = vpop.f32.mrf.mxu0  ;;  %3583 = vmatpush.bf16.msrb.mxu1 %v7273_v22 }
 0x1cc   : > { %v3213_v32 = vadd.f32 %v3212_v60, %v3163_v31  ;;  %v8292_v33 = vpack.c.bf16 %v3419_v28, %v3417_v23  ;;  %v3315_v60 = vpop.f32.mrf.mxu3  ;;  %v7280_v23 = vld [vmem:[%s8249_s17 + $0x248] sm:$0xff] }
 0x1cd   : > { %v3350_v35 = vmul.f32 %v8268_v41, %v3308_v30  ;;  %3633 = vmatpush.bf16.msrb.mxu3 %v7280_v23 }
 0x1ce   : > { %v3351_v39 = vmul.f32 %v8257_v29, %v3213_v32  ;;  %v3222_v36 = vpop.f32.mrf.mxu1 }
 0x1cf   : > { %v3388_v38 = vadd.f32 %v8275_v49, %v3350_v35  ;;  %v7272_v35 = vld [vmem:[%s8249_s17 + $0x208] sm:$0xff] }
 0x1d0   : > { %v3389_v50 = vadd.f32 %v8265_v34, %v3351_v39  ;;  %3584 = vmatpush.bf16.msrb.mxu1 %v7272_v35 }
 0x1d1   : > { %v3420_v43 = vmax.f32 %v3388_v38, 0.0 }
 0x1d2   : > { %v3261_v44 = vpop.f32.mrf.mxu2  ;;  %v3421_v54 = vmax.f32 %v3389_v50, 0.0 }
 0x1d3   : > { %v3165_v45 = vpop.f32.mrf.mxu0  ;;  %v8299_v47 = vpack.c.bf16 %v3420_v43, %v3418_v42  ;;  %v3311_v51 = vadd.f32 %v3310_v18, %v3261_v44  ;;  %v7271_v42 = vld [vmem:[%s8249_s17 + $0x200] sm:$0xff] }
 0x1d4   : > { %v3215_v48 = vadd.f32 %v3214_v26, %v3165_v45  ;;  %v3317_v28 = vpop.f32.mrf.mxu3  ;;  %3585 = vmatpush.bf16.msrb.mxu1 %v7271_v42 }
 0x1d5   : > { %v3352_v55 = vmul.f32 %v8268_v41, %v3311_v51 }
 0x1d6   : > { %v3353_v52 = vmul.f32 %v8257_v29, %v3215_v48  ;;  %v3224_v57 = vpop.f32.mrf.mxu1 }
 0x1d7   : > { %v3390_v12 = vadd.f32 %v8275_v49, %v3352_v55  ;;  %v7279_v55 = vld [vmem:[%s8249_s17 + $0x240] sm:$0xff] }
 0x1d8   : > { %v3391_v53 = vadd.f32 %v8265_v34, %v3353_v52  ;;  %3634 = vmatpush.bf16.msrb.mxu3 %v7279_v55 }
 0x1d9   : > { %v3422_v16 = vmax.f32 %v3390_v12, 0.0 }
 0x1da   : > { %v3263_v59 = vpop.f32.mrf.mxu2  ;;  %v3423_v61 = vmax.f32 %v3391_v53, 0.0 }
 0x1db   : > { %v3313_v62 = vadd.f32 %v3312_v40, %v3263_v59  ;;  %v3168_v63 = vpop.f32.mrf.mxu0 }
 0x1dc   : > { %v3218_v0 = vadd.f32 %v3217_v46, %v3168_v63  ;;  %v8307_v1 = vpack.c.bf16 %v3423_v61, %v3421_v54  ;;  %v3320_v52 = vpop.f32.mrf.mxu3 }
 0x1dd   : > { %v3354_v5 = vmul.f32 %v8268_v41, %v3313_v62 }
 0x1de   : > { %v3355_v14 = vmul.f32 %v8257_v29, %v3218_v0 }
 0x1df   : > { %v3392_v13 = vadd.f32 %v8275_v49, %v3354_v5 }
 0x1e0   : > { %v3393_v30 = vadd.f32 %v8265_v34, %v3355_v14 }
 0x1e1   : > { %v3424_v18 = vmax.f32 %v3392_v13, 0.0 }
 0x1e2   : > { %v3266_v19 = vpop.f32.mrf.mxu2  ;;  %v3425_v38 = vmax.f32 %v3393_v30, 0.0 }
 0x1e3   : > { %v3170_v25 = vpop.f32.mrf.mxu0  ;;  %v8315_v26 = vpack.c.bf16 %v3424_v18, %v3422_v16  ;;  %v3316_v31 = vadd.f32 %v3315_v60, %v3266_v19 }
 0x1e4   : > { %v3220_v27 = vadd.f32 %v3219_v8, %v3170_v25  ;;  %v3322_v14 = vpop.f32.mrf.mxu3 }
 0x1e5   : > { %v3356_v39 = vmul.f32 %v8268_v41, %v3316_v31 }
 0x1e6   : > { %v3357_v32 = vmul.f32 %v8257_v29, %v3220_v27 }
 0x1e7   : > { %v3394_v51 = vadd.f32 %v8275_v49, %v3356_v39 }
 0x1e8   : > { %v3395_v37 = vadd.f32 %v8265_v34, %v3357_v32 }
 0x1e9   : > { %v3426_v58 = vmax.f32 %v3394_v51, 0.0 }
 0x1ea   : > { %v3268_v40 = vpop.f32.mrf.mxu2  ;;  %v3427_v43 = vmax.f32 %v3395_v37, 0.0 }
 0x1eb   : > { %v3318_v44 = vadd.f32 %v3317_v28, %v3268_v40  ;;  %v3173_v45 = vpop.f32.mrf.mxu0 }
 0x1ec   : > { %v3223_v46 = vadd.f32 %v3222_v36, %v3173_v45  ;;  %v8323_v48 = vpack.c.bf16 %v3427_v43, %v3425_v38 }
 0x1ed   : > { %v3358_v50 = vmul.f32 %v8268_v41, %v3318_v44 }
 0x1ee   : > { %v3359_v54 = vmul.f32 %v8257_v29, %v3223_v46 }
 0x1ef   : > { %v3396_v53 = vadd.f32 %v8275_v49, %v3358_v50 }
 0x1f0   : > { %v3397_v63 = vadd.f32 %v8265_v34, %v3359_v54 }
 0x1f1   : > { %v3428_v59 = vmax.f32 %v3396_v53, 0.0 }
 0x1f2   : > { %v3271_v60 = vpop.f32.mrf.mxu2  ;;  %v3429_v12 = vmax.f32 %v3397_v63, 0.0 }
 0x1f3   : > { %v3175_v61 = vpop.f32.mrf.mxu0  ;;  %v8330_v62 = vpack.c.bf16 %v3428_v59, %v3426_v58  ;;  %v3321_v5 = vadd.f32 %v3320_v52, %v3271_v60 }
 0x1f4   : > { %v3225_v0 = vadd.f32 %v3224_v57, %v3175_v61 }
 0x1f5   : > { %v3360_v16 = vmul.f32 %v8268_v41, %v3321_v5 }
 0x1f6   : > { %v3361_v8 = vmul.f32 %v8257_v29, %v3225_v0 }
 0x1f7   : > { %v3398_v27 = vadd.f32 %v8275_v49, %v3360_v16 }
 0x1f8   : > { %v3399_v13 = vadd.f32 %v8265_v34, %v3361_v8 }
 0x1f9   : > { %v3430_v32 = vmax.f32 %v3398_v27, 0.0 }
 0x1fa   : > { %v3431_v18 = vmax.f32 %v3399_v13, 0.0  ;;  %v3273_v19 = vpop.f32.mrf.mxu2 }
 0x1fb   : > { %v3323_v22 = vadd.f32 %v3322_v14, %v3273_v19  ;;  %v3187_v23 = vpop.f32.mrf.mxu0 }
 0x1fc   : > { %v8336_v25 = vpack.c.bf16 %v3431_v18, %v3429_v12  ;;  %v3188_v30 = vadd.f32 %v3187_v23, %v8213_v2 }
 0x1fd   : > { %v3362_v28 = vmul.f32 %v8268_v41, %v3323_v22 }
 0x1fe   : > { %v3331_v36 = vmul.f32 %v8257_v29, %v3188_v30 }
 0x1ff   : > { %v3400_v31 = vadd.f32 %v8275_v49, %v3362_v28 }
 0x200   : > { %v3369_v43 = vadd.f32 %v8265_v34, %v3331_v36 }
 0x201   : > { %v3432_v35 = vmax.f32 %v3400_v31, 0.0 }
 0x202   : > { %v3285_v37 = vpop.f32.mrf.mxu2  ;;  %v3401_v46 = vmax.f32 %v3369_v43, 0.0 }
 0x203   : > { %v3189_v38 = vpop.f32.mrf.mxu0  ;;  %v8343_v39 = vpack.c.bf16 %v3432_v35, %v3430_v32  ;;  %v3286_v42 = vadd.f32 %v3285_v37, %v8217_v3 }
 0x204   : > { %v3190_v40 = vadd.f32 %v3189_v38, %v8219_v4 }
 0x205   : > { %v3332_v45 = vmul.f32 %v8268_v41, %v3286_v42 }
 0x206   : > { %v3333_v44 = vmul.f32 %v8257_v29, %v3190_v40 }
 0x207   : > { %v3370_v4 = vadd.f32 %v8275_v49, %v3332_v45 }
 0x208   : > { %v3371_v2 = vadd.f32 %v8265_v34, %v3333_v44 }
 0x209   : > { %v3402_v58 = vmax.f32 %v3370_v4, 0.0 }
 0x20a   : > { %v3403_v50 = vmax.f32 %v3371_v2, 0.0  ;;  %v3287_v51 = vpop.f32.mrf.mxu2 }
 0x20b   : > { %v3288_v52 = vadd.f32 %v3287_v51, %v8223_v7  ;;  %v3192_v53 = vpop.f32.mrf.mxu0 }
 0x20c   : > { %v8352_v54 = vpack.c.bf16 %v3403_v50, %v3401_v46  ;;  %v3193_v55 = vadd.f32 %v3192_v53, %v8225_v9 }
 0x20d   : > { %v3334_v3 = vmul.f32 %v8268_v41, %v3288_v52 }
 0x20e   : > { %3586 = vmatmul.bf16.vlgmr.msrb.gmra.mxu1 %v8352_v54  ;;  %v3335_v60 = vmul.f32 %v8257_v29, %v3193_v55 }
 0x20f   : > { %v3372_v57 = vadd.f32 %v8275_v49, %v3334_v3 }
 0x210   : > { %v3373_v8 = vadd.f32 %v8265_v34, %v3335_v60 }
 0x211   : > { %v3404_v59 = vmax.f32 %v3372_v57, 0.0 }
 0x212   : > { %v3290_v61 = vpop.f32.mrf.mxu2  ;;  %v3405_v16 = vmax.f32 %v3373_v8, 0.0 }
 0x213   : > { %v3194_v63 = vpop.f32.mrf.mxu0  ;;  %v8360_v7 = vpack.c.bf16 %v3404_v59, %v3402_v58  ;;  %v3291_v5 = vadd.f32 %v3290_v61, %v8229_v10 }
 0x214   : > { %v3195_v0 = vadd.f32 %v3194_v63, %v8231_v11 }
 0x215   : > { %3635 = vmatmul.bf16.vlgmr.msrb.gmra.mxu3 %v8360_v7  ;;  %v3336_v13 = vmul.f32 %v8268_v41, %v3291_v5 }
 0x216   : > { %v3337_v9 = vmul.f32 %v8257_v29, %v3195_v0 }
 0x217   : > { %v3374_v11 = vadd.f32 %v8275_v49, %v3336_v13 }
 0x218   : > { %v3375_v12 = vadd.f32 %v8265_v34, %v3337_v9 }
 0x219   : > { %v3406_v30 = vmax.f32 %v3374_v11, 0.0 }
 0x21a   : > { %v3292_v14 = vpop.f32.mrf.mxu2  ;;  %v3407_v18 = vmax.f32 %v3375_v12, 0.0 }
 0x21b   : > { %v3293_v19 = vadd.f32 %v3292_v14, %v8235_v15  ;;  %v3197_v22 = vpop.f32.mrf.mxu0 }
 0x21c   : > { %v8370_v23 = vpack.c.bf16 %v3407_v18, %v3405_v16  ;;  %v3198_v27 = vadd.f32 %v3197_v22, %v8238_v17 }
 0x21d   : > { %v3338_v10 = vmul.f32 %v8268_v41, %v3293_v19 }
 0x21e   : > { %3591 = vmatmul.bf16.gmra.mxu1 %v8370_v23  ;;  %v3339_v32 = vmul.f32 %v8257_v29, %v3198_v27 }
 0x21f   : > { %v3376_v28 = vadd.f32 %v8275_v49, %v3338_v10 }
 0x220   : > { %v3377_v40 = vadd.f32 %v8265_v34, %v3339_v32 }
 0x221   : > { %v3408_v31 = vmax.f32 %v3376_v28, 0.0 }
 0x222   : > { %v3295_v35 = vpop.f32.mrf.mxu2  ;;  %v3409_v2 = vmax.f32 %v3377_v40, 0.0 }
 0x223   : > { %v3199_v36 = vpop.f32.mrf.mxu0  ;;  %v8378_v15 = vpack.c.bf16 %v3408_v31, %v3406_v30  ;;  %v3296_v38 = vadd.f32 %v3295_v35, %v8244_v20 }
 0x224   : > { %v3200_v37 = vadd.f32 %v3199_v36, %v8247_v21 }
 0x225   : > { %3640 = vmatmul.bf16.gmra.mxu3 %v8378_v15  ;;  %v3340_v43 = vmul.f32 %v8268_v41, %v3296_v38 }
 0x226   : > { %v3341_v17 = vmul.f32 %v8257_v29, %v3200_v37 }
 0x227   : > { %v3378_v20 = vadd.f32 %v8275_v49, %v3340_v43 }
 0x228   : > { %v3379_v42 = vadd.f32 %v8265_v34, %v3341_v17 }
 0x229   : > { %v3410_v51 = vmax.f32 %v3378_v20, 0.0 }
 0x22a   : > { %v3297_v44 = vpop.f32.mrf.mxu2  ;;  %v3411_v45 = vmax.f32 %v3379_v42, 0.0 }
 0x22b   : > { %v3298_v46 = vadd.f32 %v3297_v44, %v8255_v24 }
 0x22c   : > { %v8388_v50 = vpack.c.bf16 %v3411_v45, %v3409_v2 }
 0x22d   : > { %v3342_v21 = vmul.f32 %v8268_v41, %v3298_v46 }
 0x22e   : > { %3596 = vmatmul.bf16.gmra.mxu1 %v8388_v50 }
 0x22f   : > { %v3380_v29 = vadd.f32 %v8275_v49, %v3342_v21 }
 0x231   : > { %v3412_v52 = vmax.f32 %v3380_v29, 0.0 }
 0x233   : > { %v8394_v34 = vpack.c.bf16 %v3412_v52, %v3410_v51 }
 0x235   : > { %3645 = vmatmul.bf16.gmra.mxu3 %v8394_v34 }
 0x23e   : > { %3601 = vmatmul.bf16.gmra.mxu1 %v8277_v56 }
 0x245   : > { %3650 = vmatmul.bf16.gmra.mxu3 %v8284_v6 }
 0x24e   : > { %3606 = vmatmul.bf16.gmra.mxu1 %v8292_v33 }
 0x255   : > { %3655 = vmatmul.bf16.gmra.mxu3 %v8299_v47 }
 0x25e   : > { %3611 = vmatmul.bf16.gmra.mxu1 %v8307_v1 }
 0x265   : > { %3660 = vmatmul.bf16.gmra.mxu3 %v8315_v26 }
 0x26e   : > { %3616 = vmatmul.bf16.gmra.mxu1 %v8323_v48 }
 0x275   : > { %3665 = vmatmul.bf16.gmra.mxu3 %v8330_v62 }
 0x27e   : > { %3621 = vmatmul.bf16.gmra.mxu1 %v8336_v25 }
 0x285   : > { %3670 = vmatmul.bf16.gmra.mxu3 %v8343_v39 }
 0x28b   : > { %v3587_v24 = vpop.f32.mrf.mxu1 }
 0x293   : > { %v3589_v41 = vpop.f32.mrf.mxu1 }
 0x298   : > { %v3636_v49 = vpop.f32.mrf.mxu3 }
 0x299   : > { %v8407_v53 = vadd.f32 %v3636_v49, %v3587_v24 }
 0x29b   : > { %v3592_v4 = vpop.f32.mrf.mxu1 }
 0x2a0   : > { %v3638_v3 = vpop.f32.mrf.mxu3 }
 0x2a1   : > { %v8409_v55 = vadd.f32 %v3638_v3, %v3589_v41 }
 0x2a3   : > { %v3594_v57 = vpop.f32.mrf.mxu1 }
 0x2a8   : > { %v3641_v58 = vpop.f32.mrf.mxu3 }
 0x2a9   : > { %v8411_v59 = vadd.f32 %v3641_v58, %v3592_v4 }
 0x2ab   : > { %v3597_v60 = vpop.f32.mrf.mxu1 }
 0x2b0   : > { %v3643_v61 = vpop.f32.mrf.mxu3 }
 0x2b1   : > { %v8413_v63 = vadd.f32 %v3643_v61, %v3594_v57 }
 0x2b3   : > { %v3599_v0 = vpop.f32.mrf.mxu1 }
 0x2b8   : > { %v3646_v5 = vpop.f32.mrf.mxu3 }
 0x2b9   : > { %v8415_v9 = vadd.f32 %v3646_v5, %v3597_v60 }
 0x2bb   : > { %v3602_v8 = vpop.f32.mrf.mxu1 }
 0x2c0   : > { %v3648_v12 = vpop.f32.mrf.mxu3 }
 0x2c1   : > { %v8417_v13 = vadd.f32 %v3648_v12, %v3599_v0 }
 0x2c3   : > { %v3604_v14 = vpop.f32.mrf.mxu1 }
 0x2c8   : > { %v3651_v16 = vpop.f32.mrf.mxu3 }
 0x2c9   : > { %v8419_v18 = vadd.f32 %v3651_v16, %v3602_v8 }
 0x2cb   : > { %v3607_v19 = vpop.f32.mrf.mxu1 }
 0x2d0   : > { %v3653_v22 = vpop.f32.mrf.mxu3 }
 0x2d1   : > { %v8421_v10 = vadd.f32 %v3653_v22, %v3604_v14 }
 0x2d3   : > { %v3609_v11 = vpop.f32.mrf.mxu1 }
 0x2d8   : > { %v3656_v27 = vpop.f32.mrf.mxu3 }
 0x2d9   : > { %v8423_v28 = vadd.f32 %v3656_v27, %v3607_v19 }
 0x2db   : > { %v3612_v30 = vpop.f32.mrf.mxu1 }
 0x2e0   : > { %v3658_v31 = vpop.f32.mrf.mxu3 }
 0x2e1   : > { %v8425_v32 = vadd.f32 %v3658_v31, %v3609_v11 }
 0x2e3   : > { %v3614_v35 = vpop.f32.mrf.mxu1 }
 0x2e8   : > { %v3661_v36 = vpop.f32.mrf.mxu3 }
 0x2e9   : > { %v8427_v37 = vadd.f32 %v3661_v36, %v3612_v30 }
 0x2eb   : > { %v3617_v40 = vpop.f32.mrf.mxu1 }
 0x2f0   : > { %v3663_v38 = vpop.f32.mrf.mxu3 }
 0x2f1   : > { %v8429_v17 = vadd.f32 %v3663_v38, %v3614_v35 }
 0x2f3   : > { %v3619_v44 = vpop.f32.mrf.mxu1 }
 0x2f8   : > { %v3666_v42 = vpop.f32.mrf.mxu3 }
 0x2f9   : > { %v8431_v43 = vadd.f32 %v3666_v42, %v3617_v40 }
 0x2fb   : > { %v3622_v46 = vpop.f32.mrf.mxu1 }
 0x300   : > { %v3668_v2 = vpop.f32.mrf.mxu3 }
 0x301   : > { %v8433_v45 = vadd.f32 %v3668_v2, %v3619_v44 }
 0x303   : > { %v3624_v29 = vpop.f32.mrf.mxu1 }
 0x308   : > { %v3671_v21 = vpop.f32.mrf.mxu3 }
 0x309   : > { %v8435_v20 = vadd.f32 %v3671_v21, %v3622_v46 }
 0x30d   : > { %3679 = sbr.rel (%p6493_p5) target bundleno = 802 (0x322), region = 142 }
 0x310   : > { %v3673_v51 = vpop.f32.mrf.mxu3 }
 0x311   : > { %v8437_v52 = vadd.f32 %v3673_v51, %v3624_v29 }
 0x312   : > { %3681 = vst [vmem:[#allocation2 + $0x11] sm:$0xff] %v8407_v53 }
 0x313   : > { %3682 = vst [vmem:[#allocation2 + $0x21] sm:$0xff] %v8409_v55 }
 0x314   : > { %3683 = vst [vmem:[#allocation2 + $0x31] sm:$0xff] %v8411_v59 }
 0x315   : > { %3684 = vst [vmem:[#allocation2 + $0x41] sm:$0xff] %v8413_v63 }
 0x316   : > { %3685 = vst [vmem:[#allocation2 + $0x51] sm:$0xff] %v8415_v9 }
 0x317   : > { %3686 = vst [vmem:[#allocation2 + $0x61] sm:$0xff] %v8417_v13 }
 0x318   : > { %3687 = vst [vmem:[#allocation2 + $0x71] sm:$0xff] %v8419_v18 }
 0x319   : > { %3688 = vst [vmem:[#allocation2 + $0x81] sm:$0xff] %v8421_v10 }
 0x31a   : > { %3689 = vst [vmem:[#allocation2 + $0xb1] sm:$0xff] %v8423_v28 }
 0x31b   : > { %3690 = vst [vmem:[#allocation2 + $0xc1] sm:$0xff] %v8425_v32 }
 0x31c   : > { %3691 = vst [vmem:[#allocation2 + $0xd1] sm:$0xff] %v8427_v37 }
 0x31d   : > { %3692 = vst [vmem:[#allocation2 + $0xe1] sm:$0xff] %v8429_v17 }
 0x31e   : > { %3693 = vst [vmem:[#allocation2 + $0xf1] sm:$0xff] %v8431_v43 }
 0x31f   : > { %3694 = vst [vmem:[#allocation2 + $0x101] sm:$0xff] %v8433_v45 }
 0x320   : > { %3695 = vst [vmem:[#allocation2 + $0x111] sm:$0xff] %v8435_v20 }
 0x321   : > { %3696 = vst [vmem:[#allocation2 + $0x121] sm:$0xff] %v8437_v52 }
 0x322 PF: > { %p6494_p6 = scmp.eq.s32.totalorder %s7609_s29, 0 }
 0x324   : > { %3700 = sbr.rel (%p6494_p6) target bundleno = 828 (0x33c), region = 146 }
 0x329   : > { %v3702_v24 = vld [vmem:[#allocation2 + $0x11] sm:$0xff]  ;;  %v3703_v41 = vld [vmem:[#allocation2 + $0x21] sm:$0xff] }
 0x32a   : > { %v3704_v49 = vld [vmem:[#allocation2 + $0x31] sm:$0xff]  ;;  %v3718_v4 = vadd.f32 %v3702_v24, %v8407_v53  ;;  %v3719_v3 = vadd.f32 %v3703_v41, %v8409_v55  ;;  %v3705_v58 = vld [vmem:[#allocation2 + $0x41] sm:$0xff] }
 0x32b   : > { %v3720_v57 = vadd.f32 %v3704_v49, %v8411_v59  ;;  %v3706_v60 = vld [vmem:[#allocation2 + $0x51] sm:$0xff]  ;;  %v3707_v61 = vld [vmem:[#allocation2 + $0x61] sm:$0xff]  ;;  %v3721_v0 = vadd.f32 %v3705_v58, %v8413_v63 }
 0x32c   : > { %v3708_v5 = vld [vmem:[#allocation2 + $0x71] sm:$0xff]  ;;  %3734 = vst [vmem:[#allocation2 + $0x11] sm:$0xff] %v3718_v4  ;;  %v3722_v8 = vadd.f32 %v3706_v60, %v8415_v9  ;;  %v3709_v12 = vld [vmem:[#allocation2 + $0x81] sm:$0xff]  ;;  %v3723_v14 = vadd.f32 %v3707_v61, %v8417_v13 }
 0x32d   : > { %3735 = vst [vmem:[#allocation2 + $0x21] sm:$0xff] %v3719_v3  ;;  %v3710_v16 = vld [vmem:[#allocation2 + $0xb1] sm:$0xff]  ;;  %v3724_v53 = vadd.f32 %v3708_v5, %v8419_v18  ;;  %v3711_v55 = vld [vmem:[#allocation2 + $0xc1] sm:$0xff]  ;;  %v3725_v59 = vadd.f32 %v3709_v12, %v8421_v10 }
 0x32e   : > { %3736 = vst [vmem:[#allocation2 + $0x31] sm:$0xff] %v3720_v57  ;;  %v3712_v19 = vld [vmem:[#allocation2 + $0xd1] sm:$0xff]  ;;  %v3726_v63 = vadd.f32 %v3710_v16, %v8423_v28  ;;  %v3713_v22 = vld [vmem:[#allocation2 + $0xe1] sm:$0xff]  ;;  %v3727_v9 = vadd.f32 %v3711_v55, %v8425_v32 }
 0x32f   : > { %3737 = vst [vmem:[#allocation2 + $0x41] sm:$0xff] %v3721_v0  ;;  %v3714_v11 = vld [vmem:[#allocation2 + $0xf1] sm:$0xff]  ;;  %v3728_v13 = vadd.f32 %v3712_v19, %v8427_v37  ;;  %v3715_v27 = vld [vmem:[#allocation2 + $0x101] sm:$0xff]  ;;  %v3729_v18 = vadd.f32 %v3713_v22, %v8429_v17 }
 0x330   : > { %3738 = vst [vmem:[#allocation2 + $0x51] sm:$0xff] %v3722_v8  ;;  %v3716_v30 = vld [vmem:[#allocation2 + $0x111] sm:$0xff]  ;;  %v3730_v10 = vadd.f32 %v3714_v11, %v8431_v43  ;;  %v3717_v31 = vld [vmem:[#allocation2 + $0x121] sm:$0xff]  ;;  %v3731_v28 = vadd.f32 %v3715_v27, %v8433_v45 }
 0x331   : > { %3739 = vst [vmem:[#allocation2 + $0x61] sm:$0xff] %v3723_v14  ;;  %v3732_v35 = vadd.f32 %v3716_v30, %v8435_v20  ;;  %v3733_v32 = vadd.f32 %v3717_v31, %v8437_v52 }
 0x332   : > { %3740 = vst [vmem:[#allocation2 + $0x71] sm:$0xff] %v3724_v53 }
 0x333   : > { %3741 = vst [vmem:[#allocation2 + $0x81] sm:$0xff] %v3725_v59 }
 0x334   : > { %3742 = vst [vmem:[#allocation2 + $0xb1] sm:$0xff] %v3726_v63 }
 0x335   : > { %3743 = vst [vmem:[#allocation2 + $0xc1] sm:$0xff] %v3727_v9 }
 0x336   : > { %3744 = vst [vmem:[#allocation2 + $0xd1] sm:$0xff] %v3728_v13 }
 0x337   : > { %3745 = vst [vmem:[#allocation2 + $0xe1] sm:$0xff] %v3729_v18 }
 0x338   : > { %3746 = vst [vmem:[#allocation2 + $0xf1] sm:$0xff] %v3730_v10 }
 0x339   : > { %3747 = vst [vmem:[#allocation2 + $0x101] sm:$0xff] %v3731_v28 }
 0x33a   : > { %3748 = vst [vmem:[#allocation2 + $0x111] sm:$0xff] %v3732_v35 }
 0x33b   : > { %3749 = vst [vmem:[#allocation2 + $0x121] sm:$0xff] %v3733_v32 }
 0x33c PF: > { %v7294_v36 = vld [vmem:[%s8249_s17 + $0x38] sm:$0xff]  ;;  %v7293_v17 = vld [vmem:[%s8249_s17 + $0x30] sm:$0xff]  ;;  %v7292_v2 = vld [vmem:[%s8249_s17 + $0x28] sm:$0xff]  ;;  %p7231_p8 = scmp.ne.s32.totalorder %s7609_s29, 1 }
 0x33d   : > { %v7302_v37 = vld [vmem:[%s8249_s17 + $0x78] sm:$0xff]  ;;  %3895 = vmatpush.bf16.msra.mxu0 %v7294_v36  ;;  %v7301_v40 = vld [vmem:[%s8249_s17 + $0x70] sm:$0xff]  ;;  %v7300_v45 = vld [vmem:[%s8249_s17 + $0x68] sm:$0xff] }
 0x33e   : > { %v7318_v38 = vld [vmem:[%s8249_s17 + $0xf8] sm:$0xff]  ;;  %3944 = vmatpush.bf16.msra.mxu2 %v7302_v37  ;;  %v7317_v43 = vld [vmem:[%s8249_s17 + $0xf0] sm:$0xff]  ;;  %v7316_v46 = vld [vmem:[%s8249_s17 + $0xe8] sm:$0xff] }
 0x33f   : > { %v7310_v42 = vld [vmem:[%s8249_s17 + $0xb8] sm:$0xff]  ;;  %4219 = vmatpush.bf16.msra.mxu3 %v7318_v38  ;;  %v7309_v44 = vld [vmem:[%s8249_s17 + $0xb0] sm:$0xff]  ;;  %v7308_v21 = vld [vmem:[%s8249_s17 + $0xa8] sm:$0xff] }
 0x340   : > { %4170 = vmatpush.bf16.msra.mxu1 %v7310_v42  ;;  %v7291_v20 = vld [vmem:[%s8249_s17 + $0x20] sm:$0xff]  ;;  %v7290_v24 = vld [vmem:[%s8249_s17 + $0x18] sm:$0xff]  ;;  %v7289_v3 = vld [vmem:[%s8249_s17 + $0x10] sm:$0xff] }
 0x341   : > { %3896 = vmatpush.bf16.msra.mxu0 %v7293_v17  ;;  %v7299_v29 = vld [vmem:[%s8249_s17 + $0x60] sm:$0xff]  ;;  %v7298_v41 = vld [vmem:[%s8249_s17 + $0x58] sm:$0xff]  ;;  %v7297_v57 = vld [vmem:[%s8249_s17 + $0x50] sm:$0xff] }
 0x342   : > { %3945 = vmatpush.bf16.msra.mxu2 %v7301_v40  ;;  %v7315_v51 = vld [vmem:[%s8249_s17 + $0xe0] sm:$0xff]  ;;  %v7314_v49 = vld [vmem:[%s8249_s17 + $0xd8] sm:$0xff]  ;;  %v7313_v58 = vld [vmem:[%s8249_s17 + $0xd0] sm:$0xff] }
 0x343   : > { %4220 = vmatpush.bf16.msra.mxu3 %v7317_v43  ;;  %v7307_v52 = vld [vmem:[%s8249_s17 + $0xa0] sm:$0xff]  ;;  %v7306_v4 = vld [vmem:[%s8249_s17 + $0x98] sm:$0xff]  ;;  %v7305_v60 = vld [vmem:[%s8249_s17 + $0x90] sm:$0xff] }
 0x344   : > { %4171 = vmatpush.bf16.msra.mxu1 %v7309_v44  ;;  %v7288_v61 = vld [vmem:[%s8249_s17 + $0x8] sm:$0xff]  ;;  %v7287_v12 = vld [vmem:[%s8249_s17] sm:$0xff]  ;;  %v7334_v53 = vld [vmem:[%s8249_s17 + $0x178] sm:$0xff] }
 0x345   : > { %3897 = vmatpush.bf16.msra.mxu0 %v7292_v2  ;;  %v7296_v0 = vld [vmem:[%s8249_s17 + $0x48] sm:$0xff]  ;;  %v7295_v14 = vld [vmem:[%s8249_s17 + $0x40] sm:$0xff]  ;;  %v7326_v59 = vld [vmem:[%s8249_s17 + $0x138] sm:$0xff] }
 0x346   : > { %3946 = vmatpush.bf16.msra.mxu2 %v7300_v45  ;;  %v7312_v5 = vld [vmem:[%s8249_s17 + $0xc8] sm:$0xff]  ;;  %v7311_v16 = vld [vmem:[%s8249_s17 + $0xc0] sm:$0xff]  ;;  %v7342_v19 = vld [vmem:[%s8249_s17 + $0x1b8] sm:$0xff] }
 0x347   : > { %4221 = vmatpush.bf16.msra.mxu3 %v7316_v46  ;;  %v7304_v8 = vld [vmem:[%s8249_s17 + $0x88] sm:$0xff]  ;;  %v7303_v55 = vld [vmem:[%s8249_s17 + $0x80] sm:$0xff]  ;;  %v7350_v63 = vld [vmem:[%s8249_s17 + $0x1f8] sm:$0xff] }
 0x348   : > { %4172 = vmatpush.bf16.msra.mxu1 %v7308_v21  ;;  %v7333_v22 = vld [vmem:[%s8249_s17 + $0x170] sm:$0xff]  ;;  %v7332_v27 = vld [vmem:[%s8249_s17 + $0x168] sm:$0xff]  ;;  %v7331_v10 = vld [vmem:[%s8249_s17 + $0x160] sm:$0xff] }
 0x349   : > { %3898 = vmatpush.bf16.msra.mxu0 %v7291_v20  ;;  %v7325_v9 = vld [vmem:[%s8249_s17 + $0x130] sm:$0xff]  ;;  %v7324_v18 = vld [vmem:[%s8249_s17 + $0x128] sm:$0xff]  ;;  %v7323_v28 = vld [vmem:[%s8249_s17 + $0x120] sm:$0xff] }
 0x34a   : > { %3947 = vmatpush.bf16.msra.mxu2 %v7299_v29  ;;  %v7341_v11 = vld [vmem:[%s8249_s17 + $0x1b0] sm:$0xff]  ;;  %v7348_v30 = vld [vmem:[%s8249_s17 + $0x1e8] sm:$0xff]  ;;  %v7347_v35 = vld [vmem:[%s8249_s17 + $0x1e0] sm:$0xff] }
 0x34b   : > { %4222 = vmatpush.bf16.msra.mxu3 %v7315_v51  ;;  %v7349_v13 = vld [vmem:[%s8249_s17 + $0x1f0] sm:$0xff]  ;;  %v7340_v31 = vld [vmem:[%s8249_s17 + $0x1a8] sm:$0xff]  ;;  %v7330_v32 = vld [vmem:[%s8249_s17 + $0x158] sm:$0xff] }
 0x34c   : > { %4173 = vmatpush.bf16.msra.mxu1 %v7307_v52  ;;  %v7339_v36 = vld [vmem:[%s8249_s17 + $0x1a0] sm:$0xff]  ;;  %v7322_v37 = vld [vmem:[%s8249_s17 + $0x118] sm:$0xff]  ;;  %v7329_v17 = vld [vmem:[%s8249_s17 + $0x150] sm:$0xff] }
 0x34d   : > { %3899 = vmatpush.bf16.msra.mxu0 %v7290_v24  ;;  %v7346_v38 = vld [vmem:[%s8249_s17 + $0x1d8] sm:$0xff]  ;;  %v7321_v42 = vld [vmem:[%s8249_s17 + $0x110] sm:$0xff]  ;;  %v7328_v44 = vld [vmem:[%s8249_s17 + $0x148] sm:$0xff] }
 0x34e   : > { %3948 = vmatpush.bf16.msra.mxu2 %v7298_v41  ;;  %v7338_v40 = vld [vmem:[%s8249_s17 + $0x198] sm:$0xff]  ;;  %v7345_v43 = vld [vmem:[%s8249_s17 + $0x1d0] sm:$0xff]  ;;  %v7320_v45 = vld [vmem:[%s8249_s17 + $0x108] sm:$0xff] }
 0x34f   : > { %4223 = vmatpush.bf16.msra.mxu3 %v7314_v49  ;;  %v7337_v2 = vld [vmem:[%s8249_s17 + $0x190] sm:$0xff]  ;;  %v7344_v46 = vld [vmem:[%s8249_s17 + $0x1c8] sm:$0xff]  ;;  %v7327_v21 = vld [vmem:[%s8249_s17 + $0x140] sm:$0xff] }
 0x350   : > { %4174 = vmatpush.bf16.msra.mxu1 %v7306_v4  ;;  %v7336_v20 = vld [vmem:[%s8249_s17 + $0x188] sm:$0xff]  ;;  %v7319_v29 = vld [vmem:[%s8249_s17 + $0x100] sm:$0xff]  ;;  %v7366_v24 = vld [vmem:[%s8249_s17 + $0x2f8] sm:$0xff] }
 0x351   : > { %3900 = vmatpush.bf16.msra.mxu0 %v7289_v3  ;;  %v7343_v51 = vld [vmem:[%s8249_s17 + $0x1c0] sm:$0xff]  ;;  %v7358_v41 = vld [vmem:[%s8249_s17 + $0x2b8] sm:$0xff]  ;;  %v7365_v4 = vld [vmem:[%s8249_s17 + $0x2f0] sm:$0xff] }
 0x352   : > { %3949 = vmatpush.bf16.msra.mxu2 %v7297_v57  ;;  %v7335_v52 = vld [vmem:[%s8249_s17 + $0x180] sm:$0xff]  ;;  %v7382_v49 = vld [vmem:[%s8249_s17 + $0x378] sm:$0xff] }
 0x353   : > { %4224 = vmatpush.bf16.msra.mxu3 %v7313_v58  ;;  %v7374_v3 = vld [vmem:[%s8249_s17 + $0x338] sm:$0xff] }
 0x354   : > { %4175 = vmatpush.bf16.msra.mxu1 %v7305_v60  ;;  %v7357_v60 = vld [vmem:[%s8249_s17 + $0x2b0] sm:$0xff] }
 0x355   : > { %3901 = vmatpush.bf16.msra.mxu0 %v7288_v61  ;;  %v7381_v61 = vld [vmem:[%s8249_s17 + $0x370] sm:$0xff] }
 0x356   : > { %3950 = vmatpush.bf16.msra.mxu2 %v7296_v0  ;;  %v3751_v0 = vld [vmem:[#allocation2 + $0x22] sm:$0xff] }
 0x357   : > { %4225 = vmatpush.bf16.msra.mxu3 %v7312_v5 }
 0x358   : > { %4176 = vmatpush.bf16.msra.mxu1 %v7304_v8 }
 0x359   : > { %3902 = vmatpush.bf16.msra.mxu0 %v7287_v12 }
 0x35a   : > { %3951 = vmatpush.bf16.msra.mxu2 %v7295_v14 }
 0x35b   : > { %4226 = vmatpush.bf16.msra.mxu3 %v7311_v16 }
 0x35c   : > { %4177 = vmatpush.bf16.msra.mxu1 %v7303_v55  ;;  %3903 = vmatmul.bf16.vlgmr.msra.gmra.mxu0 %v8352_v54  ;;  %v7364_v55 = vld [vmem:[%s8249_s17 + $0x2e8] sm:$0xff] }
 0x35d   : > { %4445 = vmatpush.bf16.msrb.mxu0 %v7326_v59  ;;  %3952 = vmatmul.bf16.vlgmr.msra.gmra.mxu2 %v8360_v7  ;;  %v7373_v59 = vld [vmem:[%s8249_s17 + $0x330] sm:$0xff] }
 0x35e   : > { %4494 = vmatpush.bf16.msrb.mxu2 %v7334_v53  ;;  %4227 = vmatmul.bf16.vlgmr.msra.gmra.mxu3 %v8360_v7 }
 0x35f   : > { %4178 = vmatmul.bf16.vlgmr.msra.gmra.mxu1 %v8352_v54  ;;  %4770 = vmatpush.bf16.msrb.mxu3 %v7350_v63 }
 0x360   : > { %4721 = vmatpush.bf16.msrb.mxu1 %v7342_v19  ;;  %v3752_v19 = vld [vmem:[#allocation2 + $0x32] sm:$0xff] }
 0x361   : > { %4446 = vmatpush.bf16.msrb.mxu0 %v7325_v9 }
 0x362   : > { %4495 = vmatpush.bf16.msrb.mxu2 %v7333_v22 }
 0x363   : > { %4771 = vmatpush.bf16.msrb.mxu3 %v7349_v13 }
 0x364   : > { %4722 = vmatpush.bf16.msrb.mxu1 %v7341_v11 }
 0x365   : > { %4447 = vmatpush.bf16.msrb.mxu0 %v7324_v18 }
 0x366   : > { %4496 = vmatpush.bf16.msrb.mxu2 %v7332_v27 }
 0x367   : > { %4772 = vmatpush.bf16.msrb.mxu3 %v7348_v30 }
 0x368   : > { %4723 = vmatpush.bf16.msrb.mxu1 %v7340_v31  ;;  %v7356_v31 = vld [vmem:[%s8249_s17 + $0x2a8] sm:$0xff] }
 0x369   : > { %4448 = vmatpush.bf16.msrb.mxu0 %v7323_v28  ;;  %v7380_v28 = vld [vmem:[%s8249_s17 + $0x368] sm:$0xff] }
 0x36a   : > { %4497 = vmatpush.bf16.msrb.mxu2 %v7331_v10 }
 0x36b   : > { %4773 = vmatpush.bf16.msrb.mxu3 %v7347_v35  ;;  %v3753_v35 = vld [vmem:[#allocation2 + $0x42] sm:$0xff] }
 0x36c   : > { %3908 = vmatmul.bf16.gmra.mxu0 %v8370_v23  ;;  %4724 = vmatpush.bf16.msrb.mxu1 %v7339_v36 }
 0x36d   : > { %3957 = vmatmul.bf16.gmra.mxu2 %v8378_v15  ;;  %4449 = vmatpush.bf16.msrb.mxu0 %v7322_v37 }
 0x36e   : > { %4232 = vmatmul.bf16.gmra.mxu3 %v8378_v15  ;;  %4498 = vmatpush.bf16.msrb.mxu2 %v7330_v32 }
 0x36f   : > { %4183 = vmatmul.bf16.gmra.mxu1 %v8370_v23  ;;  %4774 = vmatpush.bf16.msrb.mxu3 %v7346_v38 }
 0x370   : > { %4725 = vmatpush.bf16.msrb.mxu1 %v7338_v40 }
 0x371   : > { %4450 = vmatpush.bf16.msrb.mxu0 %v7321_v42 }
 0x372   : > { %4499 = vmatpush.bf16.msrb.mxu2 %v7329_v17 }
 0x373   : > { %4775 = vmatpush.bf16.msrb.mxu3 %v7345_v43 }
 0x374   : > { %4726 = vmatpush.bf16.msrb.mxu1 %v7337_v2  ;;  %v7363_v2 = vld [vmem:[%s8249_s17 + $0x2e0] sm:$0xff] }
 0x375   : > { %4451 = vmatpush.bf16.msrb.mxu0 %v7320_v45  ;;  %v7372_v45 = vld [vmem:[%s8249_s17 + $0x328] sm:$0xff] }
 0x376   : > { %4500 = vmatpush.bf16.msrb.mxu2 %v7328_v44 }
 0x377   : > { %4776 = vmatpush.bf16.msrb.mxu3 %v7344_v46  ;;  %v3754_v46 = vld [vmem:[#allocation2 + $0x52] sm:$0xff] }
 0x378   : > { %4727 = vmatpush.bf16.msrb.mxu1 %v7336_v20 }
 0x379   : > { %4452 = vmatpush.bf16.msrb.mxu0 %v7319_v29 }
 0x37a   : > { %4501 = vmatpush.bf16.msrb.mxu2 %v7327_v21 }
 0x37b   : > { %4777 = vmatpush.bf16.msrb.mxu3 %v7343_v51 }
 0x37c   : > { %3913 = vmatmul.bf16.gmra.mxu0 %v8388_v50  ;;  %4728 = vmatpush.bf16.msrb.mxu1 %v7335_v52 }
 0x37d   : > { %3962 = vmatmul.bf16.gmra.mxu2 %v8394_v34  ;;  %4996 = vmatpush.bf16.msra.mxu0 %v7358_v41 }
 0x37e   : > { %4237 = vmatmul.bf16.gmra.mxu3 %v8394_v34  ;;  %5045 = vmatpush.bf16.msra.mxu2 %v7366_v24 }
 0x37f   : > { %4188 = vmatmul.bf16.gmra.mxu1 %v8388_v50  ;;  %5320 = vmatpush.bf16.msra.mxu3 %v7382_v49 }
 0x380   : > { %5271 = vmatpush.bf16.msra.mxu1 %v7374_v3  ;;  %v7355_v3 = vld [vmem:[%s8249_s17 + $0x2a0] sm:$0xff] }
 0x381   : > { %4997 = vmatpush.bf16.msra.mxu0 %v7357_v60 }
 0x382   : > { %5046 = vmatpush.bf16.msra.mxu2 %v7365_v4 }
 0x383   : > { %5321 = vmatpush.bf16.msra.mxu3 %v7381_v61 }
 0x384   : > { %5272 = vmatpush.bf16.msra.mxu1 %v7373_v59  ;;  %v7371_v59 = vld [vmem:[%s8249_s17 + $0x320] sm:$0xff] }
 0x385   : > { %4998 = vmatpush.bf16.msra.mxu0 %v7356_v31  ;;  %v7354_v31 = vld [vmem:[%s8249_s17 + $0x298] sm:$0xff] }
 0x386   : > { %5047 = vmatpush.bf16.msra.mxu2 %v7364_v55  ;;  %v7362_v55 = vld [vmem:[%s8249_s17 + $0x2d8] sm:$0xff] }
 0x387   : > { %5322 = vmatpush.bf16.msra.mxu3 %v7380_v28  ;;  %v7378_v28 = vld [vmem:[%s8249_s17 + $0x358] sm:$0xff] }
 0x388   : > { %5273 = vmatpush.bf16.msra.mxu1 %v7372_v45  ;;  %v7370_v45 = vld [vmem:[%s8249_s17 + $0x318] sm:$0xff] }
 0x389   : > { %4999 = vmatpush.bf16.msra.mxu0 %v7355_v3  ;;  %v7353_v3 = vld [vmem:[%s8249_s17 + $0x290] sm:$0xff] }
 0x38a   : > { %5048 = vmatpush.bf16.msra.mxu2 %v7363_v2  ;;  %v7361_v2 = vld [vmem:[%s8249_s17 + $0x2d0] sm:$0xff] }
 0x38c   : > { %3918 = vmatmul.bf16.gmra.mxu0 %v8277_v56  ;;  %5274 = vmatpush.bf16.msra.mxu1 %v7371_v59  ;;  %v7369_v59 = vld [vmem:[%s8249_s17 + $0x310] sm:$0xff] }
 0x38d   : > { %3967 = vmatmul.bf16.gmra.mxu2 %v8284_v6  ;;  %5000 = vmatpush.bf16.msra.mxu0 %v7354_v31  ;;  %v7352_v31 = vld [vmem:[%s8249_s17 + $0x288] sm:$0xff] }
 0x38e   : > { %4242 = vmatmul.bf16.gmra.mxu3 %v8284_v6  ;;  %5049 = vmatpush.bf16.msra.mxu2 %v7362_v55  ;;  %v7360_v55 = vld [vmem:[%s8249_s17 + $0x2c8] sm:$0xff] }
 0x38f   : > { %4193 = vmatmul.bf16.gmra.mxu1 %v8277_v56 }
 0x390   : > { %5275 = vmatpush.bf16.msra.mxu1 %v7370_v45  ;;  %v7368_v45 = vld [vmem:[%s8249_s17 + $0x308] sm:$0xff] }
 0x391   : > { %5001 = vmatpush.bf16.msra.mxu0 %v7353_v3 }
 0x392   : > { %5050 = vmatpush.bf16.msra.mxu2 %v7361_v2  ;;  %v7359_v2 = vld [vmem:[%s8249_s17 + $0x2c0] sm:$0xff] }
 0x394   : > { %5276 = vmatpush.bf16.msra.mxu1 %v7369_v59  ;;  %v7398_v59 = vld [vmem:[%s8249_s17 + $0x3f8] sm:$0xff] }
 0x395   : > { %5002 = vmatpush.bf16.msra.mxu0 %v7352_v31 }
 0x396   : > { %5051 = vmatpush.bf16.msra.mxu2 %v7360_v55 }
 0x398   : > { %5277 = vmatpush.bf16.msra.mxu1 %v7368_v45 }
 0x39a   : > { %5052 = vmatpush.bf16.msra.mxu2 %v7359_v2 }
 0x39c   : > { %3923 = vmatmul.bf16.gmra.mxu0 %v8292_v33 }
 0x39d   : > { %3972 = vmatmul.bf16.gmra.mxu2 %v8299_v47 }
 0x39e   : > { %4247 = vmatmul.bf16.gmra.mxu3 %v8299_v47 }
 0x39f   : > { %4198 = vmatmul.bf16.gmra.mxu1 %v8292_v33 }
 0x3ac   : > { %3928 = vmatmul.bf16.gmra.mxu0 %v8307_v1 }
 0x3ad   : > { %3977 = vmatmul.bf16.gmra.mxu2 %v8315_v26 }
 0x3ae   : > { %4252 = vmatmul.bf16.gmra.mxu3 %v8315_v26 }
 0x3af   : > { %4203 = vmatmul.bf16.gmra.mxu1 %v8307_v1 }
 0x3bc   : > { %3933 = vmatmul.bf16.gmra.mxu0 %v8323_v48 }
 0x3bd   : > { %3982 = vmatmul.bf16.gmra.mxu2 %v8330_v62 }
 0x3be   : > { %4257 = vmatmul.bf16.gmra.mxu3 %v8330_v62 }
 0x3bf   : > { %4208 = vmatmul.bf16.gmra.mxu1 %v8323_v48 }
 0x3cc   : > { %3938 = vmatmul.bf16.gmra.mxu0 %v8336_v25 }
 0x3cd   : > { %3987 = vmatmul.bf16.gmra.mxu2 %v8343_v39 }
 0x3ce   : > { %4262 = vmatmul.bf16.gmra.mxu3 %v8343_v39 }
 0x3cf   : > { %4213 = vmatmul.bf16.gmra.mxu1 %v8336_v25 }
 0x3d9   : > { %v3904_v57 = vpop.f32.mrf.mxu0 }
 0x3dc   : > { %v4179_v58 = vpop.f32.mrf.mxu1  ;;  %4453 = vmatmul.bf16.vlgmr.msrb.gmra.mxu0 %v8352_v54 }
 0x3dd   : > { %4502 = vmatmul.bf16.vlgmr.msrb.gmra.mxu2 %v8360_v7 }
 0x3de   : > { %4778 = vmatmul.bf16.vlgmr.msrb.gmra.mxu3 %v8360_v7  ;;  %5595 = vmatpush.bf16.msrb.mxu2 %v7398_v59 }
 0x3df   : > { %4729 = vmatmul.bf16.vlgmr.msrb.gmra.mxu1 %v8352_v54 }
 0x3e0   : > { %v3953_v5 = vpop.f32.mrf.mxu2 }
 0x3e1   : > { %v3954_v8 = vadd.f32 %v3953_v5, %v3904_v57  ;;  %v4228_v12 = vpop.f32.mrf.mxu3  ;;  %v3906_v14 = vpop.f32.mrf.mxu0  ;;  %v7379_v57 = vld [vmem:[%s8249_s17 + $0x360] sm:$0xff] }
 0x3e2   : > { %v4229_v22 = vadd.f32 %v4228_v12, %v4179_v58  ;;  %v3755_v58 = vld [vmem:[#allocation2 + $0x62] sm:$0xff]  ;;  %5323 = vmatpush.bf16.msra.mxu3 %v7379_v57  ;;  %v7377_v57 = vld [vmem:[%s8249_s17 + $0x350] sm:$0xff] }
 0x3e3   : > { %v3993_v16 = vadd.f32 %v3954_v8, %v3751_v0 }
 0x3e4   : > { %v4181_v53 = vpop.f32.mrf.mxu1 }
 0x3e5   : > { %4009 = vst [vmem:[#allocation2 + $0x22] sm:$0xff] %v3993_v16 }
 0x3e6   : > { %5324 = vmatpush.bf16.msra.mxu3 %v7378_v28  ;;  %v7376_v28 = vld [vmem:[%s8249_s17 + $0x348] sm:$0xff] }
 0x3e8   : > { %v3955_v63 = vpop.f32.mrf.mxu2 }
 0x3e9   : > { %v3956_v9 = vadd.f32 %v3955_v63, %v3906_v14  ;;  %v4230_v11 = vpop.f32.mrf.mxu3  ;;  %v3909_v13 = vpop.f32.mrf.mxu0 }
 0x3ea   : > { %v4231_v17 = vadd.f32 %v4230_v11, %v4181_v53  ;;  %5325 = vmatpush.bf16.msra.mxu3 %v7377_v57 }
 0x3eb   : > { %v3994_v27 = vadd.f32 %v3956_v9, %v3752_v19  ;;  %v3756_v19 = vld [vmem:[#allocation2 + $0x72] sm:$0xff] }
 0x3ec   : > { %v4025_v18 = vld [vmem:[#allocation2 + $0x21] sm:$0xff]  ;;  %v4184_v30 = vpop.f32.mrf.mxu1  ;;  %4458 = vmatmul.bf16.gmra.mxu0 %v8370_v23 }
 0x3ed   : > { %v4268_v10 = vadd.f32 %v4229_v22, %v4025_v18  ;;  %4010 = vst [vmem:[#allocation2 + $0x32] sm:$0xff] %v3994_v27  ;;  %4507 = vmatmul.bf16.gmra.mxu2 %v8378_v15 }
 0x3ee   : > { %4783 = vmatmul.bf16.gmra.mxu3 %v8378_v15 }
 0x3ef   : > { %4284 = vst [vmem:[#allocation2 + $0x21] sm:$0xff] %v4268_v10  ;;  %4734 = vmatmul.bf16.gmra.mxu1 %v8370_v23  ;;  %5326 = vmatpush.bf16.msra.mxu3 %v7376_v28 }
 0x3f0   : > { %v3958_v32 = vpop.f32.mrf.mxu2 }
 0x3f1   : > { %v3959_v36 = vadd.f32 %v3958_v32, %v3909_v13  ;;  %v4233_v37 = vpop.f32.mrf.mxu3  ;;  %v3911_v38 = vpop.f32.mrf.mxu0 }
 0x3f2   : > { %v4234_v20 = vadd.f32 %v4233_v37, %v4184_v30 }
 0x3f3   : > { %v3995_v40 = vadd.f32 %v3959_v36, %v3753_v35  ;;  %v3757_v35 = vld [vmem:[#allocation2 + $0x82] sm:$0xff] }
 0x3f4   : > { %v4026_v42 = vld [vmem:[#allocation2 + $0x31] sm:$0xff]  ;;  %v4186_v43 = vpop.f32.mrf.mxu1 }
 0x3f5   : > { %v4269_v44 = vadd.f32 %v4231_v17, %v4026_v42  ;;  %4011 = vst [vmem:[#allocation2 + $0x42] sm:$0xff] %v3995_v40 }
 0x3f7   : > { %4285 = vst [vmem:[#allocation2 + $0x31] sm:$0xff] %v4269_v44 }
 0x3f8   : > { %v3960_v21 = vpop.f32.mrf.mxu2 }
 0x3f9   : > { %v3961_v29 = vadd.f32 %v3960_v21, %v3911_v38  ;;  %v4235_v51 = vpop.f32.mrf.mxu3  ;;  %v3914_v52 = vpop.f32.mrf.mxu0 }
 0x3fa   : > { %v4236_v8 = vadd.f32 %v4235_v51, %v4186_v43 }
 0x3fb   : > { %v3996_v24 = vadd.f32 %v3961_v29, %v3754_v46  ;;  %v3758_v46 = vld [vmem:[#allocation2 + $0x92] sm:$0xff] }
 0x3fc   : > { %v4027_v41 = vld [vmem:[#allocation2 + $0x41] sm:$0xff]  ;;  %v4189_v49 = vpop.f32.mrf.mxu1  ;;  %4463 = vmatmul.bf16.gmra.mxu0 %v8388_v50 }
 0x3fd   : > { %v4270_v4 = vadd.f32 %v4234_v20, %v4027_v41  ;;  %4012 = vst [vmem:[#allocation2 + $0x52] sm:$0xff] %v3996_v24  ;;  %4512 = vmatmul.bf16.gmra.mxu2 %v8394_v34 }
 0x3fe   : > { %4788 = vmatmul.bf16.gmra.mxu3 %v8394_v34 }
 0x3ff   : > { %4286 = vst [vmem:[#allocation2 + $0x41] sm:$0xff] %v4270_v4  ;;  %4739 = vmatmul.bf16.gmra.mxu1 %v8388_v50 }
 0x400   : > { %v3963_v60 = vpop.f32.mrf.mxu2 }
 0x401   : > { %v3964_v61 = vadd.f32 %v3963_v60, %v3914_v52  ;;  %v4238_v0 = vpop.f32.mrf.mxu3  ;;  %v3916_v5 = vpop.f32.mrf.mxu0 }
 0x402   : > { %v4239_v22 = vadd.f32 %v4238_v0, %v4189_v49 }
 0x403   : > { %v3997_v12 = vadd.f32 %v3964_v61, %v3755_v58  ;;  %v3759_v58 = vld [vmem:[#allocation2 + $0xc2] sm:$0xff] }
 0x404   : > { %v4028_v14 = vld [vmem:[#allocation2 + $0x51] sm:$0xff]  ;;  %v4191_v16 = vpop.f32.mrf.mxu1 }
 0x405   : > { %v4271_v53 = vadd.f32 %v4236_v8, %v4028_v14  ;;  %4013 = vst [vmem:[#allocation2 + $0x62] sm:$0xff] %v3997_v12 }
 0x407   : > { %4287 = vst [vmem:[#allocation2 + $0x51] sm:$0xff] %v4271_v53 }
 0x408   : > { %v3965_v63 = vpop.f32.mrf.mxu2 }
 0x409   : > { %v3966_v9 = vadd.f32 %v3965_v63, %v3916_v5  ;;  %v4240_v11 = vpop.f32.mrf.mxu3  ;;  %v3919_v13 = vpop.f32.mrf.mxu0 }
 0x40a   : > { %v4241_v17 = vadd.f32 %v4240_v11, %v4191_v16 }
 0x40b   : > { %v3998_v27 = vadd.f32 %v3966_v9, %v3756_v19  ;;  %v3760_v19 = vld [vmem:[#allocation2 + $0xd2] sm:$0xff] }
 0x40c   : > { %v4029_v18 = vld [vmem:[#allocation2 + $0x61] sm:$0xff]  ;;  %v4194_v30 = vpop.f32.mrf.mxu1  ;;  %4468 = vmatmul.bf16.gmra.mxu0 %v8277_v56 }
 0x40d   : > { %v4272_v10 = vadd.f32 %v4239_v22, %v4029_v18  ;;  %4014 = vst [vmem:[#allocation2 + $0x72] sm:$0xff] %v3998_v27  ;;  %4517 = vmatmul.bf16.gmra.mxu2 %v8284_v6 }
 0x40e   : > { %4793 = vmatmul.bf16.gmra.mxu3 %v8284_v6 }
 0x40f   : > { %4288 = vst [vmem:[#allocation2 + $0x61] sm:$0xff] %v4272_v10  ;;  %4744 = vmatmul.bf16.gmra.mxu1 %v8277_v56 }
 0x410   : > { %v3968_v32 = vpop.f32.mrf.mxu2 }
 0x411   : > { %v3969_v36 = vadd.f32 %v3968_v32, %v3919_v13  ;;  %v4243_v37 = vpop.f32.mrf.mxu3  ;;  %v3921_v38 = vpop.f32.mrf.mxu0 }
 0x412   : > { %v4244_v20 = vadd.f32 %v4243_v37, %v4194_v30 }
 0x413   : > { %v3999_v40 = vadd.f32 %v3969_v36, %v3757_v35  ;;  %v3761_v35 = vld [vmem:[#allocation2 + $0xe2] sm:$0xff] }
 0x414   : > { %v4030_v42 = vld [vmem:[#allocation2 + $0x71] sm:$0xff]  ;;  %v4196_v43 = vpop.f32.mrf.mxu1 }
 0x415   : > { %v4273_v44 = vadd.f32 %v4241_v17, %v4030_v42  ;;  %4015 = vst [vmem:[#allocation2 + $0x82] sm:$0xff] %v3999_v40 }
 0x417   : > { %4289 = vst [vmem:[#allocation2 + $0x71] sm:$0xff] %v4273_v44 }
 0x418   : > { %v3970_v21 = vpop.f32.mrf.mxu2 }
 0x419   : > { %v3971_v29 = vadd.f32 %v3970_v21, %v3921_v38  ;;  %v4245_v51 = vpop.f32.mrf.mxu3  ;;  %v3924_v52 = vpop.f32.mrf.mxu0 }
 0x41a   : > { %v4246_v8 = vadd.f32 %v4245_v51, %v4196_v43 }
 0x41b   : > { %v4000_v24 = vadd.f32 %v3971_v29, %v3758_v46  ;;  %v3762_v46 = vld [vmem:[#allocation2 + $0xf2] sm:$0xff] }
 0x41c   : > { %v4031_v41 = vld [vmem:[#allocation2 + $0x81] sm:$0xff]  ;;  %v4199_v49 = vpop.f32.mrf.mxu1  ;;  %4473 = vmatmul.bf16.gmra.mxu0 %v8292_v33 }
 0x41d   : > { %v4274_v4 = vadd.f32 %v4244_v20, %v4031_v41  ;;  %4016 = vst [vmem:[#allocation2 + $0x92] sm:$0xff] %v4000_v24  ;;  %4522 = vmatmul.bf16.gmra.mxu2 %v8299_v47  ;;  %v7351_v20 = vld [vmem:[%s8249_s17 + $0x280] sm:$0xff] }
 0x41e   : > { %4798 = vmatmul.bf16.gmra.mxu3 %v8299_v47  ;;  %5003 = vmatpush.bf16.msra.mxu0 %v7351_v20  ;;  %v7375_v41 = vld [vmem:[%s8249_s17 + $0x340] sm:$0xff]  ;;  %v3766_v20 = vld [vmem:[#allocation2 + $0x132] sm:$0xff] }
 0x41f   : > { %4290 = vst [vmem:[#allocation2 + $0x81] sm:$0xff] %v4274_v4  ;;  %4749 = vmatmul.bf16.gmra.mxu1 %v8292_v33  ;;  %5327 = vmatpush.bf16.msra.mxu3 %v7375_v41 }
 0x420   : > { %v3973_v60 = vpop.f32.mrf.mxu2 }
 0x421   : > { %v3974_v61 = vadd.f32 %v3973_v60, %v3924_v52  ;;  %v4248_v0 = vpop.f32.mrf.mxu3  ;;  %v3926_v5 = vpop.f32.mrf.mxu0 }
 0x422   : > { %v4249_v22 = vadd.f32 %v4248_v0, %v4199_v49 }
 0x423   : > { %v4001_v12 = vadd.f32 %v3974_v61, %v3759_v58  ;;  %v3763_v58 = vld [vmem:[#allocation2 + $0x102] sm:$0xff] }
 0x424   : > { %v4032_v14 = vld [vmem:[#allocation2 + $0x91] sm:$0xff]  ;;  %v4201_v16 = vpop.f32.mrf.mxu1  ;;  %v7367_v61 = vld [vmem:[%s8249_s17 + $0x300] sm:$0xff] }
 0x425   : > { %v4275_v53 = vadd.f32 %v4246_v8, %v4032_v14  ;;  %4017 = vst [vmem:[#allocation2 + $0xc2] sm:$0xff] %v4001_v12  ;;  %5278 = vmatpush.bf16.msra.mxu1 %v7367_v61 }
 0x427   : > { %4291 = vst [vmem:[#allocation2 + $0x91] sm:$0xff] %v4275_v53 }
 0x428   : > { %v3975_v63 = vpop.f32.mrf.mxu2 }
 0x429   : > { %v3976_v9 = vadd.f32 %v3975_v63, %v3926_v5  ;;  %v4250_v11 = vpop.f32.mrf.mxu3  ;;  %v3929_v13 = vpop.f32.mrf.mxu0  ;;  %v3764_v63 = vld [vmem:[#allocation2 + $0x112] sm:$0xff] }
 0x42a   : > { %v4251_v17 = vadd.f32 %v4250_v11, %v4201_v16 }
 0x42b   : > { %v4002_v27 = vadd.f32 %v3976_v9, %v3760_v19  ;;  %v7390_v19 = vld [vmem:[%s8249_s17 + $0x3b8] sm:$0xff] }
 0x42c   : > { %v4033_v18 = vld [vmem:[#allocation2 + $0xc1] sm:$0xff]  ;;  %v4204_v30 = vpop.f32.mrf.mxu1  ;;  %4478 = vmatmul.bf16.gmra.mxu0 %v8307_v1  ;;  %v7414_v9 = vld [vmem:[%s8249_s17 + $0x478] sm:$0xff] }
 0x42d   : > { %v4276_v10 = vadd.f32 %v4249_v22, %v4033_v18  ;;  %4018 = vst [vmem:[#allocation2 + $0xd2] sm:$0xff] %v4002_v27  ;;  %4527 = vmatmul.bf16.gmra.mxu2 %v8315_v26  ;;  %5546 = vmatpush.bf16.msrb.mxu0 %v7390_v19 }
 0x42e   : > { %4803 = vmatmul.bf16.gmra.mxu3 %v8315_v26 }
 0x42f   : > { %4292 = vst [vmem:[#allocation2 + $0xc1] sm:$0xff] %v4276_v10  ;;  %4754 = vmatmul.bf16.gmra.mxu1 %v8307_v1  ;;  %5870 = vmatpush.bf16.msrb.mxu3 %v7414_v9  ;;  %v7388_v9 = vld [vmem:[%s8249_s17 + $0x3a8] sm:$0xff] }
 0x430   : > { %v3978_v32 = vpop.f32.mrf.mxu2 }
 0x431   : > { %v3979_v36 = vadd.f32 %v3978_v32, %v3929_v13  ;;  %v4253_v37 = vpop.f32.mrf.mxu3  ;;  %v3931_v38 = vpop.f32.mrf.mxu0  ;;  %v7406_v32 = vld [vmem:[%s8249_s17 + $0x438] sm:$0xff] }
 0x432   : > { %v4254_v29 = vadd.f32 %v4253_v37, %v4204_v30  ;;  %5821 = vmatpush.bf16.msrb.mxu1 %v7406_v32 }
 0x433   : > { %v4003_v40 = vadd.f32 %v3979_v36, %v3761_v35  ;;  %v7397_v35 = vld [vmem:[%s8249_s17 + $0x3f0] sm:$0xff]  ;;  %v3765_v36 = vld [vmem:[#allocation2 + $0x122] sm:$0xff] }
 0x434   : > { %v4034_v42 = vld [vmem:[#allocation2 + $0xd1] sm:$0xff]  ;;  %v4206_v43 = vpop.f32.mrf.mxu1  ;;  %5596 = vmatpush.bf16.msrb.mxu2 %v7397_v35 }
 0x435   : > { %v4277_v44 = vadd.f32 %v4251_v17, %v4034_v42  ;;  %4019 = vst [vmem:[#allocation2 + $0xe2] sm:$0xff] %v4003_v40 }
 0x437   : > { %4293 = vst [vmem:[#allocation2 + $0xd1] sm:$0xff] %v4277_v44 }
 0x438   : > { %v3980_v21 = vpop.f32.mrf.mxu2 }
 0x439   : > { %v3981_v51 = vadd.f32 %v3980_v21, %v3931_v38  ;;  %v4255_v52 = vpop.f32.mrf.mxu3  ;;  %v3934_v24 = vpop.f32.mrf.mxu0  ;;  %v7413_v21 = vld [vmem:[%s8249_s17 + $0x470] sm:$0xff] }
 0x43a   : > { %v4256_v12 = vadd.f32 %v4255_v52, %v4206_v43  ;;  %5871 = vmatpush.bf16.msrb.mxu3 %v7413_v21 }
 0x43b   : > { %v4004_v49 = vadd.f32 %v3981_v51, %v3762_v46  ;;  %v7389_v46 = vld [vmem:[%s8249_s17 + $0x3b0] sm:$0xff] }
 0x43c   : > { %v4035_v4 = vld [vmem:[#allocation2 + $0xe1] sm:$0xff]  ;;  %v4209_v3 = vpop.f32.mrf.mxu1  ;;  %4483 = vmatmul.bf16.gmra.mxu0 %v8323_v48 }
 0x43d   : > { %v4278_v57 = vadd.f32 %v4254_v29, %v4035_v4  ;;  %4020 = vst [vmem:[#allocation2 + $0xf2] sm:$0xff] %v4004_v49  ;;  %4532 = vmatmul.bf16.gmra.mxu2 %v8330_v62  ;;  %5547 = vmatpush.bf16.msrb.mxu0 %v7389_v46 }
 0x43e   : > { %4808 = vmatmul.bf16.gmra.mxu3 %v8330_v62 }
 0x43f   : > { %4294 = vst [vmem:[#allocation2 + $0xe1] sm:$0xff] %v4278_v57  ;;  %4759 = vmatmul.bf16.gmra.mxu1 %v8323_v48 }
 0x440   : > { %v3983_v60 = vpop.f32.mrf.mxu2 }
 0x441   : > { %v3984_v0 = vadd.f32 %v3983_v60, %v3934_v24  ;;  %v4258_v5 = vpop.f32.mrf.mxu3  ;;  %v3936_v8 = vpop.f32.mrf.mxu0  ;;  %v7405_v60 = vld [vmem:[%s8249_s17 + $0x430] sm:$0xff]  ;;  %5548 = vmatpush.bf16.msrb.mxu0 %v7388_v9  ;;  %v7386_v9 = vld [vmem:[%s8249_s17 + $0x398] sm:$0xff] }
 0x442   : > { %v4259_v11 = vadd.f32 %v4258_v5, %v4209_v3  ;;  %v4576_v5 = vld [vmem:[#allocation2 + $0x12] sm:$0xff]  ;;  %5822 = vmatpush.bf16.msrb.mxu1 %v7405_v60 }
 0x443   : > { %v4005_v14 = vadd.f32 %v3984_v0, %v3763_v58  ;;  %v7396_v58 = vld [vmem:[%s8249_s17 + $0x3e8] sm:$0xff] }
 0x444   : > { %v4036_v16 = vld [vmem:[#allocation2 + $0xf1] sm:$0xff]  ;;  %v4211_v53 = vpop.f32.mrf.mxu1  ;;  %5597 = vmatpush.bf16.msrb.mxu2 %v7396_v58 }
 0x445   : > { %v4279_v55 = vadd.f32 %v4256_v12, %v4036_v16  ;;  %4021 = vst [vmem:[#allocation2 + $0x102] sm:$0xff] %v4005_v14  ;;  %v4300_v12 = vld [vmem:[#allocation2 + $0x20] sm:$0xff] }
 0x447   : > { %4295 = vst [vmem:[#allocation2 + $0xf1] sm:$0xff] %v4279_v55 }
 0x448   : > { %v3985_v22 = vpop.f32.mrf.mxu2 }
 0x449   : > { %v3986_v13 = vadd.f32 %v3985_v22, %v3936_v8  ;;  %v4260_v27 = vpop.f32.mrf.mxu3  ;;  %v3939_v18 = vpop.f32.mrf.mxu0 }
 0x44a   : > { %v4261_v42 = vadd.f32 %v4260_v27, %v4211_v53 }
 0x44b   : > { %v4006_v30 = vadd.f32 %v3986_v13, %v3764_v63 }
 0x44c   : > { %v4037_v10 = vld [vmem:[#allocation2 + $0x101] sm:$0xff]  ;;  %v4214_v31 = vpop.f32.mrf.mxu1  ;;  %4488 = vmatmul.bf16.gmra.mxu0 %v8336_v25 }
 0x44d   : > { %v4280_v28 = vadd.f32 %v4259_v11, %v4037_v10  ;;  %4022 = vst [vmem:[#allocation2 + $0x112] sm:$0xff] %v4006_v30  ;;  %4537 = vmatmul.bf16.gmra.mxu2 %v8343_v39  ;;  %v7412_v11 = vld [vmem:[%s8249_s17 + $0x468] sm:$0xff]  ;;  %v4301_v30 = vld [vmem:[#allocation2 + $0x30] sm:$0xff] }
 0x44e   : > { %4813 = vmatmul.bf16.gmra.mxu3 %v8343_v39 }
 0x44f   : > { %4296 = vst [vmem:[#allocation2 + $0x101] sm:$0xff] %v4280_v28  ;;  %4764 = vmatmul.bf16.gmra.mxu1 %v8336_v25  ;;  %5872 = vmatpush.bf16.msrb.mxu3 %v7412_v11  ;;  %v7410_v11 = vld [vmem:[%s8249_s17 + $0x458] sm:$0xff] }
 0x450   : > { %v3988_v37 = vpop.f32.mrf.mxu2 }
 0x451   : > { %v3989_v38 = vadd.f32 %v3988_v37, %v3939_v18  ;;  %v4263_v17 = vpop.f32.mrf.mxu3  ;;  %v3941_v40 = vpop.f32.mrf.mxu0  ;;  %v7395_v37 = vld [vmem:[%s8249_s17 + $0x3e0] sm:$0xff] }
 0x452   : > { %v4264_v51 = vadd.f32 %v4263_v17, %v4214_v31  ;;  %5598 = vmatpush.bf16.msrb.mxu2 %v7395_v37  ;;  %v7393_v37 = vld [vmem:[%s8249_s17 + $0x3d0] sm:$0xff] }
 0x453   : > { %v4007_v43 = vadd.f32 %v3989_v38, %v3765_v36  ;;  %v7404_v38 = vld [vmem:[%s8249_s17 + $0x428] sm:$0xff] }
 0x454   : > { %v4038_v44 = vld [vmem:[#allocation2 + $0x111] sm:$0xff]  ;;  %v4216_v2 = vpop.f32.mrf.mxu1  ;;  %5823 = vmatpush.bf16.msrb.mxu1 %v7404_v38 }
 0x455   : > { %v4281_v45 = vadd.f32 %v4261_v42, %v4038_v44  ;;  %4023 = vst [vmem:[#allocation2 + $0x122] sm:$0xff] %v4007_v43  ;;  %v4302_v43 = vld [vmem:[#allocation2 + $0x40] sm:$0xff]  ;;  %v7402_v38 = vld [vmem:[%s8249_s17 + $0x418] sm:$0xff] }
 0x457   : > { %4297 = vst [vmem:[#allocation2 + $0x111] sm:$0xff] %v4281_v45 }
 0x458   : > { %v3990_v29 = vpop.f32.mrf.mxu2 }
 0x459   : > { %v3991_v52 = vadd.f32 %v3990_v29, %v3941_v40  ;;  %v4265_v24 = vpop.f32.mrf.mxu3  ;;  %v4454_v41 = vpop.f32.mrf.mxu0  ;;  %v7387_v29 = vld [vmem:[%s8249_s17 + $0x3a0] sm:$0xff] }
 0x45a   : > { %v4266_v53 = vadd.f32 %v4265_v24, %v4216_v2  ;;  %5549 = vmatpush.bf16.msrb.mxu0 %v7387_v29  ;;  %v7385_v29 = vld [vmem:[%s8249_s17 + $0x390] sm:$0xff] }
 0x45b   : > { %v4008_v49 = vadd.f32 %v3991_v52, %v3766_v20 }
 0x45c   : > { %v4039_v4 = vld [vmem:[#allocation2 + $0x121] sm:$0xff]  ;;  %v4730_v3 = vpop.f32.mrf.mxu1  ;;  %5004 = vmatmul.bf16.vlgmr.msra.gmra.mxu0 %v8352_v54 }
 0x45d   : > { %v4282_v57 = vadd.f32 %v4264_v51, %v4039_v4  ;;  %4024 = vst [vmem:[#allocation2 + $0x132] sm:$0xff] %v4008_v49  ;;  %5053 = vmatmul.bf16.vlgmr.msra.gmra.mxu2 %v8360_v7  ;;  %v7411_v51 = vld [vmem:[%s8249_s17 + $0x460] sm:$0xff]  ;;  %v4303_v49 = vld [vmem:[#allocation2 + $0x50] sm:$0xff] }
 0x45e   : > { %5328 = vmatmul.bf16.vlgmr.msra.gmra.mxu3 %v8360_v7  ;;  %5550 = vmatpush.bf16.msrb.mxu0 %v7386_v9  ;;  %v7384_v9 = vld [vmem:[%s8249_s17 + $0x388] sm:$0xff] }
 0x45f   : > { %4298 = vst [vmem:[#allocation2 + $0x121] sm:$0xff] %v4282_v57  ;;  %5279 = vmatmul.bf16.vlgmr.msra.gmra.mxu1 %v8352_v54  ;;  %5873 = vmatpush.bf16.msrb.mxu3 %v7411_v51  ;;  %v7409_v51 = vld [vmem:[%s8249_s17 + $0x450] sm:$0xff] }
 0x460   : > { %v4503_v61 = vpop.f32.mrf.mxu2 }
 0x461   : > { %v4504_v0 = vadd.f32 %v4503_v61, %v4454_v41  ;;  %v4779_v8 = vpop.f32.mrf.mxu3  ;;  %v4456_v14 = vpop.f32.mrf.mxu0 }
 0x462   : > { %v4780_v16 = vadd.f32 %v4779_v8, %v4730_v3  ;;  %5551 = vmatpush.bf16.msrb.mxu0 %v7385_v29  ;;  %v7383_v29 = vld [vmem:[%s8249_s17 + $0x380] sm:$0xff] }
 0x463   : > { %v4543_v55 = vadd.f32 %v4504_v0, %v4300_v12  ;;  %v7394_v0 = vld [vmem:[%s8249_s17 + $0x3d8] sm:$0xff]  ;;  %5874 = vmatpush.bf16.msrb.mxu3 %v7410_v11  ;;  %v7408_v11 = vld [vmem:[%s8249_s17 + $0x448] sm:$0xff] }
 0x464   : > { %v4040_v59 = vld [vmem:[#allocation2 + $0x131] sm:$0xff]  ;;  %v4819_v19 = vadd.f32 %v4780_v16, %v4576_v5  ;;  %v4732_v63 = vpop.f32.mrf.mxu1  ;;  %v7403_v5 = vld [vmem:[%s8249_s17 + $0x420] sm:$0xff]  ;;  %5599 = vmatpush.bf16.msrb.mxu2 %v7394_v0  ;;  %v7392_v0 = vld [vmem:[%s8249_s17 + $0x3c8] sm:$0xff] }
 0x465   : > { %v4283_v22 = vadd.f32 %v4266_v53, %v4040_v59  ;;  %4559 = vst [vmem:[#allocation2 + $0x20] sm:$0xff] %v4543_v55  ;;  %5824 = vmatpush.bf16.msrb.mxu1 %v7403_v5  ;;  %v4304_v16 = vld [vmem:[#allocation2 + $0x60] sm:$0xff]  ;;  %v7401_v5 = vld [vmem:[%s8249_s17 + $0x410] sm:$0xff] }
 0x466   : > { %4835 = vst [vmem:[#allocation2 + $0x12] sm:$0xff] %v4819_v19  ;;  %5552 = vmatpush.bf16.msrb.mxu0 %v7384_v9 }
 0x467   : > { %4299 = vst [vmem:[#allocation2 + $0x131] sm:$0xff] %v4283_v22  ;;  %5875 = vmatpush.bf16.msrb.mxu3 %v7409_v51  ;;  %v7407_v51 = vld [vmem:[%s8249_s17 + $0x440] sm:$0xff] }
 0x468   : > { %v4505_v13 = vpop.f32.mrf.mxu2  ;;  %5600 = vmatpush.bf16.msrb.mxu2 %v7393_v37  ;;  %v7391_v37 = vld [vmem:[%s8249_s17 + $0x3c0] sm:$0xff] }
 0x469   : > { %v4506_v27 = vadd.f32 %v4505_v13, %v4456_v14  ;;  %v4781_v18 = vpop.f32.mrf.mxu3  ;;  %v4459_v10 = vpop.f32.mrf.mxu0  ;;  %5825 = vmatpush.bf16.msrb.mxu1 %v7402_v38  ;;  %v7400_v38 = vld [vmem:[%s8249_s17 + $0x408] sm:$0xff] }
 0x46a   : > { %v4782_v31 = vadd.f32 %v4781_v18, %v4732_v63  ;;  %5553 = vmatpush.bf16.msrb.mxu0 %v7383_v29 }
 0x46b   : > { %v4544_v28 = vadd.f32 %v4506_v27, %v4301_v30  ;;  %v4305_v30 = vld [vmem:[#allocation2 + $0x70] sm:$0xff]  ;;  %5876 = vmatpush.bf16.msrb.mxu3 %v7408_v11 }
 0x46c   : > { %v4577_v35 = vld [vmem:[#allocation2 + $0x22] sm:$0xff]  ;;  %v4735_v32 = vpop.f32.mrf.mxu1  ;;  %5009 = vmatmul.bf16.gmra.mxu0 %v8370_v23  ;;  %5601 = vmatpush.bf16.msrb.mxu2 %v7392_v0 }
 0x46d   : > { %4560 = vst [vmem:[#allocation2 + $0x30] sm:$0xff] %v4544_v28  ;;  %v4820_v36 = vadd.f32 %v4782_v31, %v4577_v35  ;;  %5058 = vmatmul.bf16.gmra.mxu2 %v8378_v15  ;;  %5826 = vmatpush.bf16.msrb.mxu1 %v7401_v5  ;;  %v7399_v0 = vld [vmem:[%s8249_s17 + $0x400] sm:$0xff]  ;;  %s8850_s17 = scalar_lea.vmem (!%p7231_p8), %s8834_s6, %s8139_s16 }
 0x46e   : > { %5333 = vmatmul.bf16.gmra.mxu3 %v8378_v15 }
 0x46f   : > { %4836 = vst [vmem:[#allocation2 + $0x22] sm:$0xff] %v4820_v36  ;;  %5284 = vmatmul.bf16.gmra.mxu1 %v8370_v23  ;;  %5877 = vmatpush.bf16.msrb.mxu3 %v7407_v51 }
 0x470   : > { %v4508_v17 = vpop.f32.mrf.mxu2  ;;  %5602 = vmatpush.bf16.msrb.mxu2 %v7391_v37  ;;  %v4314_v37 = vld [vmem:[#allocation2 + $0x120] sm:$0xff] }
 0x471   : > { %v4509_v40 = vadd.f32 %v4508_v17, %v4459_v10  ;;  %v4784_v42 = vpop.f32.mrf.mxu3  ;;  %v4461_v44 = vpop.f32.mrf.mxu0  ;;  %5827 = vmatpush.bf16.msrb.mxu1 %v7400_v38 }
 0x472   : > { %v4785_v2 = vadd.f32 %v4784_v42, %v4735_v32 }
 0x473   : > { %v4545_v45 = vadd.f32 %v4509_v40, %v4302_v43  ;;  %v4306_v43 = vld [vmem:[#allocation2 + $0x80] sm:$0xff] }
 0x474   : > { %v4578_v46 = vld [vmem:[#allocation2 + $0x32] sm:$0xff]  ;;  %v4737_v21 = vpop.f32.mrf.mxu1 }
 0x475   : > { %4561 = vst [vmem:[#allocation2 + $0x40] sm:$0xff] %v4545_v45  ;;  %v4821_v20 = vadd.f32 %v4785_v2, %v4578_v46  ;;  %5828 = vmatpush.bf16.msrb.mxu1 %v7399_v0 }
 0x477   : > { %4837 = vst [vmem:[#allocation2 + $0x32] sm:$0xff] %v4821_v20 }
 0x478   : > { %v4510_v52 = vpop.f32.mrf.mxu2 }
 0x479   : > { %v4511_v24 = vadd.f32 %v4510_v52, %v4461_v44  ;;  %v4786_v41 = vpop.f32.mrf.mxu3  ;;  %v4464_v4 = vpop.f32.mrf.mxu0 }
 0x47a   : > { %v4787_v3 = vadd.f32 %v4786_v41, %v4737_v21 }
 0x47b   : > { %v4546_v57 = vadd.f32 %v4511_v24, %v4303_v49  ;;  %v4307_v49 = vld [vmem:[#allocation2 + $0x90] sm:$0xff] }
 0x47c   : > { %v4579_v58 = vld [vmem:[#allocation2 + $0x42] sm:$0xff]  ;;  %v4740_v60 = vpop.f32.mrf.mxu1  ;;  %5014 = vmatmul.bf16.gmra.mxu0 %v8388_v50 }
 0x47d   : > { %4562 = vst [vmem:[#allocation2 + $0x50] sm:$0xff] %v4546_v57  ;;  %v4822_v61 = vadd.f32 %v4787_v3, %v4579_v58  ;;  %5063 = vmatmul.bf16.gmra.mxu2 %v8394_v34 }
 0x47e   : > { %5338 = vmatmul.bf16.gmra.mxu3 %v8394_v34 }
 0x47f   : > { %4838 = vst [vmem:[#allocation2 + $0x42] sm:$0xff] %v4822_v61  ;;  %5289 = vmatmul.bf16.gmra.mxu1 %v8388_v50 }
 0x480   : > { %v4513_v8 = vpop.f32.mrf.mxu2 }
 0x481   : > { %v4514_v12 = vadd.f32 %v4513_v8, %v4464_v4  ;;  %v4789_v14 = vpop.f32.mrf.mxu3  ;;  %v4466_v53 = vpop.f32.mrf.mxu0 }
 0x482   : > { %v4790_v55 = vadd.f32 %v4789_v14, %v4740_v60  ;;  %v4584_v14 = vld [vmem:[#allocation2 + $0xb2] sm:$0xff] }
 0x483   : > { %v4547_v59 = vadd.f32 %v4514_v12, %v4304_v16 }
 0x484   : > { %v4580_v19 = vld [vmem:[#allocation2 + $0x52] sm:$0xff]  ;;  %v4742_v63 = vpop.f32.mrf.mxu1 }
 0x485   : > { %4563 = vst [vmem:[#allocation2 + $0x60] sm:$0xff] %v4547_v59  ;;  %v4823_v22 = vadd.f32 %v4790_v55, %v4580_v19 }
 0x487   : > { %4839 = vst [vmem:[#allocation2 + $0x52] sm:$0xff] %v4823_v22 }
 0x488   : > { %v4515_v13 = vpop.f32.mrf.mxu2 }
 0x489   : > { %v4516_v27 = vadd.f32 %v4515_v13, %v4466_v53  ;;  %v4791_v18 = vpop.f32.mrf.mxu3  ;;  %v4469_v10 = vpop.f32.mrf.mxu0  ;;  %v4308_v53 = vld [vmem:[#allocation2 + $0xc0] sm:$0xff] }
 0x48a   : > { %v4792_v31 = vadd.f32 %v4791_v18, %v4742_v63 }
 0x48b   : > { %v4548_v28 = vadd.f32 %v4516_v27, %v4305_v30  ;;  %v4309_v30 = vld [vmem:[#allocation2 + $0xd0] sm:$0xff] }
 0x48c   : > { %v4581_v35 = vld [vmem:[#allocation2 + $0x62] sm:$0xff]  ;;  %v4745_v32 = vpop.f32.mrf.mxu1  ;;  %5019 = vmatmul.bf16.gmra.mxu0 %v8277_v56 }
 0x48d   : > { %4564 = vst [vmem:[#allocation2 + $0x70] sm:$0xff] %v4548_v28  ;;  %v4824_v36 = vadd.f32 %v4792_v31, %v4581_v35  ;;  %5068 = vmatmul.bf16.gmra.mxu2 %v8284_v6 }
 0x48e   : > { %5343 = vmatmul.bf16.gmra.mxu3 %v8284_v6 }
 0x48f   : > { %4840 = vst [vmem:[#allocation2 + $0x62] sm:$0xff] %v4824_v36  ;;  %5294 = vmatmul.bf16.gmra.mxu1 %v8277_v56 }
 0x490   : > { %v4518_v17 = vpop.f32.mrf.mxu2 }
 0x491   : > { %v4519_v40 = vadd.f32 %v4518_v17, %v4469_v10  ;;  %v4794_v42 = vpop.f32.mrf.mxu3  ;;  %v4471_v44 = vpop.f32.mrf.mxu0 }
 0x492   : > { %v4795_v2 = vadd.f32 %v4794_v42, %v4745_v32 }
 0x493   : > { %v4549_v45 = vadd.f32 %v4519_v40, %v4306_v43  ;;  %v4310_v43 = vld [vmem:[#allocation2 + $0xe0] sm:$0xff] }
 0x494   : > { %v4582_v46 = vld [vmem:[#allocation2 + $0x72] sm:$0xff]  ;;  %v4747_v21 = vpop.f32.mrf.mxu1 }
 0x495   : > { %4565 = vst [vmem:[#allocation2 + $0x80] sm:$0xff] %v4549_v45  ;;  %v4825_v20 = vadd.f32 %v4795_v2, %v4582_v46 }
 0x497   : > { %4841 = vst [vmem:[#allocation2 + $0x72] sm:$0xff] %v4825_v20 }
 0x498   : > { %v4520_v52 = vpop.f32.mrf.mxu2 }
 0x499   : > { %v4521_v24 = vadd.f32 %v4520_v52, %v4471_v44  ;;  %v4796_v41 = vpop.f32.mrf.mxu3  ;;  %v4474_v4 = vpop.f32.mrf.mxu0 }
 0x49a   : > { %v4797_v3 = vadd.f32 %v4796_v41, %v4747_v21 }
 0x49b   : > { %v4550_v57 = vadd.f32 %v4521_v24, %v4307_v49  ;;  %v4311_v49 = vld [vmem:[#allocation2 + $0xf0] sm:$0xff] }
 0x49c   : > { %v4583_v58 = vld [vmem:[#allocation2 + $0x82] sm:$0xff]  ;;  %v4750_v60 = vpop.f32.mrf.mxu1  ;;  %5024 = vmatmul.bf16.gmra.mxu0 %v8292_v33 }
 0x49d   : > { %4566 = vst [vmem:[#allocation2 + $0x90] sm:$0xff] %v4550_v57  ;;  %v4826_v61 = vadd.f32 %v4797_v3, %v4583_v58  ;;  %5073 = vmatmul.bf16.gmra.mxu2 %v8299_v47 }
 0x49e   : > { %5348 = vmatmul.bf16.gmra.mxu3 %v8299_v47 }
 0x49f   : > { %4842 = vst [vmem:[#allocation2 + $0x82] sm:$0xff] %v4826_v61  ;;  %5299 = vmatmul.bf16.gmra.mxu1 %v8292_v33 }
 0x4a0   : > { %v4523_v8 = vpop.f32.mrf.mxu2 }
 0x4a1   : > { %v4524_v12 = vadd.f32 %v4523_v8, %v4474_v4  ;;  %v4799_v16 = vpop.f32.mrf.mxu3  ;;  %v4476_v55 = vpop.f32.mrf.mxu0 }
 0x4a2   : > { %v4800_v59 = vadd.f32 %v4799_v16, %v4750_v60 }
 0x4a3   : > { %v4551_v19 = vadd.f32 %v4524_v12, %v4308_v53 }
 0x4a4   : > { %v4827_v63 = vadd.f32 %v4800_v59, %v4584_v14  ;;  %v4752_v22 = vpop.f32.mrf.mxu1  ;;  %v4312_v14 = vld [vmem:[#allocation2 + $0x100] sm:$0xff] }
 0x4a5   : > { %4567 = vst [vmem:[#allocation2 + $0xc0] sm:$0xff] %v4551_v19 }
 0x4a6   : > { %4843 = vst [vmem:[#allocation2 + $0xb2] sm:$0xff] %v4827_v63 }
 0x4a8   : > { %v4525_v13 = vpop.f32.mrf.mxu2 }
 0x4a9   : > { %v4526_v27 = vadd.f32 %v4525_v13, %v4476_v55  ;;  %v4801_v18 = vpop.f32.mrf.mxu3  ;;  %v4479_v10 = vpop.f32.mrf.mxu0  ;;  %v4313_v13 = vld [vmem:[#allocation2 + $0x110] sm:$0xff] }
 0x4aa   : > { %v4802_v31 = vadd.f32 %v4801_v18, %v4752_v22 }
 0x4ab   : > { %v4552_v28 = vadd.f32 %v4526_v27, %v4309_v30 }
 0x4ac   : > { %v4585_v35 = vld [vmem:[#allocation2 + $0xc2] sm:$0xff]  ;;  %v4755_v32 = vpop.f32.mrf.mxu1  ;;  %5029 = vmatmul.bf16.gmra.mxu0 %v8307_v1 }
 0x4ad   : > { %4568 = vst [vmem:[#allocation2 + $0xd0] sm:$0xff] %v4552_v28  ;;  %v4828_v36 = vadd.f32 %v4802_v31, %v4585_v35  ;;  %5078 = vmatmul.bf16.gmra.mxu2 %v8315_v26 }
 0x4ae   : > { %5353 = vmatmul.bf16.gmra.mxu3 %v8315_v26 }
 0x4af   : > { %4844 = vst [vmem:[#allocation2 + $0xc2] sm:$0xff] %v4828_v36  ;;  %5304 = vmatmul.bf16.gmra.mxu1 %v8307_v1 }
 0x4b0   : > { %v4528_v17 = vpop.f32.mrf.mxu2 }
 0x4b1   : > { %v4529_v40 = vadd.f32 %v4528_v17, %v4479_v10  ;;  %v4804_v42 = vpop.f32.mrf.mxu3  ;;  %v4481_v44 = vpop.f32.mrf.mxu0 }
 0x4b2   : > { %v4805_v2 = vadd.f32 %v4804_v42, %v4755_v32 }
 0x4b3   : > { %v4553_v45 = vadd.f32 %v4529_v40, %v4310_v43 }
 0x4b4   : > { %v4586_v46 = vld [vmem:[#allocation2 + $0xd2] sm:$0xff]  ;;  %v4757_v21 = vpop.f32.mrf.mxu1 }
 0x4b5   : > { %4569 = vst [vmem:[#allocation2 + $0xe0] sm:$0xff] %v4553_v45  ;;  %v4829_v20 = vadd.f32 %v4805_v2, %v4586_v46 }
 0x4b7   : > { %4845 = vst [vmem:[#allocation2 + $0xd2] sm:$0xff] %v4829_v20 }
 0x4b8   : > { %v4530_v52 = vpop.f32.mrf.mxu2 }
 0x4b9   : > { %v4531_v24 = vadd.f32 %v4530_v52, %v4481_v44  ;;  %v4806_v41 = vpop.f32.mrf.mxu3  ;;  %v4484_v4 = vpop.f32.mrf.mxu0 }
 0x4ba   : > { %v4807_v3 = vadd.f32 %v4806_v41, %v4757_v21  ;;  %v4315_v21 = vld [vmem:[#allocation2 + $0x130] sm:$0xff] }
 0x4bb   : > { %v4554_v57 = vadd.f32 %v4531_v24, %v4311_v49 }
 0x4bc   : > { %v4587_v58 = vld [vmem:[#allocation2 + $0xe2] sm:$0xff]  ;;  %v4760_v60 = vpop.f32.mrf.mxu1  ;;  %5034 = vmatmul.bf16.gmra.mxu0 %v8323_v48 }
 0x4bd   : > { %4570 = vst [vmem:[#allocation2 + $0xf0] sm:$0xff] %v4554_v57  ;;  %v4830_v61 = vadd.f32 %v4807_v3, %v4587_v58  ;;  %5083 = vmatmul.bf16.gmra.mxu2 %v8330_v62  ;;  %v5126_v3 = vld [vmem:[#allocation2 + $0x2] sm:$0xff]  ;;  %v4851_v58 = vld [vmem:[#allocation2 + $0x10] sm:$0xff] }
 0x4be   : > { %5358 = vmatmul.bf16.gmra.mxu3 %v8330_v62 }
 0x4bf   : > { %4846 = vst [vmem:[#allocation2 + $0xe2] sm:$0xff] %v4830_v61  ;;  %5309 = vmatmul.bf16.gmra.mxu1 %v8323_v48 }
 0x4c0   : > { %v4533_v5 = vpop.f32.mrf.mxu2 }
 0x4c1   : > { %v4534_v8 = vadd.f32 %v4533_v5, %v4484_v4  ;;  %v4809_v12 = vpop.f32.mrf.mxu3  ;;  %v4486_v16 = vpop.f32.mrf.mxu0 }
 0x4c2   : > { %v4810_v53 = vadd.f32 %v4809_v12, %v4760_v60 }
 0x4c3   : > { %v4555_v55 = vadd.f32 %v4534_v8, %v4312_v14 }
 0x4c4   : > { %v4588_v59 = vld [vmem:[#allocation2 + $0xf2] sm:$0xff]  ;;  %v4762_v19 = vpop.f32.mrf.mxu1 }
 0x4c5   : > { %4571 = vst [vmem:[#allocation2 + $0x100] sm:$0xff] %v4555_v55  ;;  %v4831_v63 = vadd.f32 %v4810_v53, %v4588_v59  ;;  %v4852_v53 = vld [vmem:[#allocation2 + $0x20] sm:$0xff] }
 0x4c7   : > { %4847 = vst [vmem:[#allocation2 + $0xf2] sm:$0xff] %v4831_v63 }
 0x4c8   : > { %v4535_v22 = vpop.f32.mrf.mxu2 }
 0x4c9   : > { %v4536_v9 = vadd.f32 %v4535_v22, %v4486_v16  ;;  %v4811_v11 = vpop.f32.mrf.mxu3  ;;  %v4489_v27 = vpop.f32.mrf.mxu0 }
 0x4ca   : > { %v4812_v18 = vadd.f32 %v4811_v11, %v4762_v19 }
 0x4cb   : > { %v4556_v30 = vadd.f32 %v4536_v9, %v4313_v13  ;;  %v4853_v13 = vld [vmem:[#allocation2 + $0x30] sm:$0xff] }
 0x4cc   : > { %v4589_v10 = vld [vmem:[#allocation2 + $0x102] sm:$0xff]  ;;  %v4765_v31 = vpop.f32.mrf.mxu1  ;;  %5039 = vmatmul.bf16.gmra.mxu0 %v8336_v25 }
 0x4cd   : > { %4572 = vst [vmem:[#allocation2 + $0x110] sm:$0xff] %v4556_v30  ;;  %v4832_v28 = vadd.f32 %v4812_v18, %v4589_v10  ;;  %5088 = vmatmul.bf16.gmra.mxu2 %v8343_v39 }
 0x4ce   : > { %5363 = vmatmul.bf16.gmra.mxu3 %v8343_v39 }
 0x4cf   : > { %4848 = vst [vmem:[#allocation2 + $0x102] sm:$0xff] %v4832_v28  ;;  %5314 = vmatmul.bf16.gmra.mxu1 %v8336_v25 }
 0x4d0   : > { %v4538_v35 = vpop.f32.mrf.mxu2 }
 0x4d1   : > { %v4539_v32 = vadd.f32 %v4538_v35, %v4489_v27  ;;  %v4814_v36 = vpop.f32.mrf.mxu3  ;;  %v4491_v38 = vpop.f32.mrf.mxu0 }
 0x4d2   : > { %v4815_v17 = vadd.f32 %v4814_v36, %v4765_v31 }
 0x4d3   : > { %v4557_v40 = vadd.f32 %v4539_v32, %v4314_v37  ;;  %v4854_v37 = vld [vmem:[#allocation2 + $0x40] sm:$0xff] }
 0x4d4   : > { %v4590_v42 = vld [vmem:[#allocation2 + $0x112] sm:$0xff]  ;;  %v4767_v43 = vpop.f32.mrf.mxu1 }
 0x4d5   : > { %4573 = vst [vmem:[#allocation2 + $0x120] sm:$0xff] %v4557_v40  ;;  %v4833_v44 = vadd.f32 %v4815_v17, %v4590_v42 }
 0x4d7   : > { %4849 = vst [vmem:[#allocation2 + $0x112] sm:$0xff] %v4833_v44 }
 0x4d8   : > { %v4540_v2 = vpop.f32.mrf.mxu2 }
 0x4d9   : > { %v4541_v45 = vadd.f32 %v4540_v2, %v4491_v38  ;;  %v4816_v46 = vpop.f32.mrf.mxu3  ;;  %v5005_v29 = vpop.f32.mrf.mxu0 }
 0x4da   : > { %v4817_v20 = vadd.f32 %v4816_v46, %v4767_v43 }
 0x4db   : > { %v4558_v51 = vadd.f32 %v4541_v45, %v4315_v21  ;;  %v4855_v45 = vld [vmem:[#allocation2 + $0x50] sm:$0xff] }
 0x4dc   : > { %v4591_v52 = vld [vmem:[#allocation2 + $0x122] sm:$0xff]  ;;  %v5280_v24 = vpop.f32.mrf.mxu1  ;;  %5554 = vmatmul.bf16.vlgmr.msrb.gmra.mxu0 %v8352_v54 }
 0x4dd   : > { %4574 = vst [vmem:[#allocation2 + $0x130] sm:$0xff] %v4558_v51  ;;  %v4834_v41 = vadd.f32 %v4817_v20, %v4591_v52  ;;  %5603 = vmatmul.bf16.vlgmr.msrb.gmra.mxu2 %v8360_v7 }
 0x4de   : > { %5878 = vmatmul.bf16.vlgmr.msrb.gmra.mxu3 %v8360_v7 }
 0x4df   : > { %4850 = vst [vmem:[#allocation2 + $0x122] sm:$0xff] %v4834_v41  ;;  %5829 = vmatmul.bf16.vlgmr.msrb.gmra.mxu1 %v8352_v54 }
 0x4e0   : > { %v5054_v49 = vpop.f32.mrf.mxu2 }
 0x4e1   : > { %v5055_v4 = vadd.f32 %v5054_v49, %v5005_v29  ;;  %v5329_v57 = vpop.f32.mrf.mxu3  ;;  %v5007_v60 = vpop.f32.mrf.mxu0 }
 0x4e2   : > { %v5330_v61 = vadd.f32 %v5329_v57, %v5280_v24 }
 0x4e3   : > { %v5094_v0 = vadd.f32 %v5055_v4, %v4851_v58  ;;  %v4856_v4 = vld [vmem:[#allocation2 + $0x60] sm:$0xff] }
 0x4e4   : > { %v5369_v5 = vadd.f32 %v5330_v61, %v5126_v3  ;;  %v5282_v8 = vpop.f32.mrf.mxu1 }
 0x4e5   : > { %5110 = vst [vmem:[#allocation2 + $0x10] sm:$0xff] %v5094_v0 }
 0x4e6   : > { %5385 = vst [vmem:[#allocation2 + $0x2] sm:$0xff] %v5369_v5 }
 0x4e8   : > { %v5056_v12 = vpop.f32.mrf.mxu2 }
 0x4e9   : > { %v5057_v14 = vadd.f32 %v5056_v12, %v5007_v60  ;;  %v5331_v16 = vpop.f32.mrf.mxu3  ;;  %v5010_v7 = vpop.f32.mrf.mxu0 }
 0x4ea   : > { %v5332_v55 = vadd.f32 %v5331_v16, %v5282_v8  ;;  %v4857_v8 = vld [vmem:[#allocation2 + $0x70] sm:$0xff] }
 0x4eb   : > { %v5095_v59 = vadd.f32 %v5057_v14, %v4852_v53 }
 0x4ec   : > { %v5127_v54 = vld [vmem:[#allocation2 + $0x12] sm:$0xff]  ;;  %v5285_v19 = vpop.f32.mrf.mxu1  ;;  %5559 = vmatmul.bf16.gmra.mxu0 %v8370_v23 }
 0x4ed   : > { %5111 = vst [vmem:[#allocation2 + $0x20] sm:$0xff] %v5095_v59  ;;  %v5370_v63 = vadd.f32 %v5332_v55, %v5127_v54  ;;  %5608 = vmatmul.bf16.gmra.mxu2 %v8378_v15 }
 0x4ee   : > { %5883 = vmatmul.bf16.gmra.mxu3 %v8378_v15 }
 0x4ef   : > { %5386 = vst [vmem:[#allocation2 + $0x12] sm:$0xff] %v5370_v63  ;;  %5834 = vmatmul.bf16.gmra.mxu1 %v8370_v23  ;;  %v4858_v63 = vld [vmem:[#allocation2 + $0x80] sm:$0xff] }
 0x4f0   : > { %v5059_v22 = vpop.f32.mrf.mxu2 }
 0x4f1   : > { %v5060_v9 = vadd.f32 %v5059_v22, %v5010_v7  ;;  %v5334_v11 = vpop.f32.mrf.mxu3  ;;  %v5012_v27 = vpop.f32.mrf.mxu0 }
 0x4f2   : > { %v5335_v18 = vadd.f32 %v5334_v11, %v5285_v19 }
 0x4f3   : > { %v5096_v30 = vadd.f32 %v5060_v9, %v4853_v13 }
 0x4f4   : > { %v5128_v10 = vld [vmem:[#allocation2 + $0x22] sm:$0xff]  ;;  %v5287_v31 = vpop.f32.mrf.mxu1 }
 0x4f5   : > { %5112 = vst [vmem:[#allocation2 + $0x30] sm:$0xff] %v5096_v30  ;;  %v5371_v28 = vadd.f32 %v5335_v18, %v5128_v10  ;;  %v5134_v30 = vld [vmem:[#allocation2 + $0xa2] sm:$0xff] }
 0x4f7   : > { %5387 = vst [vmem:[#allocation2 + $0x22] sm:$0xff] %v5371_v28 }
 0x4f8   : > { %v5061_v35 = vpop.f32.mrf.mxu2 }
 0x4f9   : > { %v5062_v32 = vadd.f32 %v5061_v35, %v5012_v27  ;;  %v5336_v36 = vpop.f32.mrf.mxu3  ;;  %v5015_v15 = vpop.f32.mrf.mxu0 }
 0x4fa   : > { %v5337_v38 = vadd.f32 %v5336_v36, %v5287_v31  ;;  %v4859_v31 = vld [vmem:[#allocation2 + $0xb0] sm:$0xff] }
 0x4fb   : > { %v5097_v17 = vadd.f32 %v5062_v32, %v4854_v37 }
 0x4fc   : > { %v5129_v23 = vld [vmem:[#allocation2 + $0x32] sm:$0xff]  ;;  %v5290_v40 = vpop.f32.mrf.mxu1  ;;  %5564 = vmatmul.bf16.gmra.mxu0 %v8388_v50 }
 0x4fd   : > { %5113 = vst [vmem:[#allocation2 + $0x40] sm:$0xff] %v5097_v17  ;;  %v5372_v42 = vadd.f32 %v5337_v38, %v5129_v23  ;;  %5613 = vmatmul.bf16.gmra.mxu2 %v8394_v34  ;;  %v4860_v23 = vld [vmem:[#allocation2 + $0xc0] sm:$0xff] }
 0x4fe   : > { %5888 = vmatmul.bf16.gmra.mxu3 %v8394_v34 }
 0x4ff   : > { %5388 = vst [vmem:[#allocation2 + $0x32] sm:$0xff] %v5372_v42  ;;  %5839 = vmatmul.bf16.gmra.mxu1 %v8388_v50 }
 0x500   : > { %v5064_v43 = vpop.f32.mrf.mxu2 }
 0x501   : > { %v5065_v44 = vadd.f32 %v5064_v43, %v5015_v15  ;;  %v5339_v2 = vpop.f32.mrf.mxu3  ;;  %v5017_v46 = vpop.f32.mrf.mxu0 }
 0x502   : > { %v5340_v21 = vadd.f32 %v5339_v2, %v5290_v40 }
 0x503   : > { %v5098_v20 = vadd.f32 %v5065_v44, %v4855_v45 }
 0x504   : > { %v5130_v29 = vld [vmem:[#allocation2 + $0x42] sm:$0xff]  ;;  %v5292_v51 = vpop.f32.mrf.mxu1 }
 0x505   : > { %5114 = vst [vmem:[#allocation2 + $0x50] sm:$0xff] %v5098_v20  ;;  %v5373_v52 = vadd.f32 %v5340_v21, %v5130_v29  ;;  %v4861_v21 = vld [vmem:[#allocation2 + $0xd0] sm:$0xff] }
 0x507   : > { %5389 = vst [vmem:[#allocation2 + $0x42] sm:$0xff] %v5373_v52 }
 0x508   : > { %v5066_v24 = vpop.f32.mrf.mxu2 }
 0x509   : > { %v5067_v41 = vadd.f32 %v5066_v24, %v5017_v46  ;;  %v5341_v49 = vpop.f32.mrf.mxu3  ;;  %v5020_v34 = vpop.f32.mrf.mxu0 }
 0x50a   : > { %v5342_v3 = vadd.f32 %v5341_v49, %v5292_v51 }
 0x50b   : > { %v5099_v57 = vadd.f32 %v5067_v41, %v4856_v4 }
 0x50c   : > { %v5131_v50 = vld [vmem:[#allocation2 + $0x52] sm:$0xff]  ;;  %v5295_v58 = vpop.f32.mrf.mxu1  ;;  %5569 = vmatmul.bf16.gmra.mxu0 %v8277_v56 }
 0x50d   : > { %5115 = vst [vmem:[#allocation2 + $0x60] sm:$0xff] %v5099_v57  ;;  %v5374_v60 = vadd.f32 %v5342_v3, %v5131_v50  ;;  %5618 = vmatmul.bf16.gmra.mxu2 %v8284_v6  ;;  %v4862_v3 = vld [vmem:[#allocation2 + $0xe0] sm:$0xff] }
 0x50e   : > { %5893 = vmatmul.bf16.gmra.mxu3 %v8284_v6 }
 0x50f   : > { %5390 = vst [vmem:[#allocation2 + $0x52] sm:$0xff] %v5374_v60  ;;  %5844 = vmatmul.bf16.gmra.mxu1 %v8277_v56 }
 0x510   : > { %v5069_v61 = vpop.f32.mrf.mxu2 }
 0x511   : > { %v5070_v0 = vadd.f32 %v5069_v61, %v5020_v34  ;;  %v5344_v5 = vpop.f32.mrf.mxu3  ;;  %v5022_v12 = vpop.f32.mrf.mxu0 }
 0x512   : > { %v5345_v14 = vadd.f32 %v5344_v5, %v5295_v58 }
 0x513   : > { %v5100_v16 = vadd.f32 %v5070_v0, %v4857_v8  ;;  %v4863_v8 = vld [vmem:[#allocation2 + $0xf0] sm:$0xff] }
 0x514   : > { %v5132_v53 = vld [vmem:[#allocation2 + $0x62] sm:$0xff]  ;;  %v5297_v7 = vpop.f32.mrf.mxu1 }
 0x515   : > { %5116 = vst [vmem:[#allocation2 + $0x70] sm:$0xff] %v5100_v16  ;;  %v5375_v55 = vadd.f32 %v5345_v14, %v5132_v53 }
 0x517   : > { %5391 = vst [vmem:[#allocation2 + $0x62] sm:$0xff] %v5375_v55 }
 0x518   : > { %v5071_v59 = vpop.f32.mrf.mxu2 }
 0x519   : > { %v5072_v54 = vadd.f32 %v5071_v59, %v5022_v12  ;;  %v5346_v19 = vpop.f32.mrf.mxu3  ;;  %v5025_v6 = vpop.f32.mrf.mxu0 }
 0x51a   : > { %v5347_v22 = vadd.f32 %v5346_v19, %v5297_v7 }
 0x51b   : > { %v5101_v9 = vadd.f32 %v5072_v54, %v4858_v63  ;;  %v4864_v63 = vld [vmem:[#allocation2 + $0x100] sm:$0xff] }
 0x51c   : > { %v5133_v56 = vld [vmem:[#allocation2 + $0x72] sm:$0xff]  ;;  %v5300_v11 = vpop.f32.mrf.mxu1  ;;  %5574 = vmatmul.bf16.gmra.mxu0 %v8292_v33 }
 0x51d   : > { %5117 = vst [vmem:[#allocation2 + $0x80] sm:$0xff] %v5101_v9  ;;  %v5376_v13 = vadd.f32 %v5347_v22, %v5133_v56  ;;  %5623 = vmatmul.bf16.gmra.mxu2 %v8299_v47 }
 0x51e   : > { %5898 = vmatmul.bf16.gmra.mxu3 %v8299_v47 }
 0x51f   : > { %5392 = vst [vmem:[#allocation2 + $0x72] sm:$0xff] %v5376_v13  ;;  %5849 = vmatmul.bf16.gmra.mxu1 %v8292_v33 }
 0x520   : > { %v5074_v27 = vpop.f32.mrf.mxu2 }
 0x521   : > { %v5075_v18 = vadd.f32 %v5074_v27, %v5025_v6  ;;  %v5349_v10 = vpop.f32.mrf.mxu3  ;;  %v5027_v28 = vpop.f32.mrf.mxu0 }
 0x522   : > { %v5350_v35 = vadd.f32 %v5349_v10, %v5300_v11 }
 0x523   : > { %v5102_v32 = vadd.f32 %v5075_v18, %v4859_v31  ;;  %v4865_v18 = vld [vmem:[#allocation2 + $0x110] sm:$0xff] }
 0x524   : > { %v5377_v36 = vadd.f32 %v5350_v35, %v5134_v30  ;;  %v5302_v37 = vpop.f32.mrf.mxu1 }
 0x525   : > { %5118 = vst [vmem:[#allocation2 + $0xb0] sm:$0xff] %v5102_v32 }
 0x526   : > { %5393 = vst [vmem:[#allocation2 + $0xa2] sm:$0xff] %v5377_v36 }
 0x528   : > { %v5076_v15 = vpop.f32.mrf.mxu2 }
 0x529   : > { %v5077_v38 = vadd.f32 %v5076_v15, %v5027_v28  ;;  %v5351_v17 = vpop.f32.mrf.mxu3  ;;  %v5030_v47 = vpop.f32.mrf.mxu0 }
 0x52a   : > { %v5352_v40 = vadd.f32 %v5351_v17, %v5302_v37 }
 0x52b   : > { %v5103_v42 = vadd.f32 %v5077_v38, %v4860_v23  ;;  %v4866_v38 = vld [vmem:[#allocation2 + $0x120] sm:$0xff] }
 0x52c   : > { %v5135_v33 = vld [vmem:[#allocation2 + $0xb2] sm:$0xff]  ;;  %v5305_v43 = vpop.f32.mrf.mxu1  ;;  %5579 = vmatmul.bf16.gmra.mxu0 %v8307_v1 }
 0x52d   : > { %5119 = vst [vmem:[#allocation2 + $0xc0] sm:$0xff] %v5103_v42  ;;  %v5378_v44 = vadd.f32 %v5352_v40, %v5135_v33  ;;  %5628 = vmatmul.bf16.gmra.mxu2 %v8315_v26 }
 0x52e   : > { %5903 = vmatmul.bf16.gmra.mxu3 %v8315_v26 }
 0x52f   : > { %5394 = vst [vmem:[#allocation2 + $0xb2] sm:$0xff] %v5378_v44  ;;  %5854 = vmatmul.bf16.gmra.mxu1 %v8307_v1  ;;  %v5401_v44 = vld [vmem:[#allocation2 + $0x1] sm:$0xff] }
 0x530   : > { %v5079_v2 = vpop.f32.mrf.mxu2 }
 0x531   : > { %v5080_v45 = vadd.f32 %v5079_v2, %v5030_v47  ;;  %v5354_v46 = vpop.f32.mrf.mxu3  ;;  %v5032_v20 = vpop.f32.mrf.mxu0 }
 0x532   : > { %v5355_v29 = vadd.f32 %v5354_v46, %v5305_v43 }
 0x533   : > { %v5104_v51 = vadd.f32 %v5080_v45, %v4861_v21 }
 0x534   : > { %v5136_v52 = vld [vmem:[#allocation2 + $0xc2] sm:$0xff]  ;;  %v5307_v24 = vpop.f32.mrf.mxu1 }
 0x535   : > { %5120 = vst [vmem:[#allocation2 + $0xd0] sm:$0xff] %v5104_v51  ;;  %v5379_v41 = vadd.f32 %v5355_v29, %v5136_v52  ;;  %v5402_v52 = vld [vmem:[#allocation2 + $0x11] sm:$0xff] }
 0x537   : > { %5395 = vst [vmem:[#allocation2 + $0xc2] sm:$0xff] %v5379_v41 }
 0x538   : > { %v5081_v49 = vpop.f32.mrf.mxu2 }
 0x539   : > { %v5082_v4 = vadd.f32 %v5081_v49, %v5032_v20  ;;  %v5356_v34 = vpop.f32.mrf.mxu3  ;;  %v5035_v26 = vpop.f32.mrf.mxu0 }
 0x53a   : > { %v5357_v57 = vadd.f32 %v5356_v34, %v5307_v24 }
 0x53b   : > { %v5105_v50 = vadd.f32 %v5082_v4, %v4862_v3 }
 0x53c   : > { %v5137_v1 = vld [vmem:[#allocation2 + $0xd2] sm:$0xff]  ;;  %v5310_v58 = vpop.f32.mrf.mxu1  ;;  %5584 = vmatmul.bf16.gmra.mxu0 %v8323_v48 }
 0x53d   : > { %5121 = vst [vmem:[#allocation2 + $0xe0] sm:$0xff] %v5105_v50  ;;  %v5380_v60 = vadd.f32 %v5357_v57, %v5137_v1  ;;  %5633 = vmatmul.bf16.gmra.mxu2 %v8330_v62  ;;  %v5403_v50 = vld [vmem:[#allocation2 + $0x21] sm:$0xff] }
 0x53e   : > { %5908 = vmatmul.bf16.gmra.mxu3 %v8330_v62 }
 0x53f   : > { %5396 = vst [vmem:[#allocation2 + $0xd2] sm:$0xff] %v5380_v60  ;;  %5859 = vmatmul.bf16.gmra.mxu1 %v8323_v48 }
 0x540   : > { %v5084_v61 = vpop.f32.mrf.mxu2 }
 0x541   : > { %v5085_v0 = vadd.f32 %v5084_v61, %v5035_v26  ;;  %v5359_v5 = vpop.f32.mrf.mxu3  ;;  %v5037_v12 = vpop.f32.mrf.mxu0 }
 0x542   : > { %v5360_v14 = vadd.f32 %v5359_v5, %v5310_v58 }
 0x543   : > { %v5106_v16 = vadd.f32 %v5085_v0, %v4863_v8 }
 0x544   : > { %v5138_v53 = vld [vmem:[#allocation2 + $0xe2] sm:$0xff]  ;;  %v5312_v7 = vpop.f32.mrf.mxu1 }
 0x545   : > { %5122 = vst [vmem:[#allocation2 + $0xf0] sm:$0xff] %v5106_v16  ;;  %v5381_v55 = vadd.f32 %v5360_v14, %v5138_v53  ;;  %v5404_v53 = vld [vmem:[#allocation2 + $0x31] sm:$0xff] }
 0x547   : > { %5397 = vst [vmem:[#allocation2 + $0xe2] sm:$0xff] %v5381_v55 }
 0x548   : > { %v5086_v59 = vpop.f32.mrf.mxu2 }
 0x549   : > { %v5087_v54 = vadd.f32 %v5086_v59, %v5037_v12  ;;  %v5361_v19 = vpop.f32.mrf.mxu3  ;;  %v5040_v62 = vpop.f32.mrf.mxu0 }
 0x54a   : > { %v5362_v6 = vadd.f32 %v5361_v19, %v5312_v7 }
 0x54b   : > { %v5107_v22 = vadd.f32 %v5087_v54, %v4864_v63 }
 0x54c   : > { %v5139_v48 = vld [vmem:[#allocation2 + $0xf2] sm:$0xff]  ;;  %v5315_v9 = vpop.f32.mrf.mxu1  ;;  %5589 = vmatmul.bf16.gmra.mxu0 %v8336_v25 }
 0x54d   : > { %5123 = vst [vmem:[#allocation2 + $0x100] sm:$0xff] %v5107_v22  ;;  %v5382_v56 = vadd.f32 %v5362_v6, %v5139_v48  ;;  %5638 = vmatmul.bf16.gmra.mxu2 %v8343_v39  ;;  %v5405_v22 = vld [vmem:[#allocation2 + $0x41] sm:$0xff] }
 0x54e   : > { %5913 = vmatmul.bf16.gmra.mxu3 %v8343_v39 }
 0x54f   : > { %5398 = vst [vmem:[#allocation2 + $0xf2] sm:$0xff] %v5382_v56  ;;  %5864 = vmatmul.bf16.gmra.mxu1 %v8336_v25 }
 0x550   : > { %v5089_v11 = vpop.f32.mrf.mxu2 }
 0x551   : > { %v5090_v13 = vadd.f32 %v5089_v11, %v5040_v62  ;;  %v5364_v27 = vpop.f32.mrf.mxu3  ;;  %v5042_v30 = vpop.f32.mrf.mxu0 }
 0x552   : > { %v5365_v10 = vadd.f32 %v5364_v27, %v5315_v9 }
 0x553   : > { %v5108_v31 = vadd.f32 %v5090_v13, %v4865_v18 }
 0x554   : > { %v5140_v28 = vld [vmem:[#allocation2 + $0x102] sm:$0xff]  ;;  %v5317_v35 = vpop.f32.mrf.mxu1 }
 0x555   : > { %5124 = vst [vmem:[#allocation2 + $0x110] sm:$0xff] %v5108_v31  ;;  %v5383_v32 = vadd.f32 %v5365_v10, %v5140_v28  ;;  %v5406_v28 = vld [vmem:[#allocation2 + $0x51] sm:$0xff] }
 0x557   : > { %5399 = vst [vmem:[#allocation2 + $0x102] sm:$0xff] %v5383_v32 }
 0x558   : > { %v5091_v36 = vpop.f32.mrf.mxu2 }
 0x559   : > { %v5092_v37 = vadd.f32 %v5091_v36, %v5042_v30  ;;  %v5366_v15 = vpop.f32.mrf.mxu3  ;;  %v5555_v17 = vpop.f32.mrf.mxu0 }
 0x55a   : > { %v5367_v39 = vadd.f32 %v5366_v15, %v5317_v35 }
 0x55b   : > { %v5109_v23 = vadd.f32 %v5092_v37, %v4866_v38 }
 0x55c   : > { %v5141_v25 = vld [vmem:[#allocation2 + $0x112] sm:$0xff]  ;;  %v5830_v47 = vpop.f32.mrf.mxu1 }
 0x55d   : > { %5125 = vst [vmem:[#allocation2 + $0x120] sm:$0xff] %v5109_v23  ;;  %v5384_v40 = vadd.f32 %v5367_v39, %v5141_v25  ;;  %v5407_v23 = vld [vmem:[#allocation2 + $0x61] sm:$0xff] }
 0x55f   : > { %5400 = vst [vmem:[#allocation2 + $0x112] sm:$0xff] %v5384_v40 }
 0x560   : > { %v5604_v42 = vpop.f32.mrf.mxu2 }
 0x561   : > { %v5605_v33 = vadd.f32 %v5604_v42, %v5555_v17  ;;  %v5879_v43 = vpop.f32.mrf.mxu3  ;;  %v5557_v2 = vpop.f32.mrf.mxu0 }
 0x562   : > { %v5880_v20 = vadd.f32 %v5879_v43, %v5830_v47 }
 0x563   : > { %v5644_v45 = vadd.f32 %v5605_v33, %v5401_v44 }
 0x564   : > { %v5832_v46 = vpop.f32.mrf.mxu1 }
 0x565   : > { %5660 = vst [vmem:[#allocation2 + $0x1] sm:$0xff] %v5644_v45 }
 0x568   : > { %v5606_v21 = vpop.f32.mrf.mxu2 }
 0x569   : > { %v5607_v29 = vadd.f32 %v5606_v21, %v5557_v2  ;;  %v5881_v51 = vpop.f32.mrf.mxu3  ;;  %v5560_v24 = vpop.f32.mrf.mxu0  ;;  %v5408_v21 = vld [vmem:[#allocation2 + $0x71] sm:$0xff] }
 0x56a   : > { %v5882_v58 = vadd.f32 %v5881_v51, %v5832_v46 }
 0x56b   : > { %v5645_v41 = vadd.f32 %v5607_v29, %v5402_v52 }
 0x56c   : > { %v5676_v49 = vld [vmem:[#allocation2] sm:$0xff]  ;;  %v5835_v4 = vpop.f32.mrf.mxu1 }
 0x56d   : > { %v5919_v34 = vadd.f32 %v5880_v20, %v5676_v49  ;;  %5661 = vst [vmem:[#allocation2 + $0x11] sm:$0xff] %v5645_v41 }
 0x56f   : > { %5935 = vst [vmem:[#allocation2] sm:$0xff] %v5919_v34  ;;  %v5409_v34 = vld [vmem:[#allocation2 + $0xa1] sm:$0xff] }
 0x570   : > { %v5609_v3 = vpop.f32.mrf.mxu2 }
 0x571   : > { %v5610_v26 = vadd.f32 %v5609_v3, %v5560_v24  ;;  %v5884_v57 = vpop.f32.mrf.mxu3  ;;  %v5562_v1 = vpop.f32.mrf.mxu0 }
 0x572   : > { %v5885_v12 = vadd.f32 %v5884_v57, %v5835_v4 }
 0x573   : > { %v5646_v60 = vadd.f32 %v5610_v26, %v5403_v50 }
 0x574   : > { %v5677_v61 = vld [vmem:[#allocation2 + $0x10] sm:$0xff]  ;;  %v5837_v0 = vpop.f32.mrf.mxu1 }
 0x575   : > { %v5920_v5 = vadd.f32 %v5882_v58, %v5677_v61  ;;  %5662 = vst [vmem:[#allocation2 + $0x21] sm:$0xff] %v5646_v60 }
 0x577   : > { %5936 = vst [vmem:[#allocation2 + $0x10] sm:$0xff] %v5920_v5 }
 0x578   : > { %v5611_v8 = vpop.f32.mrf.mxu2 }
 0x579   : > { %v5612_v14 = vadd.f32 %v5611_v8, %v5562_v1  ;;  %v5886_v16 = vpop.f32.mrf.mxu3  ;;  %v5565_v7 = vpop.f32.mrf.mxu0  ;;  %v5410_v8 = vld [vmem:[#allocation2 + $0xb1] sm:$0xff] }
 0x57a   : > { %v5887_v9 = vadd.f32 %v5886_v16, %v5837_v0 }
 0x57b   : > { %v5647_v55 = vadd.f32 %v5612_v14, %v5404_v53 }
 0x57c   : > { %v5678_v59 = vld [vmem:[#allocation2 + $0x20] sm:$0xff]  ;;  %v5840_v54 = vpop.f32.mrf.mxu1 }
 0x57d   : > { %v5921_v19 = vadd.f32 %v5885_v12, %v5678_v59  ;;  %5663 = vst [vmem:[#allocation2 + $0x31] sm:$0xff] %v5647_v55 }
 0x57f   : > { %5937 = vst [vmem:[#allocation2 + $0x20] sm:$0xff] %v5921_v19  ;;  %v5411_v19 = vld [vmem:[#allocation2 + $0xc1] sm:$0xff] }
 0x580   : > { %v5614_v63 = vpop.f32.mrf.mxu2 }
 0x581   : > { %v5615_v62 = vadd.f32 %v5614_v63, %v5565_v7  ;;  %v5889_v6 = vpop.f32.mrf.mxu3  ;;  %v5567_v48 = vpop.f32.mrf.mxu0 }
 0x582   : > { %v5890_v30 = vadd.f32 %v5889_v6, %v5840_v54 }
 0x583   : > { %v5648_v56 = vadd.f32 %v5615_v62, %v5405_v22 }
 0x584   : > { %v5679_v11 = vld [vmem:[#allocation2 + $0x30] sm:$0xff]  ;;  %v5842_v13 = vpop.f32.mrf.mxu1 }
 0x585   : > { %v5922_v27 = vadd.f32 %v5887_v9, %v5679_v11  ;;  %5664 = vst [vmem:[#allocation2 + $0x41] sm:$0xff] %v5648_v56 }
 0x587   : > { %5938 = vst [vmem:[#allocation2 + $0x30] sm:$0xff] %v5922_v27 }
 0x588   : > { %v5616_v18 = vpop.f32.mrf.mxu2 }
 0x589   : > { %v5617_v10 = vadd.f32 %v5616_v18, %v5567_v48  ;;  %v5891_v31 = vpop.f32.mrf.mxu3  ;;  %v5570_v35 = vpop.f32.mrf.mxu0  ;;  %v5412_v18 = vld [vmem:[#allocation2 + $0xd1] sm:$0xff] }
 0x58a   : > { %v5892_v47 = vadd.f32 %v5891_v31, %v5842_v13 }
 0x58b   : > { %v5649_v32 = vadd.f32 %v5617_v10, %v5406_v28 }
 0x58c   : > { %v5680_v36 = vld [vmem:[#allocation2 + $0x40] sm:$0xff]  ;;  %v5845_v37 = vpop.f32.mrf.mxu1 }
 0x58d   : > { %v5923_v15 = vadd.f32 %v5890_v30, %v5680_v36  ;;  %5665 = vst [vmem:[#allocation2 + $0x51] sm:$0xff] %v5649_v32  ;;  %v5413_v36 = vld [vmem:[#allocation2 + $0xe1] sm:$0xff] }
 0x58f   : > { %5939 = vst [vmem:[#allocation2 + $0x40] sm:$0xff] %v5923_v15 }
 0x590   : > { %v5619_v38 = vpop.f32.mrf.mxu2 }
 0x591   : > { %v5620_v39 = vadd.f32 %v5619_v38, %v5570_v35  ;;  %v5894_v17 = vpop.f32.mrf.mxu3  ;;  %v5572_v25 = vpop.f32.mrf.mxu0 }
 0x592   : > { %v5895_v2 = vadd.f32 %v5894_v17, %v5845_v37 }
 0x593   : > { %v5650_v40 = vadd.f32 %v5620_v39, %v5407_v23 }
 0x594   : > { %v5681_v42 = vld [vmem:[#allocation2 + $0x50] sm:$0xff]  ;;  %v5847_v33 = vpop.f32.mrf.mxu1 }
 0x595   : > { %v5924_v43 = vadd.f32 %v5892_v47, %v5681_v42  ;;  %5666 = vst [vmem:[#allocation2 + $0x61] sm:$0xff] %v5650_v40 }
 0x597   : > { %5940 = vst [vmem:[#allocation2 + $0x50] sm:$0xff] %v5924_v43 }
 0x598   : > { %v5621_v44 = vpop.f32.mrf.mxu2 }
 0x599   : > { %v5622_v45 = vadd.f32 %v5621_v44, %v5572_v25  ;;  %v5896_v46 = vpop.f32.mrf.mxu3  ;;  %v5575_v20 = vpop.f32.mrf.mxu0 }
 0x59a   : > { %v5897_v26 = vadd.f32 %v5896_v46, %v5847_v33  ;;  %v5414_v33 = vld [vmem:[#allocation2 + $0xf1] sm:$0xff] }
 0x59b   : > { %v5651_v29 = vadd.f32 %v5622_v45, %v5408_v21 }
 0x59c   : > { %v5682_v51 = vld [vmem:[#allocation2 + $0x60] sm:$0xff]  ;;  %v5850_v52 = vpop.f32.mrf.mxu1 }
 0x59d   : > { %v5925_v24 = vadd.f32 %v5895_v2, %v5682_v51  ;;  %5667 = vst [vmem:[#allocation2 + $0x71] sm:$0xff] %v5651_v29  ;;  %v5415_v51 = vld [vmem:[#allocation2 + $0x101] sm:$0xff] }
 0x59f   : > { %5941 = vst [vmem:[#allocation2 + $0x60] sm:$0xff] %v5925_v24 }
 0x5a0   : > { %v5624_v41 = vpop.f32.mrf.mxu2 }
 0x5a1   : > { %v5625_v49 = vadd.f32 %v5624_v41, %v5575_v20  ;;  %v5899_v4 = vpop.f32.mrf.mxu3  ;;  %v5577_v3 = vpop.f32.mrf.mxu0 }
 0x5a2   : > { %v5900_v61 = vadd.f32 %v5899_v4, %v5850_v52 }
 0x5a3   : > { %v5652_v57 = vadd.f32 %v5625_v49, %v5409_v34 }
 0x5a4   : > { %v5683_v50 = vld [vmem:[#allocation2 + $0x70] sm:$0xff]  ;;  %v5852_v1 = vpop.f32.mrf.mxu1 }
 0x5a5   : > { %v5926_v58 = vadd.f32 %v5897_v26, %v5683_v50  ;;  %5668 = vst [vmem:[#allocation2 + $0xa1] sm:$0xff] %v5652_v57 }
 0x5a7   : > { %5942 = vst [vmem:[#allocation2 + $0x70] sm:$0xff] %v5926_v58 }
 0x5a8   : > { %v5626_v60 = vpop.f32.mrf.mxu2 }
 0x5a9   : > { %v5627_v0 = vadd.f32 %v5626_v60, %v5577_v3  ;;  %v5901_v5 = vpop.f32.mrf.mxu3  ;;  %v5580_v12 = vpop.f32.mrf.mxu0 }
 0x5aa   : > { %v5902_v62 = vadd.f32 %v5901_v5, %v5852_v1  ;;  %v5416_v1 = vld [vmem:[#allocation2 + $0x111] sm:$0xff] }
 0x5ab   : > { %v5653_v14 = vadd.f32 %v5627_v0, %v5410_v8 }
 0x5ac   : > { %v5684_v16 = vld [vmem:[#allocation2 + $0xa0] sm:$0xff]  ;;  %v5855_v7 = vpop.f32.mrf.mxu1 }
 0x5ad   : > { %v5927_v53 = vadd.f32 %v5900_v61, %v5684_v16  ;;  %5669 = vst [vmem:[#allocation2 + $0xb1] sm:$0xff] %v5653_v14 }
 0x5af   : > { %5943 = vst [vmem:[#allocation2 + $0xa0] sm:$0xff] %v5927_v53 }
 0x5b0   : > { %v5629_v55 = vpop.f32.mrf.mxu2 }
 0x5b1   : > { %v5630_v59 = vadd.f32 %v5629_v55, %v5580_v12  ;;  %v5904_v54 = vpop.f32.mrf.mxu3  ;;  %v5582_v63 = vpop.f32.mrf.mxu0 }
 0x5b2   : > { %v5905_v11 = vadd.f32 %v5904_v54, %v5855_v7 }
 0x5b3   : > { %v5654_v6 = vadd.f32 %v5630_v59, %v5411_v19 }
 0x5b4   : > { %v5685_v22 = vld [vmem:[#allocation2 + $0xb0] sm:$0xff]  ;;  %v5857_v56 = vpop.f32.mrf.mxu1 }
 0x5b5   : > { %v5928_v48 = vadd.f32 %v5902_v62, %v5685_v22  ;;  %5670 = vst [vmem:[#allocation2 + $0xc1] sm:$0xff] %v5654_v6 }
 0x5b7   : > { %5944 = vst [vmem:[#allocation2 + $0xb0] sm:$0xff] %v5928_v48 }
 0x5b8   : > { %v5631_v9 = vpop.f32.mrf.mxu2 }
 0x5b9   : > { %v5632_v13 = vadd.f32 %v5631_v9, %v5582_v63  ;;  %v5906_v27 = vpop.f32.mrf.mxu3  ;;  %v5585_v30 = vpop.f32.mrf.mxu0 }
 0x5ba   : > { %v5907_v38 = vadd.f32 %v5906_v27, %v5857_v56 }
 0x5bb   : > { %v5655_v10 = vadd.f32 %v5632_v13, %v5412_v18 }
 0x5bc   : > { %v5686_v31 = vld [vmem:[#allocation2 + $0xc0] sm:$0xff]  ;;  %v5860_v37 = vpop.f32.mrf.mxu1 }
 0x5bd   : > { %v5929_v28 = vadd.f32 %v5905_v11, %v5686_v31  ;;  %5671 = vst [vmem:[#allocation2 + $0xd1] sm:$0xff] %v5655_v10 }
 0x5bf   : > { %5945 = vst [vmem:[#allocation2 + $0xc0] sm:$0xff] %v5929_v28 }
 0x5c0   : > { %v5634_v35 = vpop.f32.mrf.mxu2 }
 0x5c1   : > { %v5635_v32 = vadd.f32 %v5634_v35, %v5585_v30  ;;  %v5909_v15 = vpop.f32.mrf.mxu3  ;;  %v5587_v23 = vpop.f32.mrf.mxu0 }
 0x5c2   : > { %v5910_v40 = vadd.f32 %v5909_v15, %v5860_v37 }
 0x5c3   : > { %v5656_v39 = vadd.f32 %v5635_v32, %v5413_v36 }
 0x5c4   : > { %v5687_v17 = vld [vmem:[#allocation2 + $0xd0] sm:$0xff]  ;;  %v5862_v2 = vpop.f32.mrf.mxu1 }
 0x5c5   : > { %v5930_v25 = vadd.f32 %v5907_v38, %v5687_v17  ;;  %5672 = vst [vmem:[#allocation2 + $0xe1] sm:$0xff] %v5656_v39 }
 0x5c7   : > { %5946 = vst [vmem:[#allocation2 + $0xd0] sm:$0xff] %v5930_v25 }
 0x5c8   : > { %v5636_v47 = vpop.f32.mrf.mxu2 }
 0x5c9   : > { %v5637_v42 = vadd.f32 %v5636_v47, %v5587_v23  ;;  %v5911_v45 = vpop.f32.mrf.mxu3  ;;  %v5590_v21 = vpop.f32.mrf.mxu0 }
 0x5ca   : > { %v5912_v52 = vadd.f32 %v5911_v45, %v5862_v2 }
 0x5cb   : > { %v5657_v43 = vadd.f32 %v5637_v42, %v5414_v33 }
 0x5cc   : > { %v5688_v44 = vld [vmem:[#allocation2 + $0xe0] sm:$0xff]  ;;  %v5865_v4 = vpop.f32.mrf.mxu1 }
 0x5cd   : > { %v5931_v46 = vadd.f32 %v5910_v40, %v5688_v44  ;;  %5673 = vst [vmem:[#allocation2 + $0xf1] sm:$0xff] %v5657_v43 }
 0x5cf   : > { %5947 = vst [vmem:[#allocation2 + $0xe0] sm:$0xff] %v5931_v46 }
 0x5d0   : > { %v5639_v20 = vpop.f32.mrf.mxu2 }
 0x5d1   : > { %v5640_v29 = vadd.f32 %v5639_v20, %v5590_v21  ;;  %v5914_v34 = vpop.f32.mrf.mxu3  ;;  %v5592_v3 = vpop.f32.mrf.mxu0 }
 0x5d2   : > { %v5915_v57 = vadd.f32 %v5914_v34, %v5865_v4 }
 0x5d3   : > { %v5658_v24 = vadd.f32 %v5640_v29, %v5415_v51 }
 0x5d4   : > { %v5689_v41 = vld [vmem:[#allocation2 + $0xf0] sm:$0xff]  ;;  %v5867_v0 = vpop.f32.mrf.mxu1 }
 0x5d5   : > { %v5932_v49 = vadd.f32 %v5912_v52, %v5689_v41  ;;  %5674 = vst [vmem:[#allocation2 + $0x101] sm:$0xff] %v5658_v24 }
 0x5d7   : > { %5948 = vst [vmem:[#allocation2 + $0xf0] sm:$0xff] %v5932_v49 }
 0x5d8   : > { %v5641_v26 = vpop.f32.mrf.mxu2 }
 0x5d9   : > { %v5642_v50 = vadd.f32 %v5641_v26, %v5592_v3  ;;  %v5916_v5 = vpop.f32.mrf.mxu3 }
 0x5da   : > { %v5917_v8 = vadd.f32 %v5916_v5, %v5867_v0 }
 0x5db   : > { %v5659_v58 = vadd.f32 %v5642_v50, %v5416_v1 }
 0x5dc   : > { %v5690_v60 = vld [vmem:[#allocation2 + $0x100] sm:$0xff] }
 0x5dd   : > { %v5933_v61 = vadd.f32 %v5915_v57, %v5690_v60  ;;  %5675 = vst [vmem:[#allocation2 + $0x111] sm:$0xff] %v5659_v58 }
 0x5df   : > { %5949 = vst [vmem:[#allocation2 + $0x100] sm:$0xff] %v5933_v61 }
 0x5e3   : > { %5954 = sbr.rel (%p7231_p8) target bundleno = 1535 (0x5ff), region = 150 }
 0x5e4   : > { %v5691_v12 = vld [vmem:[#allocation2 + $0x110] sm:$0xff] }
 0x5e5   : > { %v5934_v14 = vadd.f32 %v5917_v8, %v5691_v12 }
 0x5e7   : > { %5950 = vst [vmem:[#allocation2 + $0x110] sm:$0xff] %v5934_v14 }
 0x5e8   : > { %v5955_v16 = vld [vmem:[#allocation2 + $0x11] sm:$0xff]  ;;  %v7513_v53 = vld [vmem:[%s2903_s18] ss:$0 sm:$0xff]  ;;  %v5956_v55 = vld [vmem:[#allocation2 + $0x21] sm:$0xff] }
 0x5e9   : > { %v8743_v7 = vld [vmem:[%s8850_s17] ss:$0 sm:$0xff]  ;;  %v5975_v59 = vmul.f32 %v7513_v53, %v5955_v16  ;;  %v5976_v54 = vmul.f32 %v7513_v53, %v5956_v55  ;;  %v5957_v19 = vld [vmem:[#allocation2 + $0x31] sm:$0xff]  ;;  %v5958_v63 = vld [vmem:[#allocation2 + $0x41] sm:$0xff] }
 0x5ea   : > { %v5959_v62 = vld [vmem:[#allocation2 + $0x51] sm:$0xff]  ;;  %v5977_v6 = vmul.f32 %v7513_v53, %v5957_v19  ;;  %v5978_v22 = vmul.f32 %v7513_v53, %v5958_v63  ;;  %v5960_v9 = vld [vmem:[#allocation2 + $0x61] sm:$0xff] }
 0x5eb   : > { %v5979_v48 = vmul.f32 %v7513_v53, %v5959_v62  ;;  %v5961_v56 = vld [vmem:[#allocation2 + $0x71] sm:$0xff]  ;;  %v5962_v11 = vld [vmem:[#allocation2 + $0x81] sm:$0xff]  ;;  %v5995_v13 = vadd.f32 %v8743_v7, %v5975_v59  ;;  %v5996_v27 = vadd.f32 %v8743_v7, %v5976_v54  ;;  %v5980_v18 = vmul.f32 %v7513_v53, %v5960_v9 }
 0x5ec   : > { %v5981_v30 = vmul.f32 %v7513_v53, %v5961_v56  ;;  %v5997_v10 = vadd.f32 %v8743_v7, %v5977_v6  ;;  %v5998_v31 = vadd.f32 %v8743_v7, %v5978_v22  ;;  %v5982_v35 = vmul.f32 %v7513_v53, %v5962_v11  ;;  %v5963_v32 = vld [vmem:[#allocation2 + $0xb1] sm:$0xff]  ;;  %v5964_v36 = vld [vmem:[#allocation2 + $0xc1] sm:$0xff] }
 0x5ed   : > { %v5999_v28 = vadd.f32 %v8743_v7, %v5979_v48  ;;  %v6011_v37 = vmax.f32 %v5995_v13, 0.0  ;;  %v6012_v15 = vmax.f32 %v5996_v27, 0.0  ;;  %v6000_v38 = vadd.f32 %v8743_v7, %v5980_v18  ;;  %v5965_v17 = vld [vmem:[#allocation2 + $0xd1] sm:$0xff]  ;;  %v5966_v23 = vld [vmem:[#allocation2 + $0xe1] sm:$0xff] }
 0x5ee   : > { %v6001_v39 = vadd.f32 %v8743_v7, %v5981_v30  ;;  %v5967_v25 = vld [vmem:[#allocation2 + $0xf1] sm:$0xff]  ;;  %v6013_v47 = vmax.f32 %v5997_v10, 0.0  ;;  %v6014_v40 = vmax.f32 %v5998_v31, 0.0  ;;  %v6002_v42 = vadd.f32 %v8743_v7, %v5982_v35  ;;  %v5968_v33 = vld [vmem:[#allocation2 + $0x101] sm:$0xff] }
 0x5ef   : > { %v5969_v43 = vld [vmem:[#allocation2 + $0x111] sm:$0xff]  ;;  %6027 = vst [vmem:[%s8440_s12] sm:$0xff] %v6011_v37  ;;  %v6015_v44 = vmax.f32 %v5999_v28, 0.0  ;;  %v6016_v2 = vmax.f32 %v6000_v38, 0.0  ;;  %v5983_v45 = vmul.f32 %v7513_v53, %v5963_v32  ;;  %v5984_v46 = vmul.f32 %v7513_v53, %v5964_v36  ;;  %v5970_v21 = vld [vmem:[#allocation2 + $0x121] sm:$0xff] }
 0x5f0   : > { %6028 = vst [vmem:[%s8440_s12 + $0x8] sm:$0xff] %v6012_v15  ;;  %v6017_v20 = vmax.f32 %v6001_v39, 0.0  ;;  %v5985_v29 = vmul.f32 %v7513_v53, %v5965_v17  ;;  %v5986_v51 = vmul.f32 %v7513_v53, %v5966_v23  ;;  %v5987_v52 = vmul.f32 %v7513_v53, %v5967_v25 }
 0x5f1   : > { %6029 = vst [vmem:[%s8440_s12 + $0x10] sm:$0xff] %v6013_v47  ;;  %v6003_v24 = vadd.f32 %v8743_v7, %v5983_v45  ;;  %v6004_v41 = vadd.f32 %v8743_v7, %v5984_v46  ;;  %v5988_v49 = vmul.f32 %v7513_v53, %v5968_v33  ;;  %v5989_v4 = vmul.f32 %v7513_v53, %v5969_v43 }
 0x5f2   : > { %6030 = vst [vmem:[%s8440_s12 + $0x18] sm:$0xff] %v6014_v40  ;;  %v6018_v34 = vmax.f32 %v6002_v42, 0.0  ;;  %v6005_v3 = vadd.f32 %v8743_v7, %v5985_v29  ;;  %v6006_v26 = vadd.f32 %v8743_v7, %v5986_v51  ;;  %v5990_v57 = vmul.f32 %v7513_v53, %v5970_v21 }
 0x5f3   : > { %6031 = vst [vmem:[%s8440_s12 + $0x20] sm:$0xff] %v6015_v44  ;;  %v6019_v50 = vmax.f32 %v6003_v24, 0.0  ;;  %v6007_v1 = vadd.f32 %v8743_v7, %v5987_v52  ;;  %v6020_v58 = vmax.f32 %v6004_v41, 0.0  ;;  %v6008_v60 = vadd.f32 %v8743_v7, %v5988_v49 }
 0x5f4   : > { %6032 = vst [vmem:[%s8440_s12 + $0x28] sm:$0xff] %v6016_v2  ;;  %v6021_v61 = vmax.f32 %v6005_v3, 0.0  ;;  %v6009_v0 = vadd.f32 %v8743_v7, %v5989_v4  ;;  %v6022_v5 = vmax.f32 %v6006_v26, 0.0  ;;  %v6010_v8 = vadd.f32 %v8743_v7, %v5990_v57 }
 0x5f5   : > { %6033 = vst [vmem:[%s8440_s12 + $0x30] sm:$0xff] %v6017_v20  ;;  %v6023_v12 = vmax.f32 %v6007_v1, 0.0  ;;  %v6024_v14 = vmax.f32 %v6008_v60, 0.0 }
 0x5f6   : > { %6034 = vst [vmem:[%s8440_s12 + $0x38] sm:$0xff] %v6018_v34  ;;  %v6025_v16 = vmax.f32 %v6009_v0, 0.0  ;;  %v6026_v53 = vmax.f32 %v6010_v8, 0.0 }
 0x5f7   : > { %6035 = vst [vmem:[%s8440_s12 + $0x40] sm:$0xff] %v6019_v50 }
 0x5f8   : > { %6036 = vst [vmem:[%s8440_s12 + $0x48] sm:$0xff] %v6020_v58 }
 0x5f9   : > { %6037 = vst [vmem:[%s8440_s12 + $0x50] sm:$0xff] %v6021_v61 }
 0x5fa   : > { %6038 = vst [vmem:[%s8440_s12 + $0x58] sm:$0xff] %v6022_v5 }
 0x5fb   : > { %6039 = vst [vmem:[%s8440_s12 + $0x60] sm:$0xff] %v6023_v12 }
 0x5fc   : > { %6040 = vst [vmem:[%s8440_s12 + $0x68] sm:$0xff] %v6024_v14 }
 0x5fd   : > { %6041 = vst [vmem:[%s8440_s12 + $0x70] sm:$0xff] %v6025_v16 }
 0x5fe   : > { %6042 = vst [vmem:[%s8440_s12 + $0x78] sm:$0xff] %v6026_v53 }
 0x5ff PF: > { %s7233_s29 = sshll.u32 %s7613_s30, 3  ;;  %s6055_s1 = sshll.u32 %s8440_s12, 4  ;;  %s6056_s1 = int_to_ptr.vmem [resolvable:$true] %s6055_s1 }
 0x600   : > { %s6054_s27 = scalar_lea.hbm %s8835_s7, %s7233_s29  ;;  %s8851_s20 = sand.u32 1, %s7593_s25  }
 0x601   : > { %s6057_s22 = sshll.u32 %s6054_s27, 4  ;;  %s6044_s14 = scalar_lea.sflag [#allocation6], %s8851_s20  ;;  %s6058_s22 = int_to_ptr.hbm [resolvable:$true] %s6057_s22 }
 0x602   : > { %s7529_s13 = sshra.s32 %s6058_s22, 4  ;;  %s7535_s30 = scalar_lea.hbm %s8835_s7, 256  ;;  %s7530_s13 = int_to_ptr.hbm [resolvable:$true] %s7529_s13 }
 0x603   : > { %s7531_s21 = scalar_lea.hbm %s7530_s13, 128  ;;  %p7536_p13 = scmp.lt.s32.totalorder %s7530_s13, %s8835_s7 }
 0x604   : > { %p7532_p9 = scmp.ne.s32.totalorder %s7530_s13, %s7531_s21  ;;  %p7537_p0 = scmp.lt.s32.totalorder %s7535_s30, %s7531_s21 }
 0x606   : > { %p7533_p10 = pnand %p7532_p9, %p7742_p7  ;;  %p7538_p1 = por %p7537_p0, %p7536_p13 }
 0x608   : > { %p7534_p11 = pneg %p7533_p10 }
 0x60a   : > { %p7539_p2 = pnand %p7538_p1, %p7534_p11 }
 0x60c   : > { %7542 = shalt.err (!%p7539_p2)
}
 0x60d   : > { %s7627_s12 = smov 128   ;;  %s7628_s29 = smov 256  }
 0x60e   : > { %s7629_s18 = smov 8  }
 0x60f   : > { %7423 = dma.vmem_to_hbm [thread:$0]  (%p7742_p7), %s6056_s1, 2048, %s6058_s22, %s6044_s14, %s7627_s12, %s7628_s29, %s7629_s18  }
 0x610 PF: > { %p7429_p3 = scmp.ge.s32.totalorder %s7625_s10, 2  ;;  %s6072_s20 = sand.u32 1, %s7589_s24  }
 0x611   : > { %s6073_s0 = scalar_lea.sflag [#allocation6], %s6072_s20 }
 0x612   : > { %p7426_p4 = pnand %p7429_p3, %p7750_p12 }
 0x614   : > { %p7427_p5 = pneg %p7426_p4 }
 0x616   : > { %7584 = dma.done.wait (%p7427_p5), %s6073_s0, 2048  }
 0x617   : > { %7586 = vsyncadd (%p7427_p5), %s6073_s0, 4294965248  ;;  %s20_s10 = sadd.s32 1, %s7625_s10   ;;  %s8853_s19 = sld [smem:[#allocation8_spill]] }
 0x618   : > { %p17_p6 = scmp.ge.s32.totalorder %s20_s10, 6   ;;  %s8854_s1 = sld [smem:[#allocation9_spill]] }
 0x619   : > { %s8855_s24 = smov %s7593_s25  ;;  %s8856_s25 = smov %s7597_s26 }
 0x61a   : > { %s8857_s26 = smov %s7755_s23  ;;  %s8858_s27 = smov %s7605_s28 }
 0x61b   : > { %s8859_s28 = smov %s7758_s11  ;;  %s8860_s29 = smov %s7617_s8 }
 0x61c   : > { %s8861_s30 = smov %s7621_s9  ;;  %19 = sbr.rel (!%p17_p6) target bundleno = 9 (0x9), region = 229 }
 0x61d   : > { %s8862_s8 = smov %s8853_s19 }
 0x61e   : > { %s8863_s9 = smov %s8854_s1 }
 0x621   :  { %6079 = vsyncpa [#allocation6], 1 }
 0x622   :  { %6081 = vsyncpa [#allocation6 + $0x1], 1 }

</bundles_post_ra>
